<compile_context>
chip_gen: v6e
topology: v6e:2x2x1
jax: 0.10.0
libtpu: 0.0.40
codegen_flags: <defaults>
</compile_context>

<pallas_src>
import math

import jax
import jax.numpy as jnp
from jax import lax
from jax.experimental import pallas as pl
from jax.experimental.pallas import tpu as pltpu

ENC_I, ENC_H, ENC_O = 379, 600, 160
MU_LEN = 80
DEC_I, DEC_H, DEC_O = 80, 600, 379
DROP_RATE = 0.1
TRAINING = True            # fresh nn.Module defaults to train() -> Dropout active
N_DROPOUT = 4              # two dropouts in the encoder, two in the decoder
BIAS_ROWS = 6
BIAS_PAD = 640             # 600 rounded up to a multiple of 128 lanes

WEIGHT_ORDER = ("ew1", "ew2", "ew3", "dw1", "dw2", "dw3")
BIAS_ORDER = ("eb1", "eb2", "eb3", "db1", "db2", "db3")
BIAS_SIZES = (ENC_H, ENC_H, ENC_O, DEC_H, DEC_H, DEC_O)


# ---------------------------------------------------------------------------
# Elementwise helpers (trace-time functions; lower to VPU/EUP ops, all in f32)
# ---------------------------------------------------------------------------
def _elu(x):
    # nn.ELU(alpha=1.0)
    return jnp.where(x > 0.0, x, jnp.exp(jnp.minimum(x, 0.0)) - 1.0)


def _softplus(x):
    # nn.Softplus(beta=1, threshold=20): linear above the threshold
    return jnp.where(x > 20.0, x, jnp.log1p(jnp.exp(jnp.minimum(x, 20.0))))


def _sigmoid(x):
    # TODO(synk): could use pl.reciprocal(..., approx=True) on the EUP slot, but
    # the plain form is interpret-mode safe and this op is negligible here.
    return 1.0 / (1.0 + jnp.exp(-x))


def _dropout(x, u):
    # Training-mode inverted dropout; u is a precomputed uniform in [0, 1).
    if not TRAINING or DROP_RATE == 0.0:
        return x
    keep = 1.0 - DROP_RATE
    return jnp.where(u < keep, x * (1.0 / keep), jnp.zeros_like(x))


# ---------------------------------------------------------------------------
# Kernel: full VAE forward (encoder -> reparameterize -> decoder) per batch tile
# ---------------------------------------------------------------------------
def vae_kernel(x_ref, noise_ref, u_ref,
               ew1, ew2, ew3, dw1, dw2, dw3, b_ref,
               ms_ref, out_ref):
    bf16 = jnp.bfloat16
    f32 = jnp.float32

    def linear(h, w_ref, bias_row, width):
        # bf16 operands on the MXU, f32 accumulation, f32 bias add.
        b = b_ref[bias_row:bias_row + 1, :width]                       # (1, width) f32
        acc = jnp.dot(h.astype(bf16), w_ref[...], preferred_element_type=f32)
        return acc + b

    x = x_ref[...]                                                     # (tb, 379) f32

    # ----- encoder: Linear -> ELU -> Dropout -> Linear -> Tanh -> Dropout -> Linear
    h = _dropout(_elu(linear(x, ew1, 0, ENC_H)), u_ref[0])
    h = _dropout(jnp.tanh(linear(h, ew2, 1, ENC_H)), u_ref[1])
    h3 = linear(h, ew3, 2, ENC_O)                                      # (tb, 160) f32

    # Packed [mu | softplus(sigma_raw)] -> single lane-dense output write.
    col = lax.broadcasted_iota(jnp.int32, h3.shape, 1)
    ms = jnp.where(col < MU_LEN, h3, _softplus(h3))
    ms_ref[...] = ms

    # ----- reparameterization: z = mu + sigma * N(0, 1)
    mu = ms[:, :MU_LEN]
    sigma = ms[:, MU_LEN:]
    z = mu + sigma * noise_ref[...]

    # ----- decoder: Linear -> Tanh -> Dropout -> Linear -> ELU -> Dropout
    #                -> Linear -> Softplus -> Sigmoid
    d = _dropout(jnp.tanh(linear(z, dw1, 3, DEC_H)), u_ref[2])
    d = _dropout(_elu(linear(d, dw2, 4, DEC_H)), u_ref[3])
    d = linear(d, dw3, 5, DEC_O)
    out_ref[...] = _sigmoid(_softplus(d))


# ---------------------------------------------------------------------------
# Wrapper
# ---------------------------------------------------------------------------
def _round_up(n, m):
    return (n + m - 1) // m * m


def vae_forward(x, noise, drop_u, weights, bias_buf):
    """x: (B,379) f32, noise: (B,80) f32, drop_u: (4,B,600) f32 uniforms,
    weights: 6 bf16 matrices (in,out) layout, bias_buf: (6,640) f32."""
    B = x.shape[0]
    tb = min(128, _round_up(B, 8))          # batch tile (8-aligned, <= 128)
    Bp = _round_up(B, tb)
    if Bp != B:
        x = jnp.pad(x, ((0, Bp - B), (0, 0)))
        noise = jnp.pad(noise, ((0, Bp - B), (0, 0)))
        drop_u = jnp.pad(drop_u, ((0, 0), (0, Bp - B), (0, 0)))
    grid = (Bp // tb,)

    def batch_spec(cols):
        return pl.BlockSpec((tb, cols), lambda i: (i, 0))

    def const_spec(shape):
        return pl.BlockSpec(shape, lambda i, _n=len(shape): (0,) * _n)

    in_specs = [
        batch_spec(ENC_I),                                            # x
        batch_spec(MU_LEN),                                           # noise
        pl.BlockSpec((N_DROPOUT, tb, ENC_H), lambda i: (0, i, 0)),    # dropout uniforms
        const_spec((ENC_I, ENC_H)),                                   # ew1 (resident)
        const_spec((ENC_H, ENC_H)),                                   # ew2
        const_spec((ENC_H, ENC_O)),                                   # ew3 (mu|sigma merged)
        const_spec((DEC_I, DEC_H)),                                   # dw1
        const_spec((DEC_H, DEC_H)),                                   # dw2
        const_spec((DEC_H, DEC_O)),                                   # dw3
        const_spec((BIAS_ROWS, BIAS_PAD)),                            # packed biases
    ]
    out_specs = (batch_spec(ENC_O), batch_spec(DEC_O))
    out_shape = (jax.ShapeDtypeStruct((Bp, ENC_O), jnp.float32),      # [mu | sigma]
                 jax.ShapeDtypeStruct((Bp, DEC_O), jnp.float32))      # decoder output

    ms, out = pl.pallas_call(
        vae_kernel,
        grid=grid,
        in_specs=in_specs,
        out_specs=out_specs,
        out_shape=out_shape,
        compiler_params=pltpu.CompilerParams(
            dimension_semantics=("parallel",),          # v7x: both TCs split the batch
            vmem_limit_bytes=16 * 1024 * 1024),         # valid on v7x's 64 MiB VMEM
    )(x, noise, drop_u, *weights, bias_buf)

    ms = ms[:B]
    out = out[:B]
    return ms[:, :MU_LEN], ms[:, MU_LEN:], out


# ---------------------------------------------------------------------------
# Parameter construction / packing
# ---------------------------------------------------------------------------
def init_params(key):
    """PyTorch nn.Linear default init; weights stored TRANSPOSED: (in, out)."""
    def linear(k, fan_in, fan_out):
        k_w, k_b = jax.random.split(k)
        bound = 1.0 / math.sqrt(fan_in)
        w = jax.random.uniform(k_w, (fan_in, fan_out), jnp.float32, -bound, bound)
        b = jax.random.uniform(k_b, (fan_out,), jnp.float32, -bound, bound)
        return w, b

    keys = jax.random.split(key, 6)
    p = {}
    p["ew1"], p["eb1"] = linear(keys[0], ENC_I, ENC_H)
    p["ew2"], p["eb2"] = linear(keys[1], ENC_H, ENC_H)
    p["ew3"], p["eb3"] = linear(keys[2], ENC_H, ENC_O)   # mu/sigma heads kept merged
    p["dw1"], p["db1"] = linear(keys[3], DEC_I, DEC_H)
    p["dw2"], p["db2"] = linear(keys[4], DEC_H, DEC_H)
    p["dw3"], p["db3"] = linear(keys[5], DEC_H, DEC_O)
    return p


def pack_params(p):
    """bf16 weights + all biases packed (f32) into one lane-padded (6,640) buffer."""
    weights = tuple(p[k].astype(jnp.bfloat16) for k in WEIGHT_ORDER)
    bias_buf = jnp.zeros((BIAS_ROWS, BIAS_PAD), jnp.float32)
    for i, (name, size) in enumerate(zip(BIAS_ORDER, BIAS_SIZES)):
        bias_buf = bias_buf.at[i, :size].set(p[name].reshape(-1))
    return weights, bias_buf


if __name__ == "__main__":
    key = jax.random.PRNGKey(0)
    k_param, k_x, k_noise, k_drop = jax.random.split(key, 4)

    batch = 8
    params = init_params(k_param)
    weights, bias_buf = pack_params(params)

    x = jax.random.normal(k_x, (batch, ENC_I), dtype=jnp.float32)
    # torch.randn(sigma.shape) equivalent, drawn deterministically up front.
    noise = jax.random.normal(k_noise, (batch, MU_LEN), dtype=jnp.float32)
    # Uniform randoms for the four training-mode Dropout layers.
    drop_u = jax.random.uniform(k_drop, (N_DROPOUT, batch, ENC_H), dtype=jnp.float32)

    mu, sigma, output = jax.block_until_ready(
        vae_forward(x, noise, drop_u, weights, bias_buf))

    assert mu.shape == (batch, MU_LEN) and mu.dtype == jnp.float32
    assert sigma.shape == (batch, MU_LEN) and sigma.dtype == jnp.float32
    assert output.shape == (batch, DEC_O) and output.dtype == jnp.float32
    assert bool(jnp.all(jnp.isfinite(mu)))
    assert bool(jnp.all(sigma >= 0.0))
    assert bool(jnp.all((output >= 0.5) & (output <= 1.0)))  # sigmoid(softplus(.)) >= 0.5

    print("KERNEL_OK")
</pallas_src>

<mosaic_0001>
module attributes {stable_mosaic.version = 11 : i64} {
  func.func @vae_kernel(%arg0: i32, %arg1: memref<8x379xf32, #tpu.memory_space<vmem>>, %arg2: memref<8x80xf32, #tpu.memory_space<vmem>>, %arg3: memref<4x8x600xf32, #tpu.memory_space<vmem>>, %arg4: memref<379x600xbf16, #tpu.memory_space<vmem>>, %arg5: memref<600x600xbf16, #tpu.memory_space<vmem>>, %arg6: memref<600x160xbf16, #tpu.memory_space<vmem>>, %arg7: memref<80x600xbf16, #tpu.memory_space<vmem>>, %arg8: memref<600x600xbf16, #tpu.memory_space<vmem>>, %arg9: memref<600x379xbf16, #tpu.memory_space<vmem>>, %arg10: memref<6x640xf32, #tpu.memory_space<vmem>>, %arg11: memref<8x160xf32, #tpu.memory_space<vmem>>, %arg12: memref<8x379xf32, #tpu.memory_space<vmem>>) attributes {dimension_semantics = [#tpu.dimension_semantics<parallel>], iteration_bounds = array<i64: 1>, scalar_prefetch = 0 : i64, scratch_operands = 0 : i64, tpu.core_type = #tpu.core_type<tc>, window_params = [{transform_indices = @transform_0, window_bounds = array<i64: 8, 379>}, {transform_indices = @transform_1, window_bounds = array<i64: 8, 80>}, {transform_indices = @transform_2, window_bounds = array<i64: 4, 8, 600>}, {pipeline_mode = #tpu.pipeline_mode<synchronous>, transform_indices = @transform_3, window_bounds = array<i64: 379, 600>}, {pipeline_mode = #tpu.pipeline_mode<synchronous>, transform_indices = @transform_4, window_bounds = array<i64: 600, 600>}, {pipeline_mode = #tpu.pipeline_mode<synchronous>, transform_indices = @transform_5, window_bounds = array<i64: 600, 160>}, {pipeline_mode = #tpu.pipeline_mode<synchronous>, transform_indices = @transform_6, window_bounds = array<i64: 80, 600>}, {pipeline_mode = #tpu.pipeline_mode<synchronous>, transform_indices = @transform_7, window_bounds = array<i64: 600, 600>}, {pipeline_mode = #tpu.pipeline_mode<synchronous>, transform_indices = @transform_8, window_bounds = array<i64: 600, 379>}, {pipeline_mode = #tpu.pipeline_mode<synchronous>, transform_indices = @transform_9, window_bounds = array<i64: 6, 640>}, {transform_indices = @transform_10, window_bounds = array<i64: 8, 160>}, {transform_indices = @transform_11, window_bounds = array<i64: 8, 379>}]} {
    %c0 = arith.constant 0 : index
    %c0_0 = arith.constant 0 : index
    %0 = vector.load %arg1[%c0, %c0_0] : memref<8x379xf32, #tpu.memory_space<vmem>>, vector<8x379xf32>
    %c0_1 = arith.constant 0 : index
    %c0_2 = arith.constant 0 : index
    %1 = vector.load %arg10[%c0_1, %c0_2] : memref<6x640xf32, #tpu.memory_space<vmem>>, vector<1x600xf32>
    %2 = arith.truncf %0 : vector<8x379xf32> to vector<8x379xbf16>
    %c0_3 = arith.constant 0 : index
    %c0_4 = arith.constant 0 : index
    %3 = vector.load %arg4[%c0_3, %c0_4] : memref<379x600xbf16, #tpu.memory_space<vmem>>, vector<379x600xbf16>
    %cst = arith.constant dense<0.000000e+00> : vector<8x600xf32>
    %4 = tpu.matmul %2, %3, %cst {dimension_numbers = #tpu.dot_dimension_numbers<[1], [0], [0], [1], [0, 0, 1, 1], [], []>} : vector<8x379xbf16>, vector<379x600xbf16>, vector<8x600xf32> -> vector<8x600xf32>
    %5 = vector.broadcast %1 : vector<1x600xf32> to vector<8x600xf32>
    %6 = arith.addf %4, %5 : vector<8x600xf32>
    %cst_5 = arith.constant 0.000000e+00 : f32
    %7 = vector.broadcast %cst_5 : f32 to vector<8x600xf32>
    %8 = arith.cmpf ogt, %6, %7 : vector<8x600xf32>
    %cst_6 = arith.constant 0.000000e+00 : f32
    %9 = vector.broadcast %cst_6 : f32 to vector<8x600xf32>
    %10 = arith.minimumf %6, %9 : vector<8x600xf32>
    %11 = math.exp %10 : vector<8x600xf32>
    %cst_7 = arith.constant 1.000000e+00 : f32
    %12 = vector.broadcast %cst_7 : f32 to vector<8x600xf32>
    %13 = arith.subf %11, %12 : vector<8x600xf32>
    %14 = arith.select %8, %6, %13 : vector<8x600xi1>, vector<8x600xf32>
    %c0_8 = arith.constant 0 : index
    %c0_9 = arith.constant 0 : index
    %c0_10 = arith.constant 0 : index
    %15 = vector.load %arg3[%c0_8, %c0_9, %c0_10] : memref<4x8x600xf32, #tpu.memory_space<vmem>>, vector<1x8x600xf32>
    %16 = vector.shape_cast %15 : vector<1x8x600xf32> to vector<8x600xf32>
    %cst_11 = arith.constant 0.899999976 : f32
    %17 = vector.broadcast %cst_11 : f32 to vector<8x600xf32>
    %18 = arith.cmpf olt, %16, %17 : vector<8x600xf32>
    %cst_12 = arith.constant 1.11111116 : f32
    %19 = vector.broadcast %cst_12 : f32 to vector<8x600xf32>
    %20 = arith.mulf %14, %19 : vector<8x600xf32>
    %cst_13 = arith.constant 0.000000e+00 : f32
    %21 = vector.broadcast %cst_13 : f32 to vector<8x600xf32>
    %22 = arith.select %18, %20, %21 : vector<8x600xi1>, vector<8x600xf32>
    %c1 = arith.constant 1 : index
    %c0_14 = arith.constant 0 : index
    %23 = vector.load %arg10[%c1, %c0_14] : memref<6x640xf32, #tpu.memory_space<vmem>>, vector<1x600xf32>
    %24 = arith.truncf %22 : vector<8x600xf32> to vector<8x600xbf16>
    %c0_15 = arith.constant 0 : index
    %c0_16 = arith.constant 0 : index
    %25 = vector.load %arg5[%c0_15, %c0_16] : memref<600x600xbf16, #tpu.memory_space<vmem>>, vector<600x600xbf16>
    %cst_17 = arith.constant dense<0.000000e+00> : vector<8x600xf32>
    %26 = tpu.matmul %24, %25, %cst_17 {dimension_numbers = #tpu.dot_dimension_numbers<[1], [0], [0], [1], [0, 0, 1, 1], [], []>} : vector<8x600xbf16>, vector<600x600xbf16>, vector<8x600xf32> -> vector<8x600xf32>
    %27 = vector.broadcast %23 : vector<1x600xf32> to vector<8x600xf32>
    %28 = arith.addf %26, %27 : vector<8x600xf32>
    %29 = math.tanh %28 : vector<8x600xf32>
    %c1_18 = arith.constant 1 : index
    %c0_19 = arith.constant 0 : index
    %c0_20 = arith.constant 0 : index
    %30 = vector.load %arg3[%c1_18, %c0_19, %c0_20] : memref<4x8x600xf32, #tpu.memory_space<vmem>>, vector<1x8x600xf32>
    %31 = vector.shape_cast %30 : vector<1x8x600xf32> to vector<8x600xf32>
    %cst_21 = arith.constant 0.899999976 : f32
    %32 = vector.broadcast %cst_21 : f32 to vector<8x600xf32>
    %33 = arith.cmpf olt, %31, %32 : vector<8x600xf32>
    %cst_22 = arith.constant 1.11111116 : f32
    %34 = vector.broadcast %cst_22 : f32 to vector<8x600xf32>
    %35 = arith.mulf %29, %34 : vector<8x600xf32>
    %cst_23 = arith.constant 0.000000e+00 : f32
    %36 = vector.broadcast %cst_23 : f32 to vector<8x600xf32>
    %37 = arith.select %33, %35, %36 : vector<8x600xi1>, vector<8x600xf32>
    %c2 = arith.constant 2 : index
    %c0_24 = arith.constant 0 : index
    %38 = vector.load %arg10[%c2, %c0_24] : memref<6x640xf32, #tpu.memory_space<vmem>>, vector<1x160xf32>
    %39 = arith.truncf %37 : vector<8x600xf32> to vector<8x600xbf16>
    %c0_25 = arith.constant 0 : index
    %c0_26 = arith.constant 0 : index
    %40 = vector.load %arg6[%c0_25, %c0_26] : memref<600x160xbf16, #tpu.memory_space<vmem>>, vector<600x160xbf16>
    %cst_27 = arith.constant dense<0.000000e+00> : vector<8x160xf32>
    %41 = tpu.matmul %39, %40, %cst_27 {dimension_numbers = #tpu.dot_dimension_numbers<[1], [0], [0], [1], [0, 0, 1, 1], [], []>} : vector<8x600xbf16>, vector<600x160xbf16>, vector<8x160xf32> -> vector<8x160xf32>
    %42 = vector.broadcast %38 : vector<1x160xf32> to vector<8x160xf32>
    %43 = arith.addf %41, %42 : vector<8x160xf32>
    %44 = tpu.iota {dimensions = array<i32: 1>} : vector<8x160xi32>
    %c80_i32 = arith.constant 80 : i32
    %45 = vector.broadcast %c80_i32 : i32 to vector<8x160xi32>
    %46 = arith.cmpi slt, %44, %45 : vector<8x160xi32>
    %cst_28 = arith.constant 2.000000e+01 : f32
    %47 = vector.broadcast %cst_28 : f32 to vector<8x160xf32>
    %48 = arith.cmpf ogt, %43, %47 : vector<8x160xf32>
    %cst_29 = arith.constant 2.000000e+01 : f32
    %49 = vector.broadcast %cst_29 : f32 to vector<8x160xf32>
    %50 = arith.minimumf %43, %49 : vector<8x160xf32>
    %51 = math.exp %50 : vector<8x160xf32>
    %52 = math.log1p %51 : vector<8x160xf32>
    %53 = arith.select %48, %43, %52 : vector<8x160xi1>, vector<8x160xf32>
    %54 = arith.select %46, %43, %53 : vector<8x160xi1>, vector<8x160xf32>
    %c0_30 = arith.constant 0 : index
    %c0_31 = arith.constant 0 : index
    %55 = vector.load %arg11[%c0_30, %c0_31] : memref<8x160xf32, #tpu.memory_space<vmem>>, vector<8x160xf32>
    tpu.vector_store %arg11[%c0_30, %c0_31], %54 {strides = array<i32>} : memref<8x160xf32, #tpu.memory_space<vmem>>, vector<8x160xf32>,
    %56 = vector.extract_strided_slice %54 {offsets = [0, 0], sizes = [8, 80], strides = [1, 1]} : vector<8x160xf32> to vector<8x80xf32>
    %57 = vector.extract_strided_slice %54 {offsets = [0, 80], sizes = [8, 80], strides = [1, 1]} : vector<8x160xf32> to vector<8x80xf32>
    %c0_32 = arith.constant 0 : index
    %c0_33 = arith.constant 0 : index
    %58 = vector.load %arg2[%c0_32, %c0_33] : memref<8x80xf32, #tpu.memory_space<vmem>>, vector<8x80xf32>
    %59 = arith.mulf %57, %58 : vector<8x80xf32>
    %60 = arith.addf %56, %59 : vector<8x80xf32>
    %c3 = arith.constant 3 : index
    %c0_34 = arith.constant 0 : index
    %61 = vector.load %arg10[%c3, %c0_34] : memref<6x640xf32, #tpu.memory_space<vmem>>, vector<1x600xf32>
    %62 = arith.truncf %60 : vector<8x80xf32> to vector<8x80xbf16>
    %c0_35 = arith.constant 0 : index
    %c0_36 = arith.constant 0 : index
    %63 = vector.load %arg7[%c0_35, %c0_36] : memref<80x600xbf16, #tpu.memory_space<vmem>>, vector<80x600xbf16>
    %cst_37 = arith.constant dense<0.000000e+00> : vector<8x600xf32>
    %64 = tpu.matmul %62, %63, %cst_37 {dimension_numbers = #tpu.dot_dimension_numbers<[1], [0], [0], [1], [0, 0, 1, 1], [], []>} : vector<8x80xbf16>, vector<80x600xbf16>, vector<8x600xf32> -> vector<8x600xf32>
    %65 = vector.broadcast %61 : vector<1x600xf32> to vector<8x600xf32>
    %66 = arith.addf %64, %65 : vector<8x600xf32>
    %67 = math.tanh %66 : vector<8x600xf32>
    %c2_38 = arith.constant 2 : index
    %c0_39 = arith.constant 0 : index
    %c0_40 = arith.constant 0 : index
    %68 = vector.load %arg3[%c2_38, %c0_39, %c0_40] : memref<4x8x600xf32, #tpu.memory_space<vmem>>, vector<1x8x600xf32>
    %69 = vector.shape_cast %68 : vector<1x8x600xf32> to vector<8x600xf32>
    %cst_41 = arith.constant 0.899999976 : f32
    %70 = vector.broadcast %cst_41 : f32 to vector<8x600xf32>
    %71 = arith.cmpf olt, %69, %70 : vector<8x600xf32>
    %cst_42 = arith.constant 1.11111116 : f32
    %72 = vector.broadcast %cst_42 : f32 to vector<8x600xf32>
    %73 = arith.mulf %67, %72 : vector<8x600xf32>
    %cst_43 = arith.constant 0.000000e+00 : f32
    %74 = vector.broadcast %cst_43 : f32 to vector<8x600xf32>
    %75 = arith.select %71, %73, %74 : vector<8x600xi1>, vector<8x600xf32>
    %c4 = arith.constant 4 : index
    %c0_44 = arith.constant 0 : index
    %76 = vector.load %arg10[%c4, %c0_44] : memref<6x640xf32, #tpu.memory_space<vmem>>, vector<1x600xf32>
    %77 = arith.truncf %75 : vector<8x600xf32> to vector<8x600xbf16>
    %c0_45 = arith.constant 0 : index
    %c0_46 = arith.constant 0 : index
    %78 = vector.load %arg8[%c0_45, %c0_46] : memref<600x600xbf16, #tpu.memory_space<vmem>>, vector<600x600xbf16>
    %cst_47 = arith.constant dense<0.000000e+00> : vector<8x600xf32>
    %79 = tpu.matmul %77, %78, %cst_47 {dimension_numbers = #tpu.dot_dimension_numbers<[1], [0], [0], [1], [0, 0, 1, 1], [], []>} : vector<8x600xbf16>, vector<600x600xbf16>, vector<8x600xf32> -> vector<8x600xf32>
    %80 = vector.broadcast %76 : vector<1x600xf32> to vector<8x600xf32>
    %81 = arith.addf %79, %80 : vector<8x600xf32>
    %cst_48 = arith.constant 0.000000e+00 : f32
    %82 = vector.broadcast %cst_48 : f32 to vector<8x600xf32>
    %83 = arith.cmpf ogt, %81, %82 : vector<8x600xf32>
    %cst_49 = arith.constant 0.000000e+00 : f32
    %84 = vector.broadcast %cst_49 : f32 to vector<8x600xf32>
    %85 = arith.minimumf %81, %84 : vector<8x600xf32>
    %86 = math.exp %85 : vector<8x600xf32>
    %cst_50 = arith.constant 1.000000e+00 : f32
    %87 = vector.broadcast %cst_50 : f32 to vector<8x600xf32>
    %88 = arith.subf %86, %87 : vector<8x600xf32>
    %89 = arith.select %83, %81, %88 : vector<8x600xi1>, vector<8x600xf32>
    %c3_51 = arith.constant 3 : index
    %c0_52 = arith.constant 0 : index
    %c0_53 = arith.constant 0 : index
    %90 = vector.load %arg3[%c3_51, %c0_52, %c0_53] : memref<4x8x600xf32, #tpu.memory_space<vmem>>, vector<1x8x600xf32>
    %91 = vector.shape_cast %90 : vector<1x8x600xf32> to vector<8x600xf32>
    %cst_54 = arith.constant 0.899999976 : f32
    %92 = vector.broadcast %cst_54 : f32 to vector<8x600xf32>
    %93 = arith.cmpf olt, %91, %92 : vector<8x600xf32>
    %cst_55 = arith.constant 1.11111116 : f32
    %94 = vector.broadcast %cst_55 : f32 to vector<8x600xf32>
    %95 = arith.mulf %89, %94 : vector<8x600xf32>
    %cst_56 = arith.constant 0.000000e+00 : f32
    %96 = vector.broadcast %cst_56 : f32 to vector<8x600xf32>
    %97 = arith.select %93, %95, %96 : vector<8x600xi1>, vector<8x600xf32>
    %c5 = arith.constant 5 : index
    %c0_57 = arith.constant 0 : index
    %98 = vector.load %arg10[%c5, %c0_57] : memref<6x640xf32, #tpu.memory_space<vmem>>, vector<1x379xf32>
    %99 = arith.truncf %97 : vector<8x600xf32> to vector<8x600xbf16>
    %c0_58 = arith.constant 0 : index
    %c0_59 = arith.constant 0 : index
    %100 = vector.load %arg9[%c0_58, %c0_59] : memref<600x379xbf16, #tpu.memory_space<vmem>>, vector<600x379xbf16>
    %cst_60 = arith.constant dense<0.000000e+00> : vector<8x379xf32>
    %101 = tpu.matmul %99, %100, %cst_60 {dimension_numbers = #tpu.dot_dimension_numbers<[1], [0], [0], [1], [0, 0, 1, 1], [], []>} : vector<8x600xbf16>, vector<600x379xbf16>, vector<8x379xf32> -> vector<8x379xf32>
    %102 = vector.broadcast %98 : vector<1x379xf32> to vector<8x379xf32>
    %103 = arith.addf %101, %102 : vector<8x379xf32>
    %cst_61 = arith.constant 2.000000e+01 : f32
    %104 = vector.broadcast %cst_61 : f32 to vector<8x379xf32>
    %105 = arith.cmpf ogt, %103, %104 : vector<8x379xf32>
    %cst_62 = arith.constant 2.000000e+01 : f32
    %106 = vector.broadcast %cst_62 : f32 to vector<8x379xf32>
    %107 = arith.minimumf %103, %106 : vector<8x379xf32>
    %108 = math.exp %107 : vector<8x379xf32>
    %109 = math.log1p %108 : vector<8x379xf32>
    %110 = arith.select %105, %103, %109 : vector<8x379xi1>, vector<8x379xf32>
    %cst_63 = arith.constant 0.000000e+00 : f32
    %111 = vector.broadcast %cst_63 : f32 to vector<8x379xf32>
    %112 = arith.subf %111, %110 : vector<8x379xf32>
    %113 = math.exp %112 : vector<8x379xf32>
    %cst_64 = arith.constant 1.000000e+00 : f32
    %114 = vector.broadcast %cst_64 : f32 to vector<8x379xf32>
    %115 = arith.addf %114, %113 : vector<8x379xf32>
    %cst_65 = arith.constant 1.000000e+00 : f32
    %116 = vector.broadcast %cst_65 : f32 to vector<8x379xf32>
    %117 = arith.divf %116, %115 : vector<8x379xf32>
    %c0_66 = arith.constant 0 : index
    %c0_67 = arith.constant 0 : index
    %118 = vector.load %arg12[%c0_66, %c0_67] : memref<8x379xf32, #tpu.memory_space<vmem>>, vector<8x379xf32>
    tpu.vector_store %arg12[%c0_66, %c0_67], %117 {strides = array<i32>} : memref<8x379xf32, #tpu.memory_space<vmem>>, vector<8x379xf32>,
    return
  }
  func.func @transform_0(%arg0: i32) -> (i32, i32) {
    %c0_i32 = arith.constant 0 : i32
    %c0_i32_0 = arith.constant 0 : i32
    return %arg0, %c0_i32 : i32, i32
  }
  func.func @transform_1(%arg0: i32) -> (i32, i32) {
    %c0_i32 = arith.constant 0 : i32
    %c0_i32_0 = arith.constant 0 : i32
    return %arg0, %c0_i32 : i32, i32
  }
  func.func @transform_2(%arg0: i32) -> (i32, i32, i32) {
    %c0_i32 = arith.constant 0 : i32
    %c0_i32_0 = arith.constant 0 : i32
    %c0_i32_1 = arith.constant 0 : i32
    return %c0_i32, %arg0, %c0_i32_0 : i32, i32, i32
  }
  func.func @transform_3(%arg0: i32) -> (i32, i32) {
    %c0_i32 = arith.constant 0 : i32
    %c0_i32_0 = arith.constant 0 : i32
    %c0_i32_1 = arith.constant 0 : i32
    return %c0_i32, %c0_i32_0 : i32, i32
  }
  func.func @transform_4(%arg0: i32) -> (i32, i32) {
    %c0_i32 = arith.constant 0 : i32
    %c0_i32_0 = arith.constant 0 : i32
    %c0_i32_1 = arith.constant 0 : i32
    return %c0_i32, %c0_i32_0 : i32, i32
  }
  func.func @transform_5(%arg0: i32) -> (i32, i32) {
    %c0_i32 = arith.constant 0 : i32
    %c0_i32_0 = arith.constant 0 : i32
    %c0_i32_1 = arith.constant 0 : i32
    return %c0_i32, %c0_i32_0 : i32, i32
  }
  func.func @transform_6(%arg0: i32) -> (i32, i32) {
    %c0_i32 = arith.constant 0 : i32
    %c0_i32_0 = arith.constant 0 : i32
    %c0_i32_1 = arith.constant 0 : i32
    return %c0_i32, %c0_i32_0 : i32, i32
  }
  func.func @transform_7(%arg0: i32) -> (i32, i32) {
    %c0_i32 = arith.constant 0 : i32
    %c0_i32_0 = arith.constant 0 : i32
    %c0_i32_1 = arith.constant 0 : i32
    return %c0_i32, %c0_i32_0 : i32, i32
  }
  func.func @transform_8(%arg0: i32) -> (i32, i32) {
    %c0_i32 = arith.constant 0 : i32
    %c0_i32_0 = arith.constant 0 : i32
    %c0_i32_1 = arith.constant 0 : i32
    return %c0_i32, %c0_i32_0 : i32, i32
  }
  func.func @transform_9(%arg0: i32) -> (i32, i32) {
    %c0_i32 = arith.constant 0 : i32
    %c0_i32_0 = arith.constant 0 : i32
    %c0_i32_1 = arith.constant 0 : i32
    return %c0_i32, %c0_i32_0 : i32, i32
  }
  func.func @transform_10(%arg0: i32) -> (i32, i32) {
    %c0_i32 = arith.constant 0 : i32
    %c0_i32_0 = arith.constant 0 : i32
    return %arg0, %c0_i32 : i32, i32
  }
  func.func @transform_11(%arg0: i32) -> (i32, i32) {
    %c0_i32 = arith.constant 0 : i32
    %c0_i32_0 = arith.constant 0 : i32
    return %arg0, %c0_i32 : i32, i32
  }
}

</mosaic_0001>

<bundles_post_ra>
// kernel: tpu_custom_call.1
= control target key start
LH: loop header
LB: loop body
LE: loop exit
PB: predicated region body
PF: predicated region fallthrough
CT: control target
= control target key end

     0   :  { %17 = vsyncpa [#allocation3], 0  ;;  %s10995_s0 = inlined_call_operand.vmem [shape: f32[8,379], index: 0, kind: input, shape index: {}]   ;;  %s10996_s1 = inlined_call_operand.vmem [shape: f32[8,80], index: 1, kind: input, shape index: {}]   ;;  %s10997_s2 = inlined_call_operand.vmem [shape: f32[4,8,600], index: 2, kind: input, shape index: {}]   ;;  %s10998_s3 = inlined_call_operand.vmem [shape: bf16[379,600], index: 3, kind: input, shape index: {}]   ;;  %s10999_s4 = inlined_call_operand.vmem [shape: bf16[600,600], index: 4, kind: input, shape index: {}]   ;;  %s11000_s5 = inlined_call_operand.vmem [shape: bf16[600,160], index: 5, kind: input, shape index: {}]   ;;  %s11001_s6 = inlined_call_operand.vmem [shape: bf16[80,600], index: 6, kind: input, shape index: {}]   ;;  %s11002_s7 = inlined_call_operand.hbm [shape: bf16[600,600], index: 7, kind: input, shape index: {}]   ;;  %s11003_s8 = inlined_call_operand.vmem [shape: bf16[600,379], index: 8, kind: input, shape index: {}]   ;;  %s11004_s9 = inlined_call_operand.vmem [shape: f32[6,640], index: 9, kind: input, shape index: {}]   ;;  %s11005_s10 = inlined_call_operand.hbm [shape: f32[8,160], index: 10, kind: output, shape index: {0}]   ;;  %s11006_s11 = inlined_call_operand.hbm [shape: f32[8,379], index: 11, kind: output, shape index: {1}]  }
   0x1   :  { %18 = vsyncpa [#allocation4], 0 }
   0x2   :  { %19 = vsyncpa [#allocation7], 0  ;;  %s8897_s17 = smov [#allocation2]  }
   0x3   :  { %s39_s18 = sshll.u32 %s8897_s17, 4  ;;  %s40_s18 = int_to_ptr.vmem [resolvable:$true] %s39_s18 }
   0x4   :  { %s8839_s19 = scalar_lea.vmem %s40_s18, 24000  ;;  %p8844_p1 = scmp.lt.s32.totalorder %s40_s18, %s40_s18 }
   0x5   :  { %p8840_p0 = scmp.ne.s32.totalorder %s40_s18, %s8839_s19  ;;  %p8845_p2 = scmp.lt.s32.totalorder %s8839_s19, %s8839_s19 }
   0x7   :  { %p8846_p3 = por %p8845_p2, %p8844_p1 }
   0x9   :  { %p8847_p4 = pnand %p8846_p3, %p8840_p0 }
   0xb   :  { %8850 = shalt.err (!%p8847_p4)
}
   0xc   :  { %s8898_s20 = smov 320   ;;  %s8899_s21 = smov 20  }
   0xd   :  { %45 = dma.hbm_to_vmem [thread:$0]  %s11002_s7, 24000, %s40_s18, [#allocation3], %s8898_s20, %s8898_s20, %s8899_s21  }
   0xe   :  { %8891 = dma.done.wait [#allocation3], 24000  }
   0xf   :  { %8892 = vsyncadd [#allocation3], 4294943296  ;;  %v8900_v0 = vmov 0   ;;  %vm856_vm0 = vcmask 1044480   ;;  %vm857_vm1 = vcmask 1045504   ;;  %v8901_v1 = vmov 65535  }
  0x10   :  { %948 = vmatprep.mubr.bf16.mxu1 %v8900_v0  ;;  %v858_v2 = vsel %vm856_vm0, 4294967295, %v8901_v1  ;;  %v7764_v3 = vld [vmem:[%s10998_s3 + $0x11c] ss:$20 sps:$4 sm:$0xff]   ;;  %v7766_v4 = vld [vmem:[%s10998_s3 + $0x118] ss:$20 sps:$4 sm:$0xff]   ;;  %vm852_vm2 = vcmask 1006592  }
  0x11   :  { %v8978_v5 = vsel %vm857_vm1, %v858_v2, 0  ;;  %875 = vmatprep.subr.bf16.mxu0 %v7764_v3  ;;  %v7767_v6 = vld [vmem:[%s10998_s3 + $0x39c] ss:$20 sps:$4 sm:$0x3f]   ;;  %v7770_v8 = vld [vmem:[%s10998_s3 + $0xf4] ss:$20 sps:$4 sm:$0xff]  }
  0x12   :  { %v7769_v7 = vld [vmem:[%s10998_s3 + $0x398] ss:$20 sps:$4 sm:$0x3f]   ;;  %876 = vmatpush1.bf16.msra.mxu0 %v7766_v4  ;;  %v864_v9 = vand.u32 %v7767_v6, %v8978_v5  ;;  %v7772_v11 = vld [vmem:[%s10998_s3 + $0xf0] ss:$20 sps:$4 sm:$0xff]   ;;  %vm8903_vm3 = vmmov 0  }
  0x13   :  { %v861_v10 = vand.u32 %v7769_v7, %v8978_v5  ;;  %877 = vmatprep.subr.bf16.mxu0 %v7770_v8  ;;  %v7773_v12 = vld [vmem:[%s10998_s3 + $0x374] ss:$20 sps:$4 sm:$0xff]   ;;  %v7775_v13 = vld [vmem:[%s10998_s3 + $0x370] ss:$20 sps:$4 sm:$0xff]   ;;  %v7776_v14 = vld [vmem:[%s10998_s3 + $0xcc] ss:$20 sps:$4 sm:$0xff]  }
  0x14   :  { %916 = vmatprep.subr.bf16.mxu1 %v864_v9  ;;  %v7778_v15 = vld [vmem:[%s10998_s3 + $0xc8] ss:$20 sps:$4 sm:$0xff]   ;;  %v7779_v16 = vld [vmem:[%s10998_s3 + $0x34c] ss:$20 sps:$4 sm:$0xff]   ;;  %v7782_v17 = vld [vmem:[%s10998_s3 + $0xa4] ss:$20 sps:$4 sm:$0xff]  }
  0x15   :  { %917 = vmatpush1.bf16.msra.mxu1 %v861_v10  ;;  %v7781_v18 = vld [vmem:[%s10998_s3 + $0x348] ss:$20 sps:$4 sm:$0xff]   ;;  %v7784_v19 = vld [vmem:[%s10998_s3 + $0xa0] ss:$20 sps:$4 sm:$0xff]   ;;  %v7785_v20 = vld [vmem:[%s10998_s3 + $0x324] ss:$20 sps:$4 sm:$0xff]  }
  0x16   :  { %878 = vmatpush1.bf16.msra.mxu0 %v7772_v11  ;;  %918 = vmatprep.subr.bf16.mxu1 %v7773_v12  ;;  %v7788_v21 = vld [vmem:[%s10998_s3 + $0x7c] ss:$20 sps:$4 sm:$0xff]   ;;  %v7787_v22 = vld [vmem:[%s10998_s3 + $0x320] ss:$20 sps:$4 sm:$0xff]   ;;  %v7790_v23 = vld [vmem:[%s10998_s3 + $0x78] ss:$20 sps:$4 sm:$0xff]  }
  0x17   :  { %879 = vmatprep.subr.bf16.mxu0 %v7776_v14  ;;  %v7791_v24 = vld [vmem:[%s10998_s3 + $0x2fc] ss:$20 sps:$4 sm:$0xff]   ;;  %v7794_v25 = vld [vmem:[%s10998_s3 + $0x54] ss:$20 sps:$4 sm:$0xff]   ;;  %v7793_v26 = vld [vmem:[%s10998_s3 + $0x2f8] ss:$20 sps:$4 sm:$0xff]  }
  0x18   :  { %v7796_v27 = vld [vmem:[%s10998_s3 + $0x50] ss:$20 sps:$4 sm:$0xff]   ;;  %v7797_v28 = vld [vmem:[%s10998_s3 + $0x2d4] ss:$20 sps:$4 sm:$0xff]   ;;  %v7800_v29 = vld [vmem:[%s10998_s3 + $0x2c] ss:$20 sps:$4 sm:$0xff]  }
  0x19   :  { %919 = vmatpush1.bf16.msra.mxu1 %v7775_v13  ;;  %v7799_v30 = vld [vmem:[%s10998_s3 + $0x2d0] ss:$20 sps:$4 sm:$0xff]   ;;  %v7802_v31 = vld [vmem:[%s10998_s3 + $0x28] ss:$20 sps:$4 sm:$0xff]   ;;  %v7803_v32 = vld [vmem:[%s10998_s3 + $0x2ac] ss:$20 sps:$4 sm:$0xff]  }
  0x1a   :  { %880 = vmatpush1.bf16.msra.mxu0 %v7778_v15  ;;  %920 = vmatprep.subr.bf16.mxu1 %v7779_v16  ;;  %v7806_v33 = vld [vmem:[%s10998_s3 + $0x4] ss:$20 sps:$4 sm:$0xff]   ;;  %v7805_v34 = vld [vmem:[%s10998_s3 + $0x2a8] ss:$20 sps:$4 sm:$0xff]   ;;  %v7808_v35 = vld [vmem:[%s10998_s3] ss:$20 sps:$4 sm:$0xff]  }
  0x1b   :  { %881 = vmatprep.subr.bf16.mxu0 %v7782_v17  ;;  %v7809_v36 = vld [vmem:[%s10998_s3 + $0x284] ss:$20 sps:$4 sm:$0xff]   ;;  %v7812_v37 = vld [vmem:[%s10998_s3 + $0x25c] ss:$20 sps:$4 sm:$0xff]   ;;  %v7811_v38 = vld [vmem:[%s10998_s3 + $0x280] ss:$20 sps:$4 sm:$0xff]  }
  0x1c   :  { %v7814_v39 = vld [vmem:[%s10998_s3 + $0x258] ss:$20 sps:$4 sm:$0xff]   ;;  %v56_v40 = vld [vmem:[%s10995_s0 + $0x10] sm:$0xff]  ;;  %v7826_v49 = vld [vmem:[%s10998_s3 + $0x208] ss:$20 sps:$4 sm:$0xff]   ;;  %vm2408_vm4 = vcmask 1043456  }
  0x1d   :  { %921 = vmatpush1.bf16.msra.mxu1 %v7781_v18  ;;  %v7817_v41 = vld [vmem:[%s10998_s3 + $0x124] ss:$20 sps:$4 sm:$0xff]   ;;  %v7818_v42 = vld [vmem:[%s10998_s3 + $0x234] ss:$20 sps:$4 sm:$0xff]   ;;  %v9087_v43 = vpack.c.bf16 %v56_v40, %v56_v40  ;;  %v7823_v46 = vld [vmem:[%s10998_s3 + $0xfc] ss:$20 sps:$4 sm:$0xff]  }
  0x1e   :  { %882 = vmatpush1.bf16.msra.mxu0 %v7784_v19  ;;  %922 = vmatprep.subr.bf16.mxu1 %v7785_v20  ;;  %v7815_v44 = vld [vmem:[%s10998_s3 + $0x120] ss:$20 sps:$4 sm:$0xff]   ;;  %v7820_v45 = vld [vmem:[%s10998_s3 + $0x230] ss:$20 sps:$4 sm:$0xff]   ;;  %v7821_v48 = vld [vmem:[%s10998_s3 + $0xf8] ss:$20 sps:$4 sm:$0xff]  }
  0x1f   :  { %883 = vmatprep.subr.bf16.mxu0 %v7788_v21  ;;  %v7824_v47 = vld [vmem:[%s10998_s3 + $0x20c] ss:$20 sps:$4 sm:$0xff]   ;;  %v7829_v50 = vld [vmem:[%s10998_s3 + $0xd4] ss:$20 sps:$4 sm:$0xff]   ;;  %v7830_v51 = vld [vmem:[%s10998_s3 + $0x1e4] ss:$20 sps:$4 sm:$0xff]  }
  0x20   :  { %v7827_v52 = vld [vmem:[%s10998_s3 + $0xd0] ss:$20 sps:$4 sm:$0xff]   ;;  %v7832_v53 = vld [vmem:[%s10998_s3 + $0x1e0] ss:$20 sps:$4 sm:$0xff]   ;;  %v55_v55 = vld [vmem:[%s10995_s0 + $0x8] sm:$0xff]  ;;  %s8905_s17 = smov 48  }
  0x21   :  { %923 = vmatpush1.bf16.msra.mxu1 %v7787_v22  ;;  %v7835_v54 = vld [vmem:[%s10998_s3 + $0xac] ss:$20 sps:$4 sm:$0xff]   ;;  %v7836_v56 = vld [vmem:[%s10998_s3 + $0x1bc] ss:$20 sps:$4 sm:$0xff]   ;;  %v9130_v57 = vpack.c.bf16 %v55_v55, %v55_v55  ;;  %v7841_v60 = vld [vmem:[%s10998_s3 + $0x84] ss:$20 sps:$4 sm:$0xff]  }
  0x22   :  { %884 = vmatpush1.bf16.msra.mxu0 %v7790_v23  ;;  %924 = vmatprep.subr.bf16.mxu1 %v7791_v24  ;;  %v7833_v58 = vld [vmem:[%s10998_s3 + $0xa8] ss:$20 sps:$4 sm:$0xff]   ;;  %v7838_v59 = vld [vmem:[%s10998_s3 + $0x1b8] ss:$20 sps:$4 sm:$0xff]   ;;  %v7839_v62 = vld [vmem:[%s10998_s3 + $0x80] ss:$20 sps:$4 sm:$0xff]  }
  0x23   :  { %885 = vmatprep.subr.bf16.mxu0 %v7794_v25  ;;  %907 = vmatprep.mubr.bf16.mxu0 %v9130_v57  ;;  %v7842_v61 = vld [vmem:[%s10998_s3 + $0x194] ss:$20 sps:$4 sm:$0xff]   ;;  %v7844_v63 = vld [vmem:[%s10998_s3 + $0x190] ss:$20 sps:$4 sm:$0xff]   ;;  %v7848_v2 = vld [vmem:[%s10998_s3 + $0x16c] ss:$20 sps:$4 sm:$0xff]  }
  0x24   :  { %v7847_v1 = vld [vmem:[%s10998_s3 + $0x5c] ss:$20 sps:$4 sm:$0xff]   ;;  %v7845_v3 = vld [vmem:[%s10998_s3 + $0x58] ss:$20 sps:$4 sm:$0xff]   ;;  %v7853_v6 = vld [vmem:[%s10998_s3 + $0x34] ss:$20 sps:$4 sm:$0xff]  }
  0x25   :  { %925 = vmatpush1.bf16.msra.mxu1 %v7793_v26  ;;  %v7850_v4 = vld [vmem:[%s10998_s3 + $0x168] ss:$20 sps:$4 sm:$0xff]   ;;  %v7854_v7 = vld [vmem:[%s10998_s3 + $0x144] ss:$20 sps:$4 sm:$0xff]   ;;  %v7856_v10 = vld [vmem:[%s10998_s3 + $0x140] ss:$20 sps:$4 sm:$0xff]  }
  0x26   :  { %886 = vmatpush1.bf16.msra.mxu0 %v7796_v27  ;;  %926 = vmatprep.subr.bf16.mxu1 %v7797_v28  ;;  %v7862_v8 = vld [vmem:[%s10998_s3 + $0x3a4] ss:$20 sps:$4 sm:$0x3f]   ;;  %v7860_v12 = vld [vmem:[%s10998_s3 + $0x3a0] ss:$20 sps:$4 sm:$0x3f]  }
  0x27   :  { %887 = vmatprep.subr.bf16.mxu0 %v7800_v29  ;;  %v7851_v9 = vld [vmem:[%s10998_s3 + $0x30] ss:$20 sps:$4 sm:$0xff]   ;;  %v7859_v13 = vld [vmem:[%s10998_s3 + $0xc] ss:$20 sps:$4 sm:$0xff]   ;;  %v870_v14 = vand.u32 %v7862_v8, %v8978_v5  ;;  %v7857_v16 = vld [vmem:[%s10998_s3 + $0x8] ss:$20 sps:$4 sm:$0xff]   ;;  %v867_v17 = vand.u32 %v7860_v12, %v8978_v5 }
  0x28   :  { %v54_v11 = vld [vmem:[%s10995_s0] sm:$0xff]  ;;  %v7868_v19 = vld [vmem:[%s10998_s3 + $0x37c] ss:$20 sps:$4 sm:$0xff]   ;;  %v7866_v21 = vld [vmem:[%s10998_s3 + $0x378] ss:$20 sps:$4 sm:$0xff]   ;;  %s8904_s0 = smov 80  }
  0x29   :  { %927 = vmatpush1.bf16.msra.mxu1 %v7799_v30  ;;  %v9189_v15 = vpack.c.bf16 %v54_v11, %v54_v11  ;;  %v7865_v18 = vld [vmem:[%s10998_s3 + $0x264] ss:$20 sps:$4 sm:$0xff]   ;;  %v7863_v20 = vld [vmem:[%s10998_s3 + $0x260] ss:$20 sps:$4 sm:$0xff]   ;;  %v7871_v22 = vld [vmem:[%s10998_s3 + $0x23c] ss:$20 sps:$4 sm:$0xff]  }
  0x2a   :  { %888 = vmatpush1.bf16.msra.mxu0 %v7802_v31  ;;  %928 = vmatprep.subr.bf16.mxu1 %v7803_v32  ;;  %v7874_v23 = vld [vmem:[%s10998_s3 + $0x354] ss:$20 sps:$4 sm:$0xff]   ;;  %v7869_v24 = vld [vmem:[%s10998_s3 + $0x238] ss:$20 sps:$4 sm:$0xff]   ;;  %v7872_v25 = vld [vmem:[%s10998_s3 + $0x350] ss:$20 sps:$4 sm:$0xff]  }
  0x2b   :  { %889 = vmatprep.subr.bf16.mxu0 %v7806_v33  ;;  %v7877_v26 = vld [vmem:[%s10998_s3 + $0x214] ss:$20 sps:$4 sm:$0xff]   ;;  %v7880_v27 = vld [vmem:[%s10998_s3 + $0x32c] ss:$20 sps:$4 sm:$0xff]   ;;  %v7875_v28 = vld [vmem:[%s10998_s3 + $0x210] ss:$20 sps:$4 sm:$0xff]  }
  0x2c   :  { %v7878_v29 = vld [vmem:[%s10998_s3 + $0x328] ss:$20 sps:$4 sm:$0xff]   ;;  %v7883_v30 = vld [vmem:[%s10998_s3 + $0x1ec] ss:$20 sps:$4 sm:$0xff]   ;;  %v7886_v31 = vld [vmem:[%s10998_s3 + $0x304] ss:$20 sps:$4 sm:$0xff]  }
  0x2d   :  { %929 = vmatpush1.bf16.msra.mxu1 %v7805_v34  ;;  %v7881_v32 = vld [vmem:[%s10998_s3 + $0x1e8] ss:$20 sps:$4 sm:$0xff]   ;;  %v7884_v33 = vld [vmem:[%s10998_s3 + $0x300] ss:$20 sps:$4 sm:$0xff]   ;;  %v7889_v34 = vld [vmem:[%s10998_s3 + $0x1c4] ss:$20 sps:$4 sm:$0xff]  }
  0x2e   :  { %890 = vmatpush1.bf16.msra.mxu0 %v7808_v35  ;;  %930 = vmatprep.subr.bf16.mxu1 %v7809_v36  ;;  %v7892_v35 = vld [vmem:[%s10998_s3 + $0x2dc] ss:$20 sps:$4 sm:$0xff]   ;;  %v7887_v36 = vld [vmem:[%s10998_s3 + $0x1c0] ss:$20 sps:$4 sm:$0xff]   ;;  %v7893_v40 = vld [vmem:[%s10998_s3 + $0x198] ss:$20 sps:$4 sm:$0xff]  }
  0x2f   :  { %891 = vmatprep.subr.bf16.mxu0 %v7812_v37  ;;  %v7890_v37 = vld [vmem:[%s10998_s3 + $0x2d8] ss:$20 sps:$4 sm:$0xff]   ;;  %v7929_v8 = vld [vmem:[%s10998_s3 + $0x150] ss:$20 sps:$4 sm:$0xff]   ;;  %s8906_s20 = smov [#allocation5]  }
  0x30   :  { %v7934_v11 = vld [vmem:[%s10999_s4 + $0x11c] ss:$20 sps:$4 sm:$0xff]   ;;  %s6581_s21 = sshll.u32 %s8906_s20, 4  ;;  %s6582_s21 = int_to_ptr.vmem [resolvable:$true] %s6581_s21 }
  0x31   :  { %931 = vmatpush1.bf16.msra.mxu1 %v7811_v38  ;;  %v7895_v38 = vld [vmem:[%s10998_s3 + $0x19c] ss:$20 sps:$4 sm:$0xff]   ;;  %p8856_p6 = scmp.lt.s32.totalorder %s6582_s21, %s6582_s21 }
  0x32   :  { %892 = vmatpush2.bf16.msra.mxu0 %v7814_v39  ;;  %957 = vmatprep.subr.bf16.mxu1 %v7817_v41  ;;  %v7898_v39 = vld [vmem:[%s10998_s3 + $0x2b4] ss:$20 sps:$4 sm:$0xff]   ;;  %v7896_v41 = vld [vmem:[%s10998_s3 + $0x2b0] ss:$20 sps:$4 sm:$0xff]  }
  0x33   :  { %893 = vmatprep.subr.bf16.mxu0 %v7818_v42  ;;  %v7901_v42 = vld [vmem:[%s10998_s3 + $0x174] ss:$20 sps:$4 sm:$0xff]   ;;  %v7931_v12 = vld [vmem:[%s10998_s3 + $0x290] ss:$20 sps:$4 sm:$0xff]  }
  0x34   :  { %6724 = vmatmul.mubr.msk.bf16.vlgmr.msra.gmra.mxu1 %vm852_vm2, %v9087_v43 }
  0x35   :  { %958 = vmatpush1.bf16.msra.mxu1 %v7815_v44  ;;  %989 = vmatprep.mubr.bf16.mxu1 %v9130_v57  ;;  %v7904_v44 = vld [vmem:[%s10998_s3 + $0x28c] ss:$20 sps:$4 sm:$0xff]  }
  0x36   :  { %894 = vmatpush2.bf16.msra.mxu0 %v7820_v45  ;;  %959 = vmatprep.subr.bf16.mxu1 %v7823_v46  ;;  %v7899_v45 = vld [vmem:[%s10998_s3 + $0x170] ss:$20 sps:$4 sm:$0xff]   ;;  %v7902_v46 = vld [vmem:[%s10998_s3 + $0x288] ss:$20 sps:$4 sm:$0xff]  }
  0x37   :  { %895 = vmatprep.subr.bf16.mxu0 %v7824_v47  ;;  %v7907_v47 = vld [vmem:[%s10998_s3 + $0x14c] ss:$20 sps:$4 sm:$0xff]  }
  0x39   :  { %960 = vmatpush1.bf16.msra.mxu1 %v7821_v48  ;;  %v7908_v48 = vld [vmem:[%s10998_s3 + $0x268] ss:$20 sps:$4 sm:$0xff]  }
  0x3a   :  { %896 = vmatpush2.bf16.msra.mxu0 %v7826_v49  ;;  %961 = vmatprep.subr.bf16.mxu1 %v7829_v50  ;;  %v7905_v49 = vld [vmem:[%s10998_s3 + $0x148] ss:$20 sps:$4 sm:$0xff]  }
  0x3b   :  { %897 = vmatprep.subr.bf16.mxu0 %v7830_v51  ;;  %v7909_v50 = vld [vmem:[%s10998_s3 + $0x128] ss:$20 sps:$4 sm:$0xff]  }
  0x3c   :  { %v7910_v51 = vld [vmem:[%s10998_s3 + $0x3a8] ss:$20 sps:$4 sm:$0x3f]  }
  0x3d   :  { %962 = vmatpush1.bf16.msra.mxu1 %v7827_v52  ;;  %v7911_v52 = vld [vmem:[%s10998_s3 + $0x240] ss:$20 sps:$4 sm:$0xff]   ;;  %v873_v55 = vand.u32 %v7910_v51, %v8978_v5  ;;  %v7917_v5 = vld [vmem:[%s10998_s3 + $0x1f0] ss:$20 sps:$4 sm:$0xff]   ;;  %v8004_v51 = vld [vmem:[%s10999_s4 + $0x4d8] ss:$20 sps:$4 sm:$0xff]  }
  0x3e   :  { %898 = vmatpush2.bf16.msra.mxu0 %v7832_v53  ;;  %963 = vmatprep.subr.bf16.mxu1 %v7835_v54  ;;  %v7912_v53 = vld [vmem:[%s10998_s3 + $0x100] ss:$20 sps:$4 sm:$0xff]   ;;  %v7914_v54 = vld [vmem:[%s10998_s3 + $0x218] ss:$20 sps:$4 sm:$0xff]  }
  0x3f   :  { %899 = vmatprep.subr.bf16.mxu0 %v7836_v56  ;;  %v8902_v56 = vmov 0.0  }
  0x41   :  { %964 = vmatpush1.bf16.msra.mxu1 %v7833_v58  ;;  %v7913_v58 = vld [vmem:[%s10998_s3 + $0x380] ss:$20 sps:$4 sm:$0xff]  }
  0x42   :  { %900 = vmatpush2.bf16.msra.mxu0 %v7838_v59  ;;  %965 = vmatprep.subr.bf16.mxu1 %v7841_v60  ;;  %v7915_v59 = vld [vmem:[%s10998_s3 + $0xd8] ss:$20 sps:$4 sm:$0xff]  }
  0x43   :  { %901 = vmatprep.subr.bf16.mxu0 %v7842_v61  ;;  %v7916_v60 = vld [vmem:[%s10998_s3 + $0x358] ss:$20 sps:$4 sm:$0xff]   ;;  %v7920_v61 = vld [vmem:[%s10998_s3 + $0x1c8] ss:$20 sps:$4 sm:$0xff]  }
  0x45   :  { %966 = vmatpush1.bf16.msra.mxu1 %v7839_v62  ;;  %v7919_v62 = vld [vmem:[%s10998_s3 + $0x330] ss:$20 sps:$4 sm:$0xff]  }
  0x46   :  { %902 = vmatpush2.bf16.msra.mxu0 %v7844_v63  ;;  %967 = vmatprep.subr.bf16.mxu1 %v7847_v1  ;;  %v7921_v63 = vld [vmem:[%s10998_s3 + $0x88] ss:$20 sps:$4 sm:$0xff]   ;;  %v7923_v1 = vld [vmem:[%s10998_s3 + $0x1a0] ss:$20 sps:$4 sm:$0xff]  }
  0x47   :  { %903 = vmatprep.subr.bf16.mxu0 %v7848_v2  ;;  %v7922_v2 = vld [vmem:[%s10998_s3 + $0x308] ss:$20 sps:$4 sm:$0xff]  }
  0x49   :  { %968 = vmatpush1.bf16.msra.mxu1 %v7845_v3  ;;  %v7924_v3 = vld [vmem:[%s10998_s3 + $0x60] ss:$20 sps:$4 sm:$0xff]  }
  0x4a   :  { %904 = vmatpush2.bf16.msra.mxu0 %v7850_v4  ;;  %969 = vmatprep.subr.bf16.mxu1 %v7853_v6  ;;  %v7926_v4 = vld [vmem:[%s10998_s3 + $0x178] ss:$20 sps:$4 sm:$0xff]   ;;  %v7925_v6 = vld [vmem:[%s10998_s3 + $0x2e0] ss:$20 sps:$4 sm:$0xff]  }
  0x4b   :  { %905 = vmatprep.subr.bf16.mxu0 %v7854_v7  ;;  %v7927_v7 = vld [vmem:[%s10998_s3 + $0x38] ss:$20 sps:$4 sm:$0xff]  }
  0x4d   :  { %970 = vmatpush1.bf16.msra.mxu1 %v7851_v9  ;;  %v7928_v9 = vld [vmem:[%s10998_s3 + $0x2b8] ss:$20 sps:$4 sm:$0xff]  }
  0x4e   :  { %906 = vmatpush2.bf16.msra.mxu0 %v7856_v10  ;;  %971 = vmatprep.subr.bf16.mxu1 %v7859_v13  ;;  %v7930_v10 = vld [vmem:[%s10998_s3 + $0x10] ss:$20 sps:$4 sm:$0xff]   ;;  %v7932_v13 = vld [vmem:[%s10999_s4 + $0x118] ss:$20 sps:$4 sm:$0xff]  }
  0x4f   :  { %998 = vmatprep.subr.bf16.mxu0 %v870_v14  ;;  %v7937_v14 = vld [vmem:[%s10999_s4 + $0xf4] ss:$20 sps:$4 sm:$0xff]  }
  0x51   :  { %908 = vmatmul.mubr.bf16.vlgmr.msra.gmra.mxu0 %v9189_v15  ;;  %972 = vmatpush1.bf16.msra.mxu1 %v7857_v16  ;;  %v7935_v16 = vld [vmem:[%s10999_s4 + $0xf0] ss:$20 sps:$4 sm:$0xff]  }
  0x52   :  { %999 = vmatpush1.bf16.msra.mxu0 %v867_v17  ;;  %973 = vmatprep.subr.bf16.mxu1 %v7865_v18  ;;  %v7940_v17 = vld [vmem:[%s10999_s4 + $0xcc] ss:$20 sps:$4 sm:$0xff]   ;;  %v7961_v18 = vld [vmem:[%s10999_s4 + $0x39c] ss:$20 sps:$4 sm:$0xff]  }
  0x53   :  { %1000 = vmatprep.subr.bf16.mxu0 %v7868_v19  ;;  %1030 = vmatprep.mubr.bf16.mxu0 %v8900_v0  ;;  %v7959_v19 = vld [vmem:[%s10999_s4 + $0x398] ss:$20 sps:$4 sm:$0xff]  }
  0x55   :  { %974 = vmatpush2.bf16.msra.mxu1 %v7863_v20  ;;  %v7943_v20 = vld [vmem:[%s10999_s4 + $0xa4] ss:$20 sps:$4 sm:$0xff]  }
  0x56   :  { %1001 = vmatpush1.bf16.msra.mxu0 %v7866_v21  ;;  %975 = vmatprep.subr.bf16.mxu1 %v7871_v22  ;;  %v7967_v21 = vld [vmem:[%s10999_s4 + $0x374] ss:$20 sps:$4 sm:$0xff]  }
  0x57   :  { %1002 = vmatprep.subr.bf16.mxu0 %v7874_v23  ;;  %v7941_v22 = vld [vmem:[%s10999_s4 + $0xa0] ss:$20 sps:$4 sm:$0xff]   ;;  %v7946_v23 = vld [vmem:[%s10999_s4 + $0x7c] ss:$20 sps:$4 sm:$0xff]  }
  0x59   :  { %976 = vmatpush2.bf16.msra.mxu1 %v7869_v24  ;;  %v7973_v24 = vld [vmem:[%s10999_s4 + $0x34c] ss:$20 sps:$4 sm:$0xff]  }
  0x5a   :  { %1003 = vmatpush1.bf16.msra.mxu0 %v7872_v25  ;;  %977 = vmatprep.subr.bf16.mxu1 %v7877_v26  ;;  %v7971_v25 = vld [vmem:[%s10999_s4 + $0x348] ss:$20 sps:$4 sm:$0xff]   ;;  %v7944_v26 = vld [vmem:[%s10999_s4 + $0x78] ss:$20 sps:$4 sm:$0xff]  }
  0x5b   :  { %1004 = vmatprep.subr.bf16.mxu0 %v7880_v27  ;;  %v7949_v27 = vld [vmem:[%s10999_s4 + $0x54] ss:$20 sps:$4 sm:$0xff]  }
  0x5d   :  { %978 = vmatpush2.bf16.msra.mxu1 %v7875_v28  ;;  %v7979_v28 = vld [vmem:[%s10999_s4 + $0x324] ss:$20 sps:$4 sm:$0xff]  }
  0x5e   :  { %1005 = vmatpush1.bf16.msra.mxu0 %v7878_v29  ;;  %979 = vmatprep.subr.bf16.mxu1 %v7883_v30  ;;  %v7977_v29 = vld [vmem:[%s10999_s4 + $0x320] ss:$20 sps:$4 sm:$0xff]   ;;  %v7947_v30 = vld [vmem:[%s10999_s4 + $0x50] ss:$20 sps:$4 sm:$0xff]  }
  0x5f   :  { %1006 = vmatprep.subr.bf16.mxu0 %v7886_v31  ;;  %v7952_v31 = vld [vmem:[%s10999_s4 + $0x2c] ss:$20 sps:$4 sm:$0xff]  }
  0x61   :  { %980 = vmatpush2.bf16.msra.mxu1 %v7881_v32  ;;  %v7985_v32 = vld [vmem:[%s10999_s4 + $0x2fc] ss:$20 sps:$4 sm:$0xff]  }
  0x62   :  { %1007 = vmatpush1.bf16.msra.mxu0 %v7884_v33  ;;  %981 = vmatprep.subr.bf16.mxu1 %v7889_v34  ;;  %v7983_v33 = vld [vmem:[%s10999_s4 + $0x2f8] ss:$20 sps:$4 sm:$0xff]   ;;  %v7950_v34 = vld [vmem:[%s10999_s4 + $0x28] ss:$20 sps:$4 sm:$0xff]  }
  0x63   :  { %1008 = vmatprep.subr.bf16.mxu0 %v7892_v35  ;;  %v7955_v35 = vld [vmem:[%s10999_s4 + $0x4] ss:$20 sps:$4 sm:$0xff]  }
  0x65   :  { %982 = vmatpush2.bf16.msra.mxu1 %v7887_v36  ;;  %v7991_v36 = vld [vmem:[%s10999_s4 + $0x2d4] ss:$20 sps:$4 sm:$0xff]  }
  0x66   :  { %1009 = vmatpush1.bf16.msra.mxu0 %v7890_v37  ;;  %983 = vmatprep.subr.bf16.mxu1 %v7895_v38  ;;  %v7989_v37 = vld [vmem:[%s10999_s4 + $0x2d0] ss:$20 sps:$4 sm:$0xff]   ;;  %v7953_v38 = vld [vmem:[%s10999_s4] ss:$20 sps:$4 sm:$0xff]  }
  0x67   :  { %1010 = vmatprep.subr.bf16.mxu0 %v7898_v39  ;;  %v7958_v39 = vld [vmem:[%s10999_s4 + $0x25c] ss:$20 sps:$4 sm:$0xff]  }
  0x69   :  { %984 = vmatpush2.bf16.msra.mxu1 %v7893_v40  ;;  %v7997_v40 = vld [vmem:[%s10999_s4 + $0x2ac] ss:$20 sps:$4 sm:$0xff]  }
  0x6a   :  { %1011 = vmatpush1.bf16.msra.mxu0 %v7896_v41  ;;  %985 = vmatprep.subr.bf16.mxu1 %v7901_v42  ;;  %v7995_v41 = vld [vmem:[%s10999_s4 + $0x2a8] ss:$20 sps:$4 sm:$0xff]   ;;  %v7956_v42 = vld [vmem:[%s10999_s4 + $0x258] ss:$20 sps:$4 sm:$0xff]  }
  0x6b   :  { %1012 = vmatprep.subr.bf16.mxu0 %v7904_v44  ;;  %v7964_v44 = vld [vmem:[%s10999_s4 + $0x234] ss:$20 sps:$4 sm:$0xff]  }
  0x6d   :  { %986 = vmatpush2.bf16.msra.mxu1 %v7899_v45  ;;  %v8001_v45 = vld [vmem:[%s10999_s4 + $0x280] ss:$20 sps:$4 sm:$0xff]  }
  0x6e   :  { %1013 = vmatpush1.bf16.msra.mxu0 %v7902_v46  ;;  %987 = vmatprep.subr.bf16.mxu1 %v7907_v47  ;;  %v8003_v46 = vld [vmem:[%s10999_s4 + $0x284] ss:$20 sps:$4 sm:$0xff]  }
  0x6f   :  { %7481 = vmatprep.subr.bf16.mxu0 %v7908_v48  ;;  %v7962_v47 = vld [vmem:[%s10999_s4 + $0x230] ss:$20 sps:$4 sm:$0xff]   ;;  %v7970_v48 = vld [vmem:[%s10999_s4 + $0x20c] ss:$20 sps:$4 sm:$0xff]  }
  0x71   :  { %6725 = vmatmul.mubr.msk.bf16.vlgmr.msra.gmra.mxu0 %vm852_vm2, %v9087_v43  ;;  %988 = vmatpush2.bf16.msra.mxu1 %v7905_v49  ;;  %v8006_v49 = vld [vmem:[%s10999_s4 + $0x4dc] ss:$20 sps:$4 sm:$0xff]  }
  0x72   :  { %7482 = vmatpush3.bf16.msra.mxu0 %v7909_v50  ;;  %7671 = vmatprep.subr.bf16.mxu1 %v8902_v56  ;;  %v7968_v50 = vld [vmem:[%s10999_s4 + $0x208] ss:$20 sps:$4 sm:$0xff]  }
  0x73   :  { %7483 = vmatprep.subr.bf16.mxu0 %v7911_v52  ;;  %1071 = vmatprep.mubr.bf16.mxu0 %v9130_v57  ;;  %v7918_v57 = vld [vmem:[%s10998_s3 + $0xb0] ss:$20 sps:$4 sm:$0xff]  }
  0x74   :  { %990 = vmatmul.mubr.bf16.vlgmr.msra.gmra.mxu1 %v9189_v15  ;;  %v7976_v52 = vld [vmem:[%s10999_s4 + $0x1e4] ss:$20 sps:$4 sm:$0xff]  }
  0x75   :  { %7672 = vmatpush3.bf16.msra.mxu1 %v873_v55  ;;  %7687 = vmatprep.mubr.msk.bf16.mxu1 %vm8903_vm3, %v8902_v56  ;;  %v8007_v55 = vld [vmem:[%s10999_s4 + $0x4b0] ss:$20 sps:$4 sm:$0xff]  }
  0x76   :  { %7484 = vmatpush3.bf16.msra.mxu0 %v7912_v53  ;;  %7673 = vmatprep.subr.bf16.mxu1 %v8902_v56  ;;  %v8009_v53 = vld [vmem:[%s10999_s4 + $0x4b4] ss:$20 sps:$4 sm:$0xff]  }
  0x77   :  { %7485 = vmatprep.subr.bf16.mxu0 %v7914_v54  ;;  %v7974_v54 = vld [vmem:[%s10999_s4 + $0x1e0] ss:$20 sps:$4 sm:$0xff]  }
  0x79   :  { %7674 = vmatpush3.bf16.msra.mxu1 %v7913_v58  ;;  %v7982_v58 = vld [vmem:[%s10999_s4 + $0x1bc] ss:$20 sps:$4 sm:$0xff]  }
  0x7a   :  { %7486 = vmatpush3.bf16.msra.mxu0 %v7915_v59  ;;  %7675 = vmatprep.subr.bf16.mxu1 %v8902_v56  ;;  %v8012_v59 = vld [vmem:[%s10999_s4 + $0x48c] ss:$20 sps:$4 sm:$0xff]  }
  0x7b   :  { %7487 = vmatprep.subr.bf16.mxu0 %v7917_v5  ;;  %v7980_v5 = vld [vmem:[%s10999_s4 + $0x1b8] ss:$20 sps:$4 sm:$0xff]  }
  0x7d   :  { %7676 = vmatpush3.bf16.msra.mxu1 %v7916_v60  ;;  %v8010_v60 = vld [vmem:[%s10999_s4 + $0x488] ss:$20 sps:$4 sm:$0xff]  }
  0x7e   :  { %7488 = vmatpush3.bf16.msra.mxu0 %v7918_v57  ;;  %7677 = vmatprep.subr.bf16.mxu1 %v8902_v56  ;;  %v7988_v57 = vld [vmem:[%s10999_s4 + $0x194] ss:$20 sps:$4 sm:$0xff]  }
  0x7f   :  { %7489 = vmatprep.subr.bf16.mxu0 %v7920_v61  ;;  %v8015_v61 = vld [vmem:[%s10999_s4 + $0x464] ss:$20 sps:$4 sm:$0xff]  }
  0x81   :  { %7678 = vmatpush3.bf16.msra.mxu1 %v7919_v62  ;;  %v7986_v62 = vld [vmem:[%s10999_s4 + $0x190] ss:$20 sps:$4 sm:$0xff]  }
  0x82   :  { %7490 = vmatpush3.bf16.msra.mxu0 %v7921_v63  ;;  %7679 = vmatprep.subr.bf16.mxu1 %v8902_v56  ;;  %v8013_v63 = vld [vmem:[%s10999_s4 + $0x460] ss:$20 sps:$4 sm:$0xff]  }
  0x83   :  { %7491 = vmatprep.subr.bf16.mxu0 %v7923_v1  ;;  %v7994_v1 = vld [vmem:[%s10999_s4 + $0x16c] ss:$20 sps:$4 sm:$0xff]  }
  0x85   :  { %7680 = vmatpush3.bf16.msra.mxu1 %v7922_v2  ;;  %v8018_v2 = vld [vmem:[%s10999_s4 + $0x43c] ss:$20 sps:$4 sm:$0xff]  }
  0x86   :  { %7492 = vmatpush3.bf16.msra.mxu0 %v7924_v3  ;;  %7681 = vmatprep.subr.bf16.mxu1 %v8902_v56  ;;  %v7992_v3 = vld [vmem:[%s10999_s4 + $0x168] ss:$20 sps:$4 sm:$0xff]  }
  0x87   :  { %7493 = vmatprep.subr.bf16.mxu0 %v7926_v4  ;;  %v8016_v4 = vld [vmem:[%s10999_s4 + $0x438] ss:$20 sps:$4 sm:$0xff]  }
  0x89   :  { %7682 = vmatpush3.bf16.msra.mxu1 %v7925_v6  ;;  %v8000_v6 = vld [vmem:[%s10999_s4 + $0x144] ss:$20 sps:$4 sm:$0xff]  }
  0x8a   :  { %7494 = vmatpush3.bf16.msra.mxu0 %v7927_v7  ;;  %7683 = vmatprep.subr.bf16.mxu1 %v8902_v56  ;;  %v8021_v7 = vld [vmem:[%s10999_s4 + $0x414] ss:$20 sps:$4 sm:$0xff]  }
  0x8b   :  { %7495 = vmatprep.subr.bf16.mxu0 %v7929_v8  ;;  %v7998_v8 = vld [vmem:[%s10999_s4 + $0x140] ss:$20 sps:$4 sm:$0xff]  }
  0x8d   :  { %7684 = vmatpush3.bf16.msra.mxu1 %v7928_v9  ;;  %v8019_v9 = vld [vmem:[%s10999_s4 + $0x410] ss:$20 sps:$4 sm:$0xff]  }
  0x8e   :  { %7496 = vmatpush3.bf16.msra.mxu0 %v7930_v10  ;;  %7685 = vmatprep.subr.bf16.mxu1 %v8902_v56  ;;  %v8024_v10 = vld [vmem:[%s10999_s4 + $0x3ec] ss:$20 sps:$4 sm:$0xff]  }
  0x8f   :  { %2424 = vmatprep.subr.bf16.mxu0 %v7934_v11  ;;  %v8022_v11 = vld [vmem:[%s10999_s4 + $0x3e8] ss:$20 sps:$4 sm:$0xff]  }
  0x91   :  { %1072 = vmatmul.mubr.bf16.vlgmr.msra.gmra.mxu0 %v9189_v15  ;;  %7686 = vmatpush3.bf16.msra.mxu1 %v7931_v12  ;;  %v7938_v15 = vld [vmem:[%s10999_s4 + $0xc8] ss:$20 sps:$4 sm:$0xff]   ;;  %v8027_v12 = vld [vmem:[%s10999_s4 + $0x3c4] ss:$20 sps:$4 sm:$0xff]  }
  0x92   :  { %2425 = vmatpush1.bf16.msra.mxu0 %v7932_v13  ;;  %2465 = vmatprep.subr.bf16.mxu1 %v7961_v18  ;;  %v8025_v13 = vld [vmem:[%s10999_s4 + $0x3c0] ss:$20 sps:$4 sm:$0xff]  }
  0x93   :  { %2426 = vmatprep.subr.bf16.mxu0 %v7937_v14  ;;  %v8030_v14 = vld [vmem:[%s10999_s4 + $0x124] ss:$20 sps:$4 sm:$0xff]  }
  0x94   :  { %7688 = vmatmul.mubr.msk.bf16.vlgmr.msra.gmra.mxu1 %vm852_vm2, %v9087_v43  ;;  %v7965_v43 = vld [vmem:[%s10999_s4 + $0x370] ss:$20 sps:$4 sm:$0xff]  }
  0x95   :  { %2466 = vmatpush1.bf16.msra.mxu1 %v7959_v19 }
  0x96   :  { %2427 = vmatpush1.bf16.msra.mxu0 %v7935_v16  ;;  %2467 = vmatprep.subr.bf16.mxu1 %v7967_v21  ;;  %v1400_v16 = vld [vmem:[%s10999_s4 + $0x5c8] sm:$0xff]  ;;  %v208_v21 = vlaneseq }
  0x97   :  { %2428 = vmatprep.subr.bf16.mxu0 %v7940_v17  ;;  %v6920_v17 = vcombine.high %v1400_v16, %v1400_v16 }
  0x99   :  { %2468 = vmatpush1.bf16.msra.mxu1 %v7965_v43  ;;  %v57_v43 = vld [vmem:[%s11004_s9] ss:$8 sm:$0xf] }
  0x9a   :  { %2429 = vmatpush1.bf16.msra.mxu0 %v7938_v15  ;;  %2469 = vmatprep.subr.bf16.mxu1 %v7973_v24 }
  0x9b   :  { %2430 = vmatprep.subr.bf16.mxu0 %v7943_v20 }
  0x9d   :  { %2470 = vmatpush1.bf16.msra.mxu1 %v7971_v25 }
  0x9e   :  { %2431 = vmatpush1.bf16.msra.mxu0 %v7941_v22  ;;  %2471 = vmatprep.subr.bf16.mxu1 %v7979_v28  ;;  %v9580_v22 = vshrl.u32 %v208_v21, 7 }
  0x9f   :  { %2432 = vmatprep.subr.bf16.mxu0 %v7946_v23  ;;  %v58_v23 = vld [vmem:[%s11004_s9] ss:$8 sm:$0x10] }
  0xa0   :  { %v9585_v24 = vor.u32 %v58_v23, %v57_v43  ;;  %v9588_v25 = vsub.s32 0, %v9580_v22  ;;  %v8059_v43 = vld [vmem:[%s10999_s4 + $0x52c] ss:$20 sps:$4 sm:$0xff]  }
  0xa1   :  { %2472 = vmatpush1.bf16.msra.mxu1 %v7977_v29 }
  0xa2   :  { %2433 = vmatpush1.bf16.msra.mxu0 %v7944_v26  ;;  %2473 = vmatprep.subr.bf16.mxu1 %v7985_v32  ;;  %v9591_v26 = vsub.s32 1, %v9580_v22 }
  0xa3   :  { %2434 = vmatprep.subr.bf16.mxu0 %v7949_v27  ;;  %v211_v27 = vrot.slane %v9585_v24, %v9588_v25 }
  0xa4   :  { %v215_v28 = vrot.slane %v9585_v24, %v9591_v26 }
  0xa5   :  { %2474 = vmatpush1.bf16.msra.mxu1 %v7983_v33 }
  0xa6   :  { %2435 = vmatpush1.bf16.msra.mxu0 %v7947_v30  ;;  %2475 = vmatprep.subr.bf16.mxu1 %v7991_v36 }
  0xa7   :  { %2436 = vmatprep.subr.bf16.mxu0 %v7952_v31 }
  0xa9   :  { %2476 = vmatpush1.bf16.msra.mxu1 %v7989_v37 }
  0xaa   :  { %2437 = vmatpush1.bf16.msra.mxu0 %v7950_v34  ;;  %2477 = vmatprep.subr.bf16.mxu1 %v7997_v40 }
  0xab   :  { %2438 = vmatprep.subr.bf16.mxu0 %v7955_v35 }
  0xad   :  { %2478 = vmatpush1.bf16.msra.mxu1 %v7995_v41 }
  0xae   :  { %2439 = vmatpush1.bf16.msra.mxu0 %v7953_v38  ;;  %2479 = vmatprep.subr.bf16.mxu1 %v8003_v46 }
  0xaf   :  { %2440 = vmatprep.subr.bf16.mxu0 %v7958_v39 }
  0xb1   :  { %2480 = vmatpush1.bf16.msra.mxu1 %v8001_v45  ;;  %v1149_v45 = vld [vmem:[%s10997_s2] sm:$0xff] }
  0xb2   :  { %2441 = vmatpush2.bf16.msra.mxu0 %v7956_v42  ;;  %2481 = vmatprep.subr.bf16.mxu1 %v8006_v49  ;;  %v1150_v42 = vld [vmem:[%s10997_s2 + $0x8] sm:$0xff]  ;;  %vm1154_vm8 = vcmp.lt.f32.partialorder %v1149_v45, 0.9  ;;  %v8028_v45 = vld [vmem:[%s10999_s4 + $0x120] ss:$20 sps:$4 sm:$0xff]  }
  0xb3   :  { %2442 = vmatprep.subr.bf16.mxu0 %v7964_v44  ;;  %vm1155_vm6 = vcmp.lt.f32.partialorder %v1150_v42, 0.9  ;;  %vm9612_vm10 = vmpackc.low %vm1154_vm8, %vm1154_vm8 }
  0xb4   :  { %vm9603_vm9 = vmpackc.low %vm1155_vm6, %vm1155_vm6  ;;  %vm2404_vm6 = vcmask 719872  }
  0xb5   :  { %2482 = vmatpush2.bf16.msra.mxu1 %v8004_v51  ;;  %v6919_v51 = vcombine.low %v1400_v16, %v1400_v16 }
  0xb6   :  { %2443 = vmatpush2.bf16.msra.mxu0 %v7962_v47  ;;  %2483 = vmatprep.subr.bf16.mxu1 %v8009_v53  ;;  %v8171_v53 = vld [vmem:[%s10999_s4 + $0x448] ss:$20 sps:$4 sm:$0xff]  }
  0xb7   :  { %2444 = vmatprep.subr.bf16.mxu0 %v7970_v48 }
  0xb9   :  { %2484 = vmatpush2.bf16.msra.mxu1 %v8007_v55 }
  0xba   :  { %2445 = vmatpush2.bf16.msra.mxu0 %v7968_v50  ;;  %2485 = vmatprep.subr.bf16.mxu1 %v8012_v59  ;;  %v8041_v59 = vld [vmem:[%s10999_s4 + $0x5a4] ss:$20 sps:$4 sm:$0xff]  }
  0xbb   :  { %2446 = vmatprep.subr.bf16.mxu0 %v7976_v52 }
  0xbd   :  { %2486 = vmatpush2.bf16.msra.mxu1 %v8010_v60  ;;  %v9622_v60 = vsub.s32 3, %v9580_v22 }
  0xbe   :  { %2447 = vmatpush2.bf16.msra.mxu0 %v7974_v54  ;;  %2487 = vmatprep.subr.bf16.mxu1 %v8015_v61  ;;  %v9608_v54 = vsub.s32 2, %v9580_v22 }
  0xbf   :  { %2448 = vmatprep.subr.bf16.mxu0 %v7982_v58  ;;  %v8205_v58 = vld [vmem:[%s11000_s5 + $0x40] ss:$8 sps:$4 sm:$0xff]  }
  0xc1   :  { %2488 = vmatpush2.bf16.msra.mxu1 %v8013_v63  ;;  %v219_v63 = vrot.slane %v9585_v24, %v9608_v54 }
  0xc2   :  { %2449 = vmatpush2.bf16.msra.mxu0 %v7980_v5  ;;  %2489 = vmatprep.subr.bf16.mxu1 %v8018_v2  ;;  %v223_v2 = vrot.slane %v9585_v24, %v9622_v60 }
  0xc3   :  { %2450 = vmatprep.subr.bf16.mxu0 %v7988_v57  ;;  %v2410_v57 = vsel %vm2408_vm4, %v6919_v51, 0  ;;  %v8033_v51 = vld [vmem:[%s10999_s4 + $0xfc] ss:$20 sps:$4 sm:$0xff]  }
  0xc5   :  { %2490 = vmatpush2.bf16.msra.mxu1 %v8016_v4 }
  0xc6   :  { %2451 = vmatpush2.bf16.msra.mxu0 %v7986_v62  ;;  %2491 = vmatprep.subr.bf16.mxu1 %v8021_v7  ;;  %v8039_v62 = vld [vmem:[%s10999_s4 + $0x5a0] ss:$20 sps:$4 sm:$0xff]  }
  0xc7   :  { %2452 = vmatprep.subr.bf16.mxu0 %v7994_v1 }
  0xc9   :  { %2492 = vmatpush2.bf16.msra.mxu1 %v8019_v9 }
  0xca   :  { %2453 = vmatpush2.bf16.msra.mxu0 %v7992_v3  ;;  %2493 = vmatprep.subr.bf16.mxu1 %v8024_v10  ;;  %v8047_v3 = vld [vmem:[%s10999_s4 + $0x57c] ss:$20 sps:$4 sm:$0xff]   ;;  %v8045_v10 = vld [vmem:[%s10999_s4 + $0x578] ss:$20 sps:$4 sm:$0xff]  }
  0xcb   :  { %2454 = vmatprep.subr.bf16.mxu0 %v8000_v6 }
  0xcd   :  { %2494 = vmatpush2.bf16.msra.mxu1 %v8022_v11 }
  0xce   :  { %2455 = vmatpush2.bf16.msra.mxu0 %v7998_v8  ;;  %2495 = vmatprep.subr.bf16.mxu1 %v8027_v12 }
  0xcf   :  { %6936 = vmatprep.subr.msk.bf16.mxu0 %vm2408_vm4, %v6920_v17 }
  0xd1   :  { %2496 = vmatpush2.bf16.msra.mxu1 %v8025_v13  ;;  %v8053_v13 = vld [vmem:[%s10999_s4 + $0x554] ss:$20 sps:$4 sm:$0xff]  }
  0xd2   :  { %2547 = vmatprep.subr.bf16.mxu1 %v8030_v14 }
  0xf4   :  { %v950_v18 = vpop.f32.mrf.mxu1 }
  0xf6   :  { %v952_v19 = vpop.f32.mrf.mxu1 }
  0xf8   :  { %v954_v15 = vpop.f32.mrf.mxu1 }
  0xfa   :  { %v955_v20 = vpop.f32.mrf.mxu1 }
 0x111   :  { %v909_v29 = vpop.f32.mrf.mxu0 }
 0x112   :  { %v910_v30 = vadd.f32 %v909_v29, %v211_v27  ;;  %v8057_v27 = vld [vmem:[%s10999_s4 + $0x528] ss:$20 sps:$4 sm:$0xff]   ;;  %v8063_v29 = vld [vmem:[%s10999_s4 + $0x500] ss:$20 sps:$4 sm:$0xff]  }
 0x113   :  { %v911_v31 = vpop.f32.mrf.mxu0 }
 0x114   :  { %v951_v32 = vadd.f32 %v950_v18, %v910_v30  ;;  %v912_v33 = vadd.f32 %v911_v31, %v215_v28  ;;  %v8065_v28 = vld [vmem:[%s10999_s4 + $0x504] ss:$20 sps:$4 sm:$0xff]  }
 0x115   :  { %v913_v34 = vpop.f32.mrf.mxu0  ;;  %v8074_v30 = vld [vmem:[%s10999_s4 + $0x3a4] ss:$20 sps:$4 sm:$0xff]  }
 0x116   :  { %v1124_v35 = vmin.f32 %v951_v32, 0.0  ;;  %v953_v36 = vadd.f32 %v952_v19, %v912_v33  ;;  %vm1119_vm5 = vcmp.gt.f32.partialorder %v951_v32, 0.0  ;;  %v8051_v19 = vld [vmem:[%s10999_s4 + $0x550] ss:$20 sps:$4 sm:$0xff]   ;;  %v1152_v31 = vld [vmem:[%s10997_s2 + $0x18] sm:$0xff] }
 0x117   :  { %v914_v37 = vpop.f32.mrf.mxu0  ;;  %vm1157_vm11 = vcmp.lt.f32.partialorder %v1152_v31, 0.9  ;;  %v1151_v33 = vld [vmem:[%s10997_s2 + $0x10] sm:$0xff] }
 0x118   :  { %v1129_v38 = vmul.f32 1.442695, %v1124_v35  ;;  %v1125_v39 = vmin.f32 %v953_v36, 0.0  ;;  %vm1120_vm7 = vcmp.gt.f32.partialorder %v953_v36, 0.0  ;;  %vm1156_vm14 = vcmp.lt.f32.partialorder %v1151_v33, 0.9  ;;  %vm9675_vm15 = vmpackc.low %vm1157_vm11, %vm1157_vm11 }
 0x119   :  { %vm9682_vm0 = vmpackc.low %vm1156_vm14, %vm1156_vm14  ;;  %v8069_v31 = vld [vmem:[%s10999_s4 + $0x260] ss:$20 sps:$4 sm:$0xff]   ;;  %v8077_v33 = vld [vmem:[%s10999_s4 + $0x23c] ss:$20 sps:$4 sm:$0xff]  }
 0x11a   :  { %8759 = vpow2.f32 %v1129_v38  ;;  %v1131_v40 = vmul.f32 1.442695, %v1125_v39 }
 0x11c   :  { %8761 = vpow2.f32 %v1131_v40  ;;  %v8166_v40 = vld [vmem:[%s10999_s4 + $0x240] ss:$20 sps:$4 sm:$0xff]  }
 0x127   :  { %v8760_v41 = vpop.eup %8759 }
 0x128   :  { %v6727_v44 = vadd.f32 -1.0, %v8760_v41 }
 0x129   :  { %v8762_v46 = vpop.eup %8761 }
 0x12a   :  { %v1144_v47 = vsel %vm1119_vm5, %v951_v32, %v6727_v44  ;;  %v6728_v48 = vadd.f32 -1.0, %v8762_v46 }
 0x12b   :  { %v1159_v49 = vmul.f32 1.1111112, %v1144_v47 }
 0x12c   :  { %v1145_v50 = vsel %vm1120_vm7, %v953_v36, %v6728_v48  ;;  %v9673_v36 = vsub.s32 4, %v9580_v22 }
 0x12d   :  { %v1160_v52 = vmul.f32 1.1111112, %v1145_v50  ;;  %v9619_v5 = vpack.c.bf16 %v1159_v49, %v1159_v49 }
 0x12e   :  { %v227_v22 = vrot.slane %v9585_v24, %v9673_v36  ;;  %v8031_v24 = vld [vmem:[%s10999_s4 + $0xf8] ss:$20 sps:$4 sm:$0xff]  }
 0x12f   :  { %v9610_v55 = vpack.c.bf16 %v1160_v52, %v1160_v52 }
 0x131   :  { %v1032_v61 = vpop.f32.mrf.mxu0  ;;  %6926 = vmatprep.mubr.msk.bf16.mxu0 %vm9603_vm9, %v9610_v55 }
 0x132   :  { %6929 = vmatmul.mubr.msk.bf16.vlgmr.msra.gmra.mxu0 %vm9612_vm10, %v9619_v5 }
 0x133   :  { %v1034_v1 = vpop.f32.mrf.mxu0  ;;  %2511 = vmatpush1.bf16.msra.mxu0 %v2410_v57  ;;  %2538 = vmatprep.mubr.bf16.mxu0 %v8900_v0 }
 0x134   :  { %2512 = vmatprep.subr.bf16.mxu0 %v8041_v59  ;;  %v991_v4 = vpop.f32.mrf.mxu1 }
 0x135   :  { %v1036_v6 = vpop.f32.mrf.mxu0  ;;  %v992_v7 = vadd.f32 %v991_v4, %v219_v63 }
 0x136   :  { %v993_v8 = vpop.f32.mrf.mxu1  ;;  %v8044_v6 = vld [vmem:[%s10999_s4 + $0xac] ss:$20 sps:$4 sm:$0xff]  }
 0x137   :  { %v1037_v9 = vpop.f32.mrf.mxu0  ;;  %2513 = vmatpush1.bf16.msra.mxu0 %v8039_v62  ;;  %v1033_v11 = vadd.f32 %v1032_v61, %v992_v7  ;;  %v994_v12 = vadd.f32 %v993_v8, %v223_v2  ;;  %v8037_v61 = vld [vmem:[%s10999_s4 + $0xd4] ss:$20 sps:$4 sm:$0xff]  }
 0x138   :  { %2514 = vmatprep.subr.bf16.mxu0 %v8047_v3  ;;  %v995_v14 = vpop.f32.mrf.mxu1  ;;  %v8035_v3 = vld [vmem:[%s10999_s4 + $0xd0] ss:$20 sps:$4 sm:$0xff]   ;;  %v8042_v9 = vld [vmem:[%s10999_s4 + $0xa8] ss:$20 sps:$4 sm:$0xff]  }
 0x139   :  { %v1126_v16 = vmin.f32 %v1033_v11, 0.0  ;;  %v1035_v17 = vadd.f32 %v1034_v1, %v994_v12  ;;  %vm1121_vm12 = vcmp.gt.f32.partialorder %v1033_v11, 0.0  ;;  %v8056_v12 = vld [vmem:[%s10999_s4 + $0x5c] ss:$20 sps:$4 sm:$0xff]   ;;  %v8062_v14 = vld [vmem:[%s10999_s4 + $0x34] ss:$20 sps:$4 sm:$0xff]  }
 0x13a   :  { %v996_v18 = vpop.f32.mrf.mxu1 }
 0x13b   :  { %2515 = vmatpush1.bf16.msra.mxu0 %v8045_v10  ;;  %v1133_v15 = vmul.f32 1.442695, %v1126_v16  ;;  %v1127_v20 = vmin.f32 %v1035_v17, 0.0  ;;  %vm1122_vm13 = vcmp.gt.f32.partialorder %v1035_v17, 0.0  ;;  %v8050_v10 = vld [vmem:[%s10999_s4 + $0x84] ss:$20 sps:$4 sm:$0xff]  }
 0x13c   :  { %2516 = vmatprep.subr.bf16.mxu0 %v8053_v13  ;;  %v8054_v13 = vld [vmem:[%s10999_s4 + $0x58] ss:$20 sps:$4 sm:$0xff]   ;;  %v1153_v16 = vld [vmem:[%s10997_s2 + $0x20] sm:$0xff] }
 0x13d   :  { %8763 = vpow2.f32 %v1133_v15  ;;  %v1135_v23 = vmul.f32 1.442695, %v1127_v20  ;;  %v8068_v15 = vld [vmem:[%s10999_s4 + $0xc] ss:$20 sps:$4 sm:$0xff]   ;;  %v8066_v20 = vld [vmem:[%s10999_s4 + $0x8] ss:$20 sps:$4 sm:$0xff]  }
 0x13e   :  { %vm1158_vm5 = vcmp.lt.f32.partialorder %v1153_v16, 0.9  ;;  %v8127_v16 = vld [vmem:[%s10999_s4 + $0x5ac] ss:$20 sps:$4 sm:$0xff]  }
 0x13f   :  { %2517 = vmatpush1.bf16.msra.mxu0 %v8051_v19  ;;  %8765 = vpow2.f32 %v1135_v23  ;;  %v8071_v23 = vld [vmem:[%s10999_s4 + $0x264] ss:$20 sps:$4 sm:$0xff]  }
 0x140   :  { %2518 = vmatprep.subr.bf16.mxu0 %v8059_v43 }
 0x143   :  { %2519 = vmatpush1.bf16.msra.mxu0 %v8057_v27 }
 0x144   :  { %2520 = vmatprep.subr.bf16.mxu0 %v8065_v28  ;;  %v8072_v28 = vld [vmem:[%s10999_s4 + $0x3a0] ss:$20 sps:$4 sm:$0xff]  }
 0x147   :  { %2521 = vmatpush1.bf16.msra.mxu0 %v8063_v29  ;;  %v8080_v29 = vld [vmem:[%s10999_s4 + $0x37c] ss:$20 sps:$4 sm:$0xff]  }
 0x148   :  { %2588 = vmatprep.subr.bf16.mxu0 %v8074_v30 }
 0x14a   :  { %v8764_v32 = vpop.eup %8763 }
 0x14b   :  { %v6729_v34 = vadd.f32 -1.0, %v8764_v32 }
 0x14c   :  { %v8766_v35 = vpop.eup %8765 }
 0x14d   :  { %v1146_v37 = vsel %vm1121_vm12, %v1033_v11, %v6729_v34  ;;  %v6730_v38 = vadd.f32 -1.0, %v8766_v35  ;;  %v8048_v11 = vld [vmem:[%s10999_s4 + $0x80] ss:$20 sps:$4 sm:$0xff]   ;;  %v8078_v34 = vld [vmem:[%s10999_s4 + $0x378] ss:$20 sps:$4 sm:$0xff]  }
 0x14e   :  { %v1161_v39 = vmul.f32 1.1111112, %v1146_v37  ;;  %v8086_v35 = vld [vmem:[%s10999_s4 + $0x354] ss:$20 sps:$4 sm:$0xff]   ;;  %v8075_v37 = vld [vmem:[%s10999_s4 + $0x238] ss:$20 sps:$4 sm:$0xff]  }
 0x14f   :  { %v1147_v41 = vsel %vm1122_vm13, %v1035_v17, %v6730_v38  ;;  %v8060_v17 = vld [vmem:[%s10999_s4 + $0x30] ss:$20 sps:$4 sm:$0xff]   ;;  %v8083_v38 = vld [vmem:[%s10999_s4 + $0x214] ss:$20 sps:$4 sm:$0xff]  }
 0x150   :  { %v1162_v42 = vmul.f32 1.1111112, %v1147_v41  ;;  %v9690_v49 = vpack.c.bf16 %v1161_v39, %v1161_v39  ;;  %v8084_v39 = vld [vmem:[%s10999_s4 + $0x350] ss:$20 sps:$4 sm:$0xff]  }
 0x151   :  { %v7497_v44 = vpop.f32.mrf.mxu0  ;;  %v8081_v41 = vld [vmem:[%s10999_s4 + $0x210] ss:$20 sps:$4 sm:$0xff]  }
 0x152   :  { %v9688_v48 = vpack.c.bf16 %v1162_v42, %v1162_v42  ;;  %v8092_v42 = vld [vmem:[%s10999_s4 + $0x32c] ss:$20 sps:$4 sm:$0xff]  }
 0x153   :  { %v7498_v47 = vpop.f32.mrf.mxu0 }
 0x154   :  { %v7499_v50 = vadd.f32 %v7498_v47, %v7497_v44  ;;  %v1113_v52 = vpop.f32.mrf.mxu1  ;;  %6932 = vmatprep.mubr.msk.bf16.mxu1 %vm9675_vm15, %v9688_v48  ;;  %v8089_v44 = vld [vmem:[%s10999_s4 + $0x1ec] ss:$20 sps:$4 sm:$0xff]   ;;  %v8087_v47 = vld [vmem:[%s10999_s4 + $0x1e8] ss:$20 sps:$4 sm:$0xff]  }
 0x155   :  { %v7500_v59 = vpop.f32.mrf.mxu0  ;;  %6935 = vmatmul.mubr.msk.bf16.vlgmr.msra.gmra.mxu1 %vm9682_vm0, %v9690_v49 }
 0x156   :  { %v1074_v57 = vadd.f32 %v7499_v50, %v227_v22  ;;  %2548 = vmatpush1.bf16.msra.mxu1 %v8028_v45  ;;  %v7689_v62 = vpop.f32.mrf.mxu1  ;;  %6940 = vmatprep.mubr.msk.bf16.mxu1 %vm9603_vm9, %v9610_v55  ;;  %v8090_v45 = vld [vmem:[%s10999_s4 + $0x328] ss:$20 sps:$4 sm:$0xff]   ;;  %v8098_v22 = vld [vmem:[%s10999_s4 + $0x304] ss:$20 sps:$4 sm:$0xff]   ;;  %v8093_v59 = vld [vmem:[%s10999_s4 + $0x1c0] ss:$20 sps:$4 sm:$0xff]  }
 0x157   :  { %v7501_v63 = vpop.f32.mrf.mxu0  ;;  %2549 = vmatprep.subr.bf16.mxu1 %v8033_v51  ;;  %v8095_v50 = vld [vmem:[%s10999_s4 + $0x1c4] ss:$20 sps:$4 sm:$0xff]   ;;  %v8096_v51 = vld [vmem:[%s10999_s4 + $0x300] ss:$20 sps:$4 sm:$0xff]  }
 0x158   :  { %v1114_v1 = vadd.f32 %v1113_v52, %v1074_v57  ;;  %v1116_v2 = vpop.f32.mrf.mxu1  ;;  %v8104_v52 = vld [vmem:[%s10999_s4 + $0x2dc] ss:$20 sps:$4 sm:$0xff]   ;;  %v8102_v57 = vld [vmem:[%s10999_s4 + $0x2d8] ss:$20 sps:$4 sm:$0xff]   ;;  %v8110_v62 = vld [vmem:[%s10999_s4 + $0x2b4] ss:$20 sps:$4 sm:$0xff]  }
 0x159   :  { %v8099_v63 = vld [vmem:[%s10999_s4 + $0x198] ss:$20 sps:$4 sm:$0xff]   ;;  %v8108_v2 = vld [vmem:[%s10999_s4 + $0x2b0] ss:$20 sps:$4 sm:$0xff]  }
 0x15a   :  { %v1128_v4 = vmin.f32 %v1114_v1, 0.0  ;;  %2550 = vmatpush1.bf16.msra.mxu1 %v8031_v24  ;;  %v7690_v7 = vpop.f32.mrf.mxu1  ;;  %vm1123_vm1 = vcmp.gt.f32.partialorder %v1114_v1, 0.0  ;;  %v8101_v24 = vld [vmem:[%s10999_s4 + $0x19c] ss:$20 sps:$4 sm:$0xff]  }
 0x15b   :  { %2551 = vmatprep.subr.bf16.mxu1 %v8037_v61  ;;  %v1401_v61 = vld [vmem:[%s10999_s4 + $0x5d0] sm:$0xff]  ;;  %v8113_v7 = vld [vmem:[%s10999_s4 + $0x14c] ss:$20 sps:$4 sm:$0xff]  }
 0x15c   :  { %v1137_v8 = vmul.f32 1.442695, %v1128_v4  ;;  %v6921_v4 = vcombine.low %v1401_v61, %v1401_v61 }
 0x15e   :  { %8767 = vpow2.f32 %v1137_v8  ;;  %2552 = vmatpush1.bf16.msra.mxu1 %v8035_v3  ;;  %v8116_v3 = vld [vmem:[%s10999_s4 + $0x28c] ss:$20 sps:$4 sm:$0xff]   ;;  %v8114_v8 = vld [vmem:[%s10999_s4 + $0x288] ss:$20 sps:$4 sm:$0xff]  }
 0x15f   :  { %2553 = vmatprep.subr.bf16.mxu1 %v8044_v6  ;;  %v8105_v6 = vld [vmem:[%s10999_s4 + $0x170] ss:$20 sps:$4 sm:$0xff]  }
 0x162   :  { %2554 = vmatpush1.bf16.msra.mxu1 %v8042_v9  ;;  %v8119_v9 = vld [vmem:[%s10999_s4 + $0x4e4] ss:$20 sps:$4 sm:$0xff]  }
 0x163   :  { %2555 = vmatprep.subr.bf16.mxu1 %v8050_v10  ;;  %v2416_v10 = vsel %vm2408_vm4, %v6921_v4, 0  ;;  %v8176_v4 = vld [vmem:[%s10999_s4 + $0xb0] ss:$20 sps:$4 sm:$0xff]  }
 0x166   :  { %2556 = vmatpush1.bf16.msra.mxu1 %v8048_v11  ;;  %v8111_v11 = vld [vmem:[%s10999_s4 + $0x148] ss:$20 sps:$4 sm:$0xff]  }
 0x167   :  { %2557 = vmatprep.subr.bf16.mxu1 %v8056_v12  ;;  %v8117_v12 = vld [vmem:[%s10999_s4 + $0x4e0] ss:$20 sps:$4 sm:$0xff]  }
 0x16a   :  { %2558 = vmatpush1.bf16.msra.mxu1 %v8054_v13  ;;  %v6922_v13 = vcombine.high %v1401_v61, %v1401_v61  ;;  %v8168_v61 = vld [vmem:[%s10999_s4 + $0x100] ss:$20 sps:$4 sm:$0xff]  }
 0x16b   :  { %v8768_v18 = vpop.eup %8767  ;;  %2559 = vmatprep.subr.bf16.mxu1 %v8062_v14  ;;  %v8124_v14 = vld [vmem:[%s10999_s4 + $0x4bc] ss:$20 sps:$4 sm:$0xff]  }
 0x16c   :  { %v6731_v19 = vadd.f32 -1.0, %v8768_v18  ;;  %v8125_v18 = vld [vmem:[%s10999_s4 + $0x5a8] ss:$20 sps:$4 sm:$0xff]  }
 0x16e   :  { %v1148_v43 = vsel %vm1123_vm1, %v1114_v1, %v6731_v19  ;;  %2560 = vmatpush1.bf16.msra.mxu1 %v8060_v17  ;;  %v8107_v1 = vld [vmem:[%s10999_s4 + $0x174] ss:$20 sps:$4 sm:$0xff]   ;;  %v8122_v17 = vld [vmem:[%s10999_s4 + $0x4b8] ss:$20 sps:$4 sm:$0xff]  }
 0x16f   :  { %v1163_v27 = vmul.f32 1.1111112, %v1148_v43  ;;  %2561 = vmatprep.subr.bf16.mxu1 %v8068_v15  ;;  %v8130_v19 = vld [vmem:[%s10999_s4 + $0x494] ss:$20 sps:$4 sm:$0xff]   ;;  %v8133_v15 = vld [vmem:[%s10999_s4 + $0x584] ss:$20 sps:$4 sm:$0xff]  }
 0x170   :  { %v8136_v43 = vld [vmem:[%s10999_s4 + $0x46c] ss:$20 sps:$4 sm:$0xff]  }
 0x171   :  { %v1168_v30 = vsel %vm1158_vm5, %v1163_v27, 0.0  ;;  %v8139_v27 = vld [vmem:[%s10999_s4 + $0x55c] ss:$20 sps:$4 sm:$0xff]  }
 0x172   :  { %v9758_v32 = vpack.c.bf16 %v1168_v30, %v1168_v30  ;;  %2562 = vmatpush1.bf16.msra.mxu1 %v8066_v20  ;;  %v8128_v20 = vld [vmem:[%s10999_s4 + $0x490] ss:$20 sps:$4 sm:$0xff]   ;;  %v8137_v30 = vld [vmem:[%s10999_s4 + $0x558] ss:$20 sps:$4 sm:$0xff]  }
 0x173   :  { %2563 = vmatprep.subr.bf16.mxu1 %v8071_v23  ;;  %v8131_v23 = vld [vmem:[%s10999_s4 + $0x580] ss:$20 sps:$4 sm:$0xff]  }
 0x174   :  { %6937 = vmatmul.mubr.msk.bf16.vlgmr.msra.gmra.mxu0 %vm2404_vm6, %v9758_v32 }
 0x175   :  { %2589 = vmatpush1.bf16.msra.mxu0 %v8072_v28  ;;  %6946 = vmatprep.mubr.msk.bf16.mxu0 %vm9675_vm15, %v9688_v48  ;;  %v8134_v28 = vld [vmem:[%s10999_s4 + $0x468] ss:$20 sps:$4 sm:$0xff]  }
 0x176   :  { %2590 = vmatprep.subr.bf16.mxu0 %v8080_v29  ;;  %2564 = vmatpush2.bf16.msra.mxu1 %v8069_v31  ;;  %v8142_v29 = vld [vmem:[%s10999_s4 + $0x444] ss:$20 sps:$4 sm:$0xff]   ;;  %v8145_v31 = vld [vmem:[%s10999_s4 + $0x534] ss:$20 sps:$4 sm:$0xff]  }
 0x177   :  { %2565 = vmatprep.subr.bf16.mxu1 %v8077_v33  ;;  %v8140_v33 = vld [vmem:[%s10999_s4 + $0x440] ss:$20 sps:$4 sm:$0xff]  }
 0x179   :  { %2591 = vmatpush1.bf16.msra.mxu0 %v8078_v34  ;;  %v8148_v34 = vld [vmem:[%s10999_s4 + $0x41c] ss:$20 sps:$4 sm:$0xff]  }
 0x17a   :  { %2592 = vmatprep.subr.bf16.mxu0 %v8086_v35  ;;  %2566 = vmatpush2.bf16.msra.mxu1 %v8075_v37  ;;  %v8143_v35 = vld [vmem:[%s10999_s4 + $0x530] ss:$20 sps:$4 sm:$0xff]   ;;  %v8151_v37 = vld [vmem:[%s10999_s4 + $0x50c] ss:$20 sps:$4 sm:$0xff]  }
 0x17b   :  { %2567 = vmatprep.subr.bf16.mxu1 %v8083_v38  ;;  %v8146_v38 = vld [vmem:[%s10999_s4 + $0x418] ss:$20 sps:$4 sm:$0xff]  }
 0x17d   :  { %2593 = vmatpush1.bf16.msra.mxu0 %v8084_v39  ;;  %v8154_v39 = vld [vmem:[%s10999_s4 + $0x3f4] ss:$20 sps:$4 sm:$0xff]  }
 0x17e   :  { %2594 = vmatprep.subr.bf16.mxu0 %v8092_v42  ;;  %2568 = vmatpush2.bf16.msra.mxu1 %v8081_v41  ;;  %v8149_v41 = vld [vmem:[%s10999_s4 + $0x508] ss:$20 sps:$4 sm:$0xff]  }
 0x17f   :  { %2569 = vmatprep.subr.bf16.mxu1 %v8089_v44  ;;  %v8155_v42 = vld [vmem:[%s10999_s4 + $0x4e8] ss:$20 sps:$4 sm:$0xff]   ;;  %v8152_v44 = vld [vmem:[%s10999_s4 + $0x3f0] ss:$20 sps:$4 sm:$0xff]  }
 0x181   :  { %2595 = vmatpush1.bf16.msra.mxu0 %v8090_v45  ;;  %v8159_v45 = vld [vmem:[%s10999_s4 + $0x3cc] ss:$20 sps:$4 sm:$0xff]  }
 0x182   :  { %2596 = vmatprep.subr.bf16.mxu0 %v8098_v22  ;;  %2570 = vmatpush2.bf16.msra.mxu1 %v8087_v47  ;;  %v8156_v22 = vld [vmem:[%s10999_s4 + $0x3a8] ss:$20 sps:$4 sm:$0xff]   ;;  %v8160_v47 = vld [vmem:[%s10999_s4 + $0x4c0] ss:$20 sps:$4 sm:$0xff]  }
 0x183   :  { %2571 = vmatprep.subr.bf16.mxu1 %v8095_v50  ;;  %v8157_v50 = vld [vmem:[%s10999_s4 + $0x3c8] ss:$20 sps:$4 sm:$0xff]  }
 0x185   :  { %2597 = vmatpush1.bf16.msra.mxu0 %v8096_v51  ;;  %v8162_v51 = vld [vmem:[%s10999_s4 + $0x268] ss:$20 sps:$4 sm:$0xff]  }
 0x186   :  { %2598 = vmatprep.subr.bf16.mxu0 %v8104_v52  ;;  %2572 = vmatpush2.bf16.msra.mxu1 %v8093_v59  ;;  %v8161_v52 = vld [vmem:[%s10999_s4 + $0x380] ss:$20 sps:$4 sm:$0xff]   ;;  %v8163_v59 = vld [vmem:[%s10999_s4 + $0x498] ss:$20 sps:$4 sm:$0xff]  }
 0x187   :  { %2573 = vmatprep.subr.bf16.mxu1 %v8101_v24  ;;  %v8164_v24 = vld [vmem:[%s10999_s4 + $0x128] ss:$20 sps:$4 sm:$0xff]  }
 0x189   :  { %2599 = vmatpush1.bf16.msra.mxu0 %v8102_v57  ;;  %v8167_v57 = vld [vmem:[%s10999_s4 + $0x470] ss:$20 sps:$4 sm:$0xff]  }
 0x18a   :  { %2600 = vmatprep.subr.bf16.mxu0 %v8110_v62  ;;  %2574 = vmatpush2.bf16.msra.mxu1 %v8099_v63  ;;  %v8170_v62 = vld [vmem:[%s10999_s4 + $0x218] ss:$20 sps:$4 sm:$0xff]   ;;  %v8169_v63 = vld [vmem:[%s10999_s4 + $0x330] ss:$20 sps:$4 sm:$0xff]  }
 0x18b   :  { %2575 = vmatprep.subr.bf16.mxu1 %v8107_v1  ;;  %v8174_v1 = vld [vmem:[%s10999_s4 + $0x1f0] ss:$20 sps:$4 sm:$0xff]  }
 0x18d   :  { %2601 = vmatpush1.bf16.msra.mxu0 %v8108_v2  ;;  %v8173_v2 = vld [vmem:[%s10999_s4 + $0x308] ss:$20 sps:$4 sm:$0xff]  }
 0x18e   :  { %2602 = vmatprep.subr.bf16.mxu0 %v8116_v3  ;;  %2576 = vmatpush2.bf16.msra.mxu1 %v8105_v6  ;;  %v8175_v3 = vld [vmem:[%s10999_s4 + $0x420] ss:$20 sps:$4 sm:$0xff]   ;;  %v8178_v6 = vld [vmem:[%s10999_s4 + $0x1c8] ss:$20 sps:$4 sm:$0xff]  }
 0x18f   :  { %2577 = vmatprep.subr.bf16.mxu1 %v8113_v7  ;;  %v8177_v7 = vld [vmem:[%s10999_s4 + $0x2e0] ss:$20 sps:$4 sm:$0xff]  }
 0x191   :  { %2603 = vmatpush1.bf16.msra.mxu0 %v8114_v8  ;;  %v8179_v8 = vld [vmem:[%s10999_s4 + $0x3f8] ss:$20 sps:$4 sm:$0xff]  }
 0x192   :  { %2604 = vmatprep.subr.bf16.mxu0 %v8119_v9  ;;  %2578 = vmatpush2.bf16.msra.mxu1 %v8111_v11  ;;  %v8180_v9 = vld [vmem:[%s10999_s4 + $0x88] ss:$20 sps:$4 sm:$0xff]   ;;  %v8181_v11 = vld [vmem:[%s10999_s4 + $0x2b8] ss:$20 sps:$4 sm:$0xff]  }
 0x193   :  { %6950 = vmatprep.subr.msk.bf16.mxu1 %vm2408_vm4, %v6922_v13  ;;  %v8184_v13 = vld [vmem:[%s10999_s4 + $0x60] ss:$20 sps:$4 sm:$0xff]  }
 0x195   :  { %2605 = vmatpush2.bf16.msra.mxu0 %v8117_v12  ;;  %6943 = vmatmul.mubr.msk.bf16.vlgmr.msra.gmra.mxu1 %vm9612_vm10, %v9619_v5  ;;  %v8183_v12 = vld [vmem:[%s10999_s4 + $0x3d0] ss:$20 sps:$4 sm:$0xff]  }
 0x196   :  { %2606 = vmatprep.subr.bf16.mxu0 %v8124_v14  ;;  %2634 = vmatpush1.bf16.msra.mxu1 %v2416_v10  ;;  %v8182_v10 = vld [vmem:[%s10999_s4 + $0x1a0] ss:$20 sps:$4 sm:$0xff]   ;;  %v8186_v14 = vld [vmem:[%s10999_s4 + $0x178] ss:$20 sps:$4 sm:$0xff]  }
 0x197   :  { %2661 = vmatprep.mubr.bf16.mxu1 %v8900_v0  ;;  %2635 = vmatprep.subr.bf16.mxu1 %v8127_v16  ;;  %v8185_v16 = vld [vmem:[%s10999_s4 + $0x290] ss:$20 sps:$4 sm:$0xff]  }
 0x199   :  { %2607 = vmatpush2.bf16.msra.mxu0 %v8122_v17  ;;  %v8198_v17 = vld [vmem:[%s11000_s5 + $0x74] ss:$8 sps:$4 sm:$0xff]  }
 0x19a   :  { %2608 = vmatprep.subr.bf16.mxu0 %v8130_v19  ;;  %2636 = vmatpush1.bf16.msra.mxu1 %v8125_v18  ;;  %v8187_v18 = vld [vmem:[%s10999_s4 + $0x38] ss:$20 sps:$4 sm:$0xff]   ;;  %v8188_v19 = vld [vmem:[%s10999_s4 + $0x150] ss:$20 sps:$4 sm:$0xff]  }
 0x19b   :  { %2637 = vmatprep.subr.bf16.mxu1 %v8133_v15  ;;  %v8196_v15 = vld [vmem:[%s11000_s5 + $0x70] ss:$8 sps:$4 sm:$0xff]  }
 0x19d   :  { %2609 = vmatpush2.bf16.msra.mxu0 %v8128_v20  ;;  %v8201_v20 = vld [vmem:[%s11000_s5 + $0x64] ss:$8 sps:$4 sm:$0xff]  }
 0x19e   :  { %2610 = vmatprep.subr.bf16.mxu0 %v8136_v43  ;;  %2638 = vmatpush1.bf16.msra.mxu1 %v8131_v23  ;;  %v8189_v43 = vld [vmem:[%s10999_s4 + $0x10] ss:$20 sps:$4 sm:$0xff]   ;;  %v8190_v23 = vld [vmem:[%s10999_s4 + $0x5d8] ss:$0 sps:$4 sm:$0xff]  }
 0x19f   :  { %2639 = vmatprep.subr.bf16.mxu1 %v8139_v27  ;;  %v8199_v27 = vld [vmem:[%s11000_s5 + $0x60] ss:$8 sps:$4 sm:$0xff]   ;;  %v2422_v46 = vsel %vm2408_vm4, %v8190_v23, 0 }
 0x1a0   :  { %v8241_v23 = vld [vmem:[%s11000_s5 + $0x80] ss:$8 sps:$4 sm:$0xff]  }
 0x1a1   :  { %2611 = vmatpush2.bf16.msra.mxu0 %v8134_v28  ;;  %v8204_v28 = vld [vmem:[%s11000_s5 + $0x54] ss:$8 sps:$4 sm:$0xff]  }
 0x1a2   :  { %2612 = vmatprep.subr.bf16.mxu0 %v8142_v29  ;;  %2640 = vmatpush1.bf16.msra.mxu1 %v8137_v30  ;;  %v8207_v29 = vld [vmem:[%s11000_s5 + $0x44] ss:$8 sps:$4 sm:$0xff]  }
 0x1a3   :  { %2641 = vmatprep.subr.bf16.mxu1 %v8145_v31  ;;  %v8191_v30 = vld [vmem:[%s10999_s4 + $0x5b0] ss:$20 sps:$4 sm:$0xff]   ;;  %v8192_v31 = vld [vmem:[%s10999_s4 + $0x588] ss:$20 sps:$4 sm:$0xff]  }
 0x1a5   :  { %2613 = vmatpush2.bf16.msra.mxu0 %v8140_v33  ;;  %v8208_v33 = vld [vmem:[%s11000_s5 + $0x30] ss:$8 sps:$4 sm:$0xff]  }
 0x1a6   :  { %2614 = vmatprep.subr.bf16.mxu0 %v8148_v34  ;;  %2642 = vmatpush1.bf16.msra.mxu1 %v8143_v35  ;;  %v8213_v34 = vld [vmem:[%s11000_s5 + $0x24] ss:$8 sps:$4 sm:$0xff]   ;;  %v8193_v35 = vld [vmem:[%s10999_s4 + $0x560] ss:$20 sps:$4 sm:$0xff]  }
 0x1a7   :  { %2643 = vmatprep.subr.bf16.mxu1 %v8151_v37  ;;  %v8211_v37 = vld [vmem:[%s11000_s5 + $0x20] ss:$8 sps:$4 sm:$0xff]  }
 0x1a9   :  { %2615 = vmatpush2.bf16.msra.mxu0 %v8146_v38  ;;  %v8216_v38 = vld [vmem:[%s11000_s5 + $0x14] ss:$8 sps:$4 sm:$0xff]  }
 0x1aa   :  { %2616 = vmatprep.subr.bf16.mxu0 %v8154_v39  ;;  %2644 = vmatpush1.bf16.msra.mxu1 %v8149_v41  ;;  %v8194_v39 = vld [vmem:[%s10999_s4 + $0x538] ss:$20 sps:$4 sm:$0xff]  }
 0x1ab   :  { %7534 = vmatprep.subr.bf16.mxu1 %v8155_v42  ;;  %v8214_v41 = vld [vmem:[%s11000_s5 + $0x10] ss:$8 sps:$4 sm:$0xff]   ;;  %v8219_v42 = vld [vmem:[%s11000_s5 + $0x4] ss:$8 sps:$4 sm:$0xff]  }
 0x1ad   :  { %2617 = vmatpush2.bf16.msra.mxu0 %v8152_v44  ;;  %6951 = vmatmul.mubr.msk.bf16.vlgmr.msra.gmra.mxu1 %vm2404_vm6, %v9758_v32  ;;  %v8195_v44 = vld [vmem:[%s10999_s4 + $0x510] ss:$20 sps:$4 sm:$0xff]  }
 0x1ae   :  { %2618 = vmatprep.subr.bf16.mxu0 %v8159_v45  ;;  %7535 = vmatpush3.bf16.msra.mxu1 %v8156_v22  ;;  %v8246_v45 = vld [vmem:[%s11000_s5 + $0x174] ss:$8 sps:$4 sm:$0xff]   ;;  %v8217_v22 = vld [vmem:[%s11000_s5] ss:$8 sps:$4 sm:$0xff]  }
 0x1af   :  { %6960 = vmatprep.mubr.msk.bf16.mxu1 %vm9675_vm15, %v9688_v48  ;;  %7536 = vmatprep.subr.bf16.mxu1 %v8160_v47  ;;  %v8165_v48 = vld [vmem:[%s10999_s4 + $0x358] ss:$20 sps:$4 sm:$0xff]   ;;  %v8222_v47 = vld [vmem:[%s11000_s5 + $0xf4] ss:$8 sps:$4 sm:$0xff]  }
 0x1b1   :  { %2619 = vmatpush2.bf16.msra.mxu0 %v8157_v50  ;;  %v8244_v50 = vld [vmem:[%s11000_s5 + $0x170] ss:$8 sps:$4 sm:$0xff]  }
 0x1b2   :  { %7512 = vmatprep.subr.bf16.mxu0 %v8162_v51  ;;  %7537 = vmatpush3.bf16.msra.mxu1 %v8161_v52  ;;  %v8249_v51 = vld [vmem:[%s11000_s5 + $0x164] ss:$8 sps:$4 sm:$0xff]   ;;  %v8220_v52 = vld [vmem:[%s11000_s5 + $0xf0] ss:$8 sps:$4 sm:$0xff]  }
 0x1b3   :  { %7538 = vmatprep.subr.bf16.mxu1 %v8163_v59  ;;  %v8225_v59 = vld [vmem:[%s11000_s5 + $0xe4] ss:$8 sps:$4 sm:$0xff]  }
 0x1b4   :  { %6949 = vmatmul.mubr.msk.bf16.vlgmr.msra.gmra.mxu0 %vm9682_vm0, %v9690_v49 }
 0x1b5   :  { %7513 = vmatpush3.bf16.msra.mxu0 %v8164_v24  ;;  %6954 = vmatprep.mubr.msk.bf16.mxu0 %vm9603_vm9, %v9610_v55  ;;  %v8172_v55 = vld [vmem:[%s10999_s4 + $0xd8] ss:$20 sps:$4 sm:$0xff]   ;;  %v8247_v24 = vld [vmem:[%s11000_s5 + $0x160] ss:$8 sps:$4 sm:$0xff]  }
 0x1b6   :  { %7514 = vmatprep.subr.bf16.mxu0 %v8166_v40  ;;  %7539 = vmatpush3.bf16.msra.mxu1 %v8165_v48  ;;  %v8252_v40 = vld [vmem:[%s11000_s5 + $0x154] ss:$8 sps:$4 sm:$0xff]  }
 0x1b7   :  { %7540 = vmatprep.subr.bf16.mxu1 %v8167_v57  ;;  %v8228_v48 = vld [vmem:[%s11000_s5 + $0xd4] ss:$8 sps:$4 sm:$0xff]   ;;  %v8250_v57 = vld [vmem:[%s11000_s5 + $0x150] ss:$8 sps:$4 sm:$0xff]  }
 0x1b9   :  { %7515 = vmatpush3.bf16.msra.mxu0 %v8168_v61 }
 0x1ba   :  { %7516 = vmatprep.subr.bf16.mxu0 %v8170_v62  ;;  %7541 = vmatpush3.bf16.msra.mxu1 %v8169_v63  ;;  %v8255_v62 = vld [vmem:[%s11000_s5 + $0x144] ss:$8 sps:$4 sm:$0xff]   ;;  %v8226_v63 = vld [vmem:[%s11000_s5 + $0xd0] ss:$8 sps:$4 sm:$0xff]  }
 0x1bb   :  { %7542 = vmatprep.subr.bf16.mxu1 %v8171_v53 }
 0x1bd   :  { %7517 = vmatpush3.bf16.msra.mxu0 %v8172_v55  ;;  %v8231_v55 = vld [vmem:[%s11000_s5 + $0xc4] ss:$8 sps:$4 sm:$0xff]  }
 0x1be   :  { %7518 = vmatprep.subr.bf16.mxu0 %v8174_v1  ;;  %7543 = vmatpush3.bf16.msra.mxu1 %v8173_v2  ;;  %v8253_v1 = vld [vmem:[%s11000_s5 + $0x140] ss:$8 sps:$4 sm:$0xff]  }
 0x1bf   :  { %7544 = vmatprep.subr.bf16.mxu1 %v8175_v3  ;;  %v8258_v3 = vld [vmem:[%s11000_s5 + $0x134] ss:$8 sps:$4 sm:$0xff]  }
 0x1c1   :  { %7519 = vmatpush3.bf16.msra.mxu0 %v8176_v4  ;;  %v8229_v4 = vld [vmem:[%s11000_s5 + $0xc0] ss:$8 sps:$4 sm:$0xff]  }
 0x1c2   :  { %7520 = vmatprep.subr.bf16.mxu0 %v8178_v6  ;;  %7545 = vmatpush3.bf16.msra.mxu1 %v8177_v7  ;;  %v8234_v7 = vld [vmem:[%s11000_s5 + $0xb4] ss:$8 sps:$4 sm:$0xff]  }
 0x1c3   :  { %7546 = vmatprep.subr.bf16.mxu1 %v8179_v8  ;;  %v8256_v8 = vld [vmem:[%s11000_s5 + $0x130] ss:$8 sps:$4 sm:$0xff]  }
 0x1c5   :  { %7521 = vmatpush3.bf16.msra.mxu0 %v8180_v9  ;;  %v8261_v9 = vld [vmem:[%s11000_s5 + $0x124] ss:$8 sps:$4 sm:$0xff]  }
 0x1c6   :  { %7522 = vmatprep.subr.bf16.mxu0 %v8182_v10  ;;  %7547 = vmatpush3.bf16.msra.mxu1 %v8181_v11  ;;  %v8232_v10 = vld [vmem:[%s11000_s5 + $0xb0] ss:$8 sps:$4 sm:$0xff]   ;;  %v8237_v11 = vld [vmem:[%s11000_s5 + $0xa4] ss:$8 sps:$4 sm:$0xff]  }
 0x1c7   :  { %7548 = vmatprep.subr.bf16.mxu1 %v8183_v12  ;;  %v8259_v12 = vld [vmem:[%s11000_s5 + $0x120] ss:$8 sps:$4 sm:$0xff]  }
 0x1c9   :  { %7523 = vmatpush3.bf16.msra.mxu0 %v8184_v13  ;;  %v8264_v13 = vld [vmem:[%s11000_s5 + $0x114] ss:$8 sps:$4 sm:$0xff]  }
 0x1ca   :  { %7524 = vmatprep.subr.bf16.mxu0 %v8186_v14  ;;  %7549 = vmatpush3.bf16.msra.mxu1 %v8185_v16  ;;  %v8235_v14 = vld [vmem:[%s11000_s5 + $0xa0] ss:$8 sps:$4 sm:$0xff]   ;;  %v8240_v16 = vld [vmem:[%s11000_s5 + $0x94] ss:$8 sps:$4 sm:$0xff]  }
 0x1cb   :  { %3293 = vmatprep.subr.bf16.mxu1 %v8198_v17  ;;  %v8262_v17 = vld [vmem:[%s11000_s5 + $0x110] ss:$8 sps:$4 sm:$0xff]  }
 0x1cd   :  { %7525 = vmatpush3.bf16.msra.mxu0 %v8187_v18  ;;  %6963 = vmatmul.mubr.msk.bf16.vlgmr.msra.gmra.mxu1 %vm9682_vm0, %v9690_v49  ;;  %v8202_v49 = vld [vmem:[%s11000_s5 + $0x50] ss:$8 sps:$4 sm:$0xff]   ;;  %v8267_v18 = vld [vmem:[%s11000_s5 + $0x104] ss:$8 sps:$4 sm:$0xff]  }
 0x1ce   :  { %7526 = vmatprep.subr.bf16.mxu0 %v8188_v19  ;;  %3294 = vmatpush1.bf16.msra.mxu1 %v8196_v15  ;;  %v8238_v19 = vld [vmem:[%s11000_s5 + $0x90] ss:$8 sps:$4 sm:$0xff]   ;;  %v8243_v15 = vld [vmem:[%s11000_s5 + $0x84] ss:$8 sps:$4 sm:$0xff]  }
 0x1cf   :  { %3295 = vmatprep.subr.bf16.mxu1 %v8201_v20  ;;  %v8265_v20 = vld [vmem:[%s11000_s5 + $0x100] ss:$8 sps:$4 sm:$0xff]  }
 0x1d1   :  { %7527 = vmatpush3.bf16.msra.mxu0 %v8189_v43  ;;  %v8270_v43 = vld [vmem:[%s11000_s5 + $0x1f4] ss:$8 sps:$4 sm:$0xff]  }
 0x1d2   :  { %7691 = vmatprep.subr.bf16.mxu0 %v8902_v56  ;;  %3296 = vmatpush1.bf16.msra.mxu1 %v8199_v27  ;;  %v8268_v27 = vld [vmem:[%s11000_s5 + $0x1f0] ss:$8 sps:$4 sm:$0xff]  }
 0x1d3   :  { %3297 = vmatprep.subr.bf16.mxu1 %v8204_v28  ;;  %v8273_v28 = vld [vmem:[%s11000_s5 + $0x1e4] ss:$8 sps:$4 sm:$0xff]  }
 0x1d4   :  { %6957 = vmatmul.mubr.msk.bf16.vlgmr.msra.gmra.mxu0 %vm9612_vm10, %v9619_v5  ;;  %v8210_v5 = vld [vmem:[%s11000_s5 + $0x34] ss:$8 sps:$4 sm:$0xff]  }
 0x1d5   :  { %7692 = vmatpush3.bf16.msra.mxu0 %v2422_v46  ;;  %7703 = vmatprep.mubr.msk.bf16.mxu0 %vm8903_vm3, %v8902_v56  ;;  %v8271_v46 = vld [vmem:[%s11000_s5 + $0x1e0] ss:$8 sps:$4 sm:$0xff]  }
 0x1d6   :  { %7693 = vmatprep.subr.bf16.mxu0 %v8902_v56  ;;  %3298 = vmatpush1.bf16.msra.mxu1 %v8202_v49  ;;  %v8276_v49 = vld [vmem:[%s11000_s5 + $0x1d4] ss:$8 sps:$4 sm:$0xff]  }
 0x1d7   :  { %3299 = vmatprep.subr.bf16.mxu1 %v8207_v29  ;;  %v8274_v29 = vld [vmem:[%s11000_s5 + $0x1d0] ss:$8 sps:$4 sm:$0xff]  }
 0x1d9   :  { %7694 = vmatpush3.bf16.msra.mxu0 %v8191_v30  ;;  %v8279_v30 = vld [vmem:[%s11000_s5 + $0x1c4] ss:$8 sps:$4 sm:$0xff]  }
 0x1da   :  { %7695 = vmatprep.subr.bf16.mxu0 %v8902_v56  ;;  %3300 = vmatpush1.bf16.msra.mxu1 %v8205_v58  ;;  %v8277_v58 = vld [vmem:[%s11000_s5 + $0x1c0] ss:$8 sps:$4 sm:$0xff]  }
 0x1db   :  { %3301 = vmatprep.subr.bf16.mxu1 %v8210_v5 }
 0x1dd   :  { %7696 = vmatpush3.bf16.msra.mxu0 %v8192_v31  ;;  %v8282_v31 = vld [vmem:[%s11000_s5 + $0x1b4] ss:$8 sps:$4 sm:$0xff]  }
 0x1de   :  { %7697 = vmatprep.subr.bf16.mxu0 %v8902_v56  ;;  %3302 = vmatpush1.bf16.msra.mxu1 %v8208_v33 }
 0x1df   :  { %3303 = vmatprep.subr.bf16.mxu1 %v8213_v34  ;;  %v8280_v34 = vld [vmem:[%s11000_s5 + $0x1b0] ss:$8 sps:$4 sm:$0xff]  }
 0x1e1   :  { %7698 = vmatpush3.bf16.msra.mxu0 %v8193_v35 }
 0x1e2   :  { %7699 = vmatprep.subr.bf16.mxu0 %v8902_v56  ;;  %3304 = vmatpush1.bf16.msra.mxu1 %v8211_v37  ;;  %v8285_v37 = vld [vmem:[%s11000_s5 + $0x1a4] ss:$8 sps:$4 sm:$0xff]  }
 0x1e3   :  { %3305 = vmatprep.subr.bf16.mxu1 %v8216_v38  ;;  %v2897_v38 = vld [vmem:[%s11000_s5 + $0x250] sm:$0xff] }
 0x1e5   :  { %7700 = vmatpush3.bf16.msra.mxu0 %v8194_v39  ;;  %v7046_v39 = vcombine.high %v2897_v38, %v2897_v38 }
 0x1e6   :  { %7701 = vmatprep.subr.bf16.mxu0 %v8902_v56  ;;  %3306 = vmatpush1.bf16.msra.mxu1 %v8214_v41 }
 0x1e7   :  { %3307 = vmatprep.subr.bf16.mxu1 %v8219_v42  ;;  %v8283_v42 = vld [vmem:[%s11000_s5 + $0x1a0] ss:$8 sps:$4 sm:$0xff]  }
 0x1e9   :  { %7702 = vmatpush3.bf16.msra.mxu0 %v8195_v44  ;;  %v8288_v44 = vld [vmem:[%s11000_s5 + $0x194] ss:$8 sps:$4 sm:$0xff]  }
 0x1ea   :  { %3334 = vmatprep.subr.bf16.mxu0 %v8246_v45  ;;  %3308 = vmatpush1.bf16.msra.mxu1 %v8217_v22  ;;  %v8286_v45 = vld [vmem:[%s11000_s5 + $0x190] ss:$8 sps:$4 sm:$0xff]   ;;  %v8291_v22 = vld [vmem:[%s11000_s5 + $0x184] ss:$8 sps:$4 sm:$0xff]  }
 0x1eb   :  { %3309 = vmatprep.subr.bf16.mxu1 %v8222_v47  ;;  %v8289_v47 = vld [vmem:[%s11000_s5 + $0x180] ss:$8 sps:$4 sm:$0xff]  }
 0x1ec   :  { %7704 = vmatmul.mubr.msk.bf16.vlgmr.msra.gmra.mxu0 %vm2404_vm6, %v9758_v32  ;;  %v8223_v32 = vld [vmem:[%s11000_s5 + $0xe0] ss:$8 sps:$4 sm:$0xff]  }
 0x1ed   :  { %3335 = vmatpush1.bf16.msra.mxu0 %v8244_v50  ;;  %v6732_v50 = vld [vmem:[%s11004_s9 + $0x1] ss:$8 sm:$0xf] }
 0x1ee   :  { %3336 = vmatprep.subr.bf16.mxu0 %v8249_v51  ;;  %3310 = vmatpush2.bf16.msra.mxu1 %v8220_v52  ;;  %v6733_v51 = vld [vmem:[%s11004_s9 + $0x1] ss:$8 sm:$0x10] }
 0x1ef   :  { %3311 = vmatprep.subr.bf16.mxu1 %v8225_v59  ;;  %v10281_v52 = vor.u32 %v6733_v51, %v6732_v50  ;;  %v6967_v50 = vld [vmem:[%s10997_s2 + $0x38] sm:$0xff] }
 0x1f0   :  { %vm2803_vm12 = vcmp.lt.f32.partialorder %v6967_v50, 0.9 }
 0x1f1   :  { %3337 = vmatpush1.bf16.msra.mxu0 %v8247_v24  ;;  %v1407_v59 = vrot.slane %v10281_v52, %v9588_v25  ;;  %v1411_v24 = vrot.slane %v10281_v52, %v9591_v26  ;;  %vm7056_vm14 = vmpackc.low %vm2803_vm12, %vm2803_vm12 }
 0x1f2   :  { %v10156_v61 = vpop.f32.mrf.mxu0  ;;  %3338 = vmatprep.subr.bf16.mxu0 %v8252_v40  ;;  %3312 = vmatpush2.bf16.msra.mxu1 %v8223_v32 }
 0x1f3   :  { %3313 = vmatprep.subr.bf16.mxu1 %v8228_v48  ;;  %v2459_v40 = vadd.f32 %v10156_v61, %v1407_v59  ;;  %v6965_v61 = vld [vmem:[%s10997_s2 + $0x28] sm:$0xff] }
 0x1f4   :  { %v10164_v53 = vpop.f32.mrf.mxu0  ;;  %vm2801_vm8 = vcmp.lt.f32.partialorder %v6965_v61, 0.9 }
 0x1f5   :  { %3339 = vmatpush1.bf16.msra.mxu0 %v8250_v57  ;;  %v2461_v32 = vadd.f32 %v10164_v53, %v1411_v24  ;;  %vm7050_vm10 = vmpackc.low %vm2801_vm8, %vm2801_vm8  ;;  %vm3452_vm8 = vcmask 261120  }
 0x1f6   :  { %v2462_v2 = vpop.f32.mrf.mxu0  ;;  %3340 = vmatprep.subr.bf16.mxu0 %v8255_v62  ;;  %3314 = vmatpush2.bf16.msra.mxu1 %v8226_v63 }
 0x1f7   :  { %3315 = vmatprep.subr.bf16.mxu1 %v8231_v55 }
 0x1f8   :  { %v2463_v6 = vpop.f32.mrf.mxu0 }
 0x1f9   :  { %3341 = vmatpush1.bf16.msra.mxu0 %v8253_v1 }
 0x1fa   :  { %3342 = vmatprep.subr.bf16.mxu0 %v8258_v3  ;;  %3316 = vmatpush2.bf16.msra.mxu1 %v8229_v4  ;;  %v6966_v4 = vld [vmem:[%s10997_s2 + $0x30] sm:$0xff] }
 0x1fb   :  { %3317 = vmatprep.subr.bf16.mxu1 %v8234_v7  ;;  %vm2802_vm7 = vcmp.lt.f32.partialorder %v6966_v4, 0.9 }
 0x1fc   :  { %vm7047_vm9 = vmpackc.low %vm2802_vm7, %vm2802_vm7 }
 0x1fd   :  { %3343 = vmatpush1.bf16.msra.mxu0 %v8256_v8  ;;  %v7045_v8 = vcombine.low %v2897_v38, %v2897_v38 }
 0x1fe   :  { %3344 = vmatprep.subr.bf16.mxu0 %v8261_v9  ;;  %3318 = vmatpush2.bf16.msra.mxu1 %v8232_v10 }
 0x1ff   :  { %3319 = vmatprep.subr.bf16.mxu1 %v8237_v11 }
 0x201   :  { %3345 = vmatpush1.bf16.msra.mxu0 %v8259_v12  ;;  %v3288_v12 = vsel %vm2408_vm4, %v7045_v8, 0 }
 0x202   :  { %3346 = vmatprep.subr.bf16.mxu0 %v8264_v13  ;;  %3320 = vmatpush2.bf16.msra.mxu1 %v8235_v14  ;;  %v8296_v13 = vld [vmem:[%s11000_s5 + $0x244] ss:$8 sps:$4 sm:$0xff]   ;;  %v8294_v14 = vld [vmem:[%s11000_s5 + $0x240] ss:$8 sps:$4 sm:$0xff]  }
 0x203   :  { %3321 = vmatprep.subr.bf16.mxu1 %v8240_v16  ;;  %v8299_v16 = vld [vmem:[%s11000_s5 + $0x234] ss:$8 sps:$4 sm:$0xff]  }
 0x205   :  { %3347 = vmatpush1.bf16.msra.mxu0 %v8262_v17  ;;  %v8297_v17 = vld [vmem:[%s11000_s5 + $0x230] ss:$8 sps:$4 sm:$0xff]  }
 0x206   :  { %3348 = vmatprep.subr.bf16.mxu0 %v8267_v18  ;;  %3322 = vmatpush2.bf16.msra.mxu1 %v8238_v19  ;;  %v8302_v18 = vld [vmem:[%s11000_s5 + $0x224] ss:$8 sps:$4 sm:$0xff]   ;;  %v8300_v19 = vld [vmem:[%s11000_s5 + $0x220] ss:$8 sps:$4 sm:$0xff]  }
 0x207   :  { %3323 = vmatprep.subr.bf16.mxu1 %v8243_v15 }
 0x209   :  { %3349 = vmatpush1.bf16.msra.mxu0 %v8265_v20  ;;  %v8305_v20 = vld [vmem:[%s11000_s5 + $0x214] ss:$8 sps:$4 sm:$0xff]  }
 0x20a   :  { %3350 = vmatprep.subr.bf16.mxu0 %v8270_v43  ;;  %3324 = vmatpush2.bf16.msra.mxu1 %v8241_v23  ;;  %v8303_v23 = vld [vmem:[%s11000_s5 + $0x210] ss:$8 sps:$4 sm:$0xff]  }
 0x20b   :  { %7059 = vmatprep.subr.msk.bf16.mxu1 %vm2408_vm4, %v7046_v39 }
 0x20d   :  { %3351 = vmatpush2.bf16.msra.mxu0 %v8268_v27 }
 0x20e   :  { %3352 = vmatprep.subr.bf16.mxu0 %v8273_v28  ;;  %v8308_v28 = vld [vmem:[%s11000_s5 + $0x204] ss:$8 sps:$4 sm:$0xff]  }
 0x211   :  { %3353 = vmatpush2.bf16.msra.mxu0 %v8271_v46 }
 0x212   :  { %3354 = vmatprep.subr.bf16.mxu0 %v8276_v49  ;;  %v8306_v49 = vld [vmem:[%s11000_s5 + $0x200] ss:$8 sps:$4 sm:$0xff]  }
 0x215   :  { %3355 = vmatpush2.bf16.msra.mxu0 %v8274_v29  ;;  %v2499_v5 = vpop.f32.mrf.mxu1 }
 0x216   :  { %3356 = vmatprep.subr.bf16.mxu0 %v8279_v30  ;;  %v2500_v48 = vadd.f32 %v2499_v5, %v2459_v40  ;;  %v1415_v30 = vrot.slane %v10281_v52, %v9608_v54  ;;  %v1419_v5 = vrot.slane %v10281_v52, %v9622_v60 }
 0x217   :  { %v2501_v33 = vpop.f32.mrf.mxu1 }
 0x218   :  { %v2502_v62 = vadd.f32 %v2501_v33, %v2461_v32 }
 0x219   :  { %3357 = vmatpush2.bf16.msra.mxu0 %v8277_v58  ;;  %v2503_v35 = vpop.f32.mrf.mxu1 }
 0x21a   :  { %3358 = vmatprep.subr.bf16.mxu0 %v8282_v31 }
 0x21b   :  { %v2504_v41 = vpop.f32.mrf.mxu1 }
 0x21d   :  { %3359 = vmatpush2.bf16.msra.mxu0 %v8280_v34 }
 0x21e   :  { %3360 = vmatprep.subr.bf16.mxu0 %v8285_v37 }
 0x221   :  { %3361 = vmatpush2.bf16.msra.mxu0 %v8283_v42 }
 0x222   :  { %3362 = vmatprep.subr.bf16.mxu0 %v8288_v44 }
 0x225   :  { %3363 = vmatpush2.bf16.msra.mxu0 %v8286_v45 }
 0x226   :  { %3364 = vmatprep.subr.bf16.mxu0 %v8291_v22 }
 0x229   :  { %3365 = vmatpush2.bf16.msra.mxu0 %v8289_v47  ;;  %v6968_v47 = vld [vmem:[%s10997_s2 + $0x40] sm:$0xff] }
 0x22a   :  { %vm2804_vm11 = vcmp.lt.f32.partialorder %v6968_v47, 0.9  ;;  %v6970_v47 = vld [vmem:[%s11004_s9 + $0x2] ss:$8 sm:$0x3] }
 0x22b   :  { %vm7053_vm13 = vmpackc.low %vm2804_vm11, %vm2804_vm11  ;;  %v2902_v50 = vrot.slane %v6970_v47, %v9588_v25  ;;  %vm3662_vm11 = vcmask 654336  }
 0x234   :  { %v2540_v57 = vpop.f32.mrf.mxu0 }
 0x235   :  { %v2541_v63 = vadd.f32 %v2540_v57, %v2500_v48 }
 0x236   :  { %v2542_v55 = vpop.f32.mrf.mxu0 }
 0x237   :  { %8769 = vtanh.f32 %v2541_v63  ;;  %v2543_v1 = vadd.f32 %v2542_v55, %v2502_v62  ;;  %v3454_v55 = vld [vmem:[%s10996_s1] sm:$0xff] }
 0x238   :  { %v2544_v2 = vpop.f32.mrf.mxu0  ;;  %3456 = vrot.lane.b32.xlu0 %v3454_v55, %s8904_s0 }
 0x239   :  { %8771 = vtanh.f32 %v2543_v1 }
 0x23a   :  { %v2545_v3 = vpop.f32.mrf.mxu0 }
 0x244   :  { %v8770_v6 = vpop.eup %8769 }
 0x245   :  { %v2806_v7 = vmul.f32 1.1111112, %v8770_v6  ;;  %v1423_v6 = vrot.slane %v10281_v52, %v9673_v36 }
 0x246   :  { %v8772_v53 = vpop.eup %8771 }
 0x247   :  { %v2807_v9 = vmul.f32 1.1111112, %v8772_v53  ;;  %v7051_v11 = vpack.c.bf16 %v2806_v7, %v2806_v7 }
 0x249   :  { %v7048_v10 = vpack.c.bf16 %v2807_v9, %v2807_v9 }
 0x24b   :  { %7049 = vmatprep.mubr.msk.bf16.mxu1 %vm7047_vm9, %v7048_v10 }
 0x24c   :  { %7052 = vmatmul.mubr.msk.bf16.vlgmr.msra.gmra.mxu1 %vm7050_vm10, %v7051_v11  ;;  %vm3467_vm10 = vcmask 392192  }
 0x24d   :  { %3380 = vmatpush1.bf16.msra.mxu1 %v3288_v12  ;;  %3407 = vmatprep.mubr.bf16.mxu1 %v8900_v0 }
 0x24e   :  { %3381 = vmatprep.subr.bf16.mxu1 %v8296_v13 }
 0x251   :  { %3382 = vmatpush1.bf16.msra.mxu1 %v8294_v14 }
 0x252   :  { %3383 = vmatprep.subr.bf16.mxu1 %v8299_v16  ;;  %v6969_v16 = vld [vmem:[%s10997_s2 + $0x48] sm:$0xff] }
 0x253   :  { %vm2805_vm15 = vcmp.lt.f32.partialorder %v6969_v16, 0.9  ;;  %v3417_v16 = vand.u32 127, %v208_v21 }
 0x255   :  { %3384 = vmatpush1.bf16.msra.mxu1 %v8297_v17  ;;  %v2581_v15 = vpop.f32.mrf.mxu1  ;;  %vm3419_vm0 = vcmp.lt.s32.totalorder %v3417_v16, 80  ;;  %v8371_v16 = vld [vmem:[#allocation2 + $0x2f8] ss:$20 sps:$4 sm:$0xff]  }
 0x256   :  { %3385 = vmatprep.subr.bf16.mxu1 %v8302_v18  ;;  %v2582_v33 = vadd.f32 %v2581_v15, %v1415_v30  ;;  %v8320_v30 = vld [vmem:[%s11001_s6 + $0x84] ss:$20 sps:$4 sm:$0xff]  }
 0x257   :  { %v2583_v43 = vpop.f32.mrf.mxu1 }
 0x258   :  { %v2584_v37 = vadd.f32 %v2583_v43, %v1419_v5  ;;  %v8318_v5 = vld [vmem:[%s11001_s6 + $0x80] ss:$20 sps:$4 sm:$0xff]  }
 0x259   :  { %3386 = vmatpush1.bf16.msra.mxu1 %v8300_v19  ;;  %v2585_v27 = vpop.f32.mrf.mxu1 }
 0x25a   :  { %3387 = vmatprep.subr.bf16.mxu1 %v8305_v20  ;;  %v8309_v27 = vld [vmem:[%s11001_s6 + $0xa0] ss:$20 sps:$4 sm:$0xff]  }
 0x25b   :  { %v2586_v46 = vpop.f32.mrf.mxu1 }
 0x25c   :  { %v8312_v46 = vld [vmem:[%s11001_s6 + $0xa8] ss:$20 sps:$4 sm:$0xff]  }
 0x25d   :  { %3388 = vmatpush1.bf16.msra.mxu1 %v8303_v23 }
 0x25e   :  { %3389 = vmatprep.subr.bf16.mxu1 %v8308_v28  ;;  %v8311_v28 = vld [vmem:[%s11001_s6 + $0xa4] ss:$20 sps:$4 sm:$0xff]  }
 0x25f   :  { %3672 = vmatprep.subr.bf16.mxu0 %v8311_v28 }
 0x261   :  { %3390 = vmatpush1.bf16.msra.mxu1 %v8306_v49  ;;  %v8314_v49 = vld [vmem:[%s11001_s6 + $0xac] ss:$20 sps:$4 sm:$0xff]  }
 0x262   :  { %3713 = vmatprep.subr.bf16.mxu1 %v8314_v49 }
 0x26d   :  { %v2663_v29 = vpop.f32.mrf.mxu1 }
 0x26f   :  { %v2665_v58 = vpop.f32.mrf.mxu1 }
 0x271   :  { %v2667_v31 = vpop.f32.mrf.mxu1 }
 0x272   :  { %v8323_v31 = vld [vmem:[%s11001_s6 + $0x54] ss:$20 sps:$4 sm:$0xff]  }
 0x273   :  { %v2668_v34 = vpop.f32.mrf.mxu1 }
 0x274   :  { %v2622_v35 = vpop.f32.mrf.mxu0  ;;  %v8321_v34 = vld [vmem:[%s11001_s6 + $0x50] ss:$20 sps:$4 sm:$0xff]  }
 0x275   :  { %v2623_v38 = vadd.f32 %v2622_v35, %v2582_v33  ;;  %v8326_v33 = vld [vmem:[%s11001_s6 + $0x5c] ss:$20 sps:$4 sm:$0xff]   ;;  %v8324_v35 = vld [vmem:[%s11001_s6 + $0x58] ss:$20 sps:$4 sm:$0xff]  }
 0x276   :  { %v2624_v39 = vpop.f32.mrf.mxu0 }
 0x277   :  { %v2664_v41 = vadd.f32 %v2663_v29, %v2623_v38  ;;  %v2625_v42 = vadd.f32 %v2624_v39, %v2584_v37  ;;  %v8317_v29 = vld [vmem:[%s11001_s6 + $0x7c] ss:$20 sps:$4 sm:$0xff]   ;;  %v8329_v37 = vld [vmem:[%s11001_s6 + $0x2c] ss:$20 sps:$4 sm:$0xff]   ;;  %v8332_v38 = vld [vmem:[%s11001_s6 + $0x34] ss:$20 sps:$4 sm:$0xff]  }
 0x278   :  { %v2626_v44 = vpop.f32.mrf.mxu0  ;;  %v8327_v39 = vld [vmem:[%s11001_s6 + $0x28] ss:$20 sps:$4 sm:$0xff]  }
 0x279   :  { %8773 = vtanh.f32 %v2664_v41  ;;  %v2666_v45 = vadd.f32 %v2665_v58, %v2625_v42  ;;  %v8315_v58 = vld [vmem:[%s11001_s6 + $0x78] ss:$20 sps:$4 sm:$0xff]   ;;  %v8330_v41 = vld [vmem:[%s11001_s6 + $0x30] ss:$20 sps:$4 sm:$0xff]  }
 0x27a   :  { %v2627_v22 = vpop.f32.mrf.mxu0 }
 0x27b   :  { %8775 = vtanh.f32 %v2666_v45 }
 0x286   :  { %v8774_v51 = vpop.eup %8773 }
 0x287   :  { %v2808_v24 = vmul.f32 1.1111112, %v8774_v51  ;;  %v2906_v51 = vrot.slane %v6970_v47, %v9591_v26  ;;  %v8358_v47 = vld [vmem:[#allocation2 + $0xcc] ss:$20 sps:$4 sm:$0xff]  }
 0x288   :  { %v8776_v59 = vpop.eup %8775 }
 0x289   :  { %v2809_v40 = vmul.f32 1.1111112, %v8776_v59  ;;  %v7057_v48 = vpack.c.bf16 %v2808_v24, %v2808_v24 }
 0x28b   :  { %v7054_v32 = vpack.c.bf16 %v2809_v40, %v2809_v40 }
 0x28d   :  { %7055 = vmatprep.mubr.msk.bf16.mxu0 %vm7053_vm13, %v7054_v32  ;;  %v7550_v57 = vpop.f32.mrf.mxu1 }
 0x28e   :  { %7058 = vmatmul.mubr.msk.bf16.vlgmr.msra.gmra.mxu0 %vm7056_vm14, %v7057_v48 }
 0x28f   :  { %3698 = vmatprep.mubr.bf16.mxu0 %v8900_v0  ;;  %v7551_v62 = vpop.f32.mrf.mxu1  ;;  %3673 = vmatpush1.bf16.msra.mxu0 %v8309_v27 }
 0x290   :  { %v7552_v8 = vadd.f32 %v7551_v62, %v7550_v57  ;;  %3674 = vmatprep.subr.bf16.mxu0 %v8317_v29 }
 0x291   :  { %v7553_v63 = vpop.f32.mrf.mxu1 }
 0x293   :  { %v7554_v1 = vpop.f32.mrf.mxu1  ;;  %3675 = vmatpush1.bf16.msra.mxu0 %v8315_v58 }
 0x294   :  { %v7528_v2 = vpop.f32.mrf.mxu0  ;;  %3676 = vmatprep.subr.bf16.mxu0 %v8323_v31 }
 0x296   :  { %v7529_v3 = vpop.f32.mrf.mxu0 }
 0x297   :  { %v7530_v53 = vadd.f32 %v7529_v3, %v7528_v2  ;;  %3677 = vmatpush1.bf16.msra.mxu0 %v8321_v34 }
 0x298   :  { %v7531_v4 = vpop.f32.mrf.mxu0  ;;  %3678 = vmatprep.subr.bf16.mxu0 %v8329_v37 }
 0x299   :  { %v2705_v7 = vadd.f32 %v7530_v53, %v1423_v6 }
 0x29a   :  { %v7532_v61 = vpop.f32.mrf.mxu0 }
 0x29b   :  { %v2745_v9 = vadd.f32 %v7552_v8, %v2705_v7  ;;  %3679 = vmatpush1.bf16.msra.mxu0 %v8327_v39  ;;  %v8339_v39 = vld [vmem:[%s11001_s6 + $0xb0] ss:$20 sps:$4 sm:$0xff]  }
 0x2aa   :  { %v3457_v21 = vpop.permute.xlu0 %3456 }
 0x2ac   :  { %v2784_v10 = vpop.f32.mrf.mxu0 }
 0x2ad   :  { %v2785_v11 = vadd.f32 %v2784_v10, %v2745_v9 }
 0x2ae   :  { %v7705_v12 = vpop.f32.mrf.mxu0 }
 0x2af   :  { %8777 = vtanh.f32 %v2785_v11  ;;  %v8335_v11 = vld [vmem:[%s11001_s6 + $0x4] ss:$20 sps:$4 sm:$0xff]  }
 0x2b0   :  { %v2787_v13 = vpop.f32.mrf.mxu0  ;;  %3680 = vmatprep.subr.bf16.mxu0 %v8335_v11  ;;  %v8365_v11 = vld [vmem:[#allocation2 + $0x320] ss:$20 sps:$4 sm:$0xff]  }
 0x2b1   :  { %v8333_v13 = vld [vmem:[%s11001_s6] ss:$20 sps:$4 sm:$0xff]  }
 0x2b2   :  { %v7706_v14 = vpop.f32.mrf.mxu0  ;;  %3681 = vmatpush1.bf16.msra.mxu0 %v8333_v13  ;;  %v8392_v13 = vld [vmem:[#allocation2 + $0x258] ss:$20 sps:$4 sm:$0xff]  }
 0x2b3   :  { %v8338_v14 = vld [vmem:[%s11001_s6 + $0xc] ss:$20 sps:$4 sm:$0xff]   ;;  %7707 = vmatprep.subr.bf16.mxu0 %v8902_v56 }
 0x2bc   :  { %v8778_v17 = vpop.eup %8777 }
 0x2bd   :  { %v2810_v18 = vmul.f32 1.1111112, %v8778_v17 }
 0x2bf   :  { %v2815_v19 = vsel %vm2805_vm15, %v2810_v18, 0.0  ;;  %v8336_v18 = vld [vmem:[%s11001_s6 + $0x8] ss:$20 sps:$4 sm:$0xff]  }
 0x2c0   :  { %v2822_v15 = vpack.c.bf16 %v2815_v19, %v2815_v19 }
 0x2c2   :  { %7060 = vmatmul.mubr.msk.bf16.vlgmr.msra.gmra.mxu1 %vm2404_vm6, %v2822_v15 }
 0x2c3   :  { %3739 = vmatprep.mubr.bf16.mxu1 %v8900_v0  ;;  %3714 = vmatpush1.bf16.msra.mxu1 %v8312_v46 }
 0x2c4   :  { %3715 = vmatprep.subr.bf16.mxu1 %v8320_v30 }
 0x2c7   :  { %3716 = vmatpush1.bf16.msra.mxu1 %v8318_v5 }
 0x2c8   :  { %3717 = vmatprep.subr.bf16.mxu1 %v8326_v33  ;;  %v8346_v33 = vld [vmem:[#allocation2 + $0x11c] ss:$20 sps:$4 sm:$0xff]  }
 0x2cb   :  { %3718 = vmatpush1.bf16.msra.mxu1 %v8324_v35 }
 0x2cc   :  { %3719 = vmatprep.subr.bf16.mxu1 %v8332_v38 }
 0x2cf   :  { %3720 = vmatpush1.bf16.msra.mxu1 %v8330_v41 }
 0x2d0   :  { %3721 = vmatprep.subr.bf16.mxu1 %v8338_v14  ;;  %v8400_v14 = vld [vmem:[#allocation2 + $0x234] ss:$20 sps:$4 sm:$0xff]  }
 0x2d3   :  { %3722 = vmatpush1.bf16.msra.mxu1 %v8336_v18  ;;  %v8398_v18 = vld [vmem:[#allocation2 + $0x230] ss:$20 sps:$4 sm:$0xff]  }
 0x2d4   :  { %5067 = vmatprep.subr.bf16.mxu1 %v8346_v33  ;;  %v8413_v33 = vld [vmem:[#allocation2 + $0x460] ss:$20 sps:$4 sm:$0xff]  }
 0x30c   :  { %v3327_v52 = vpop.f32.mrf.mxu1 }
 0x30d   :  { %v3328_v59 = vadd.f32 %v3327_v52, %v2902_v50  ;;  %v8341_v50 = vld [vmem:[%s11001_s6 + $0x60] ss:$20 sps:$4 sm:$0xff]  }
 0x30e   :  { %v3329_v20 = vpop.f32.mrf.mxu1 }
 0x30f   :  { %v3330_v24 = vadd.f32 %v3329_v20, %v2906_v51  ;;  %v8356_v51 = vld [vmem:[#allocation2 + $0xc8] ss:$20 sps:$4 sm:$0xff]  }
 0x310   :  { %v3331_v43 = vpop.f32.mrf.mxu1 }
 0x312   :  { %v3332_v23 = vpop.f32.mrf.mxu1 }
 0x34e   :  { %v3368_v42 = vpop.f32.mrf.mxu0 }
 0x34f   :  { %v3369_v40 = vadd.f32 %v3368_v42, %v3328_v59  ;;  %v8344_v42 = vld [vmem:[#allocation2 + $0x118] ss:$20 sps:$4 sm:$0xff]  }
 0x350   :  { %v3370_v44 = vpop.f32.mrf.mxu0  ;;  %v8364_v59 = vld [vmem:[#allocation2 + $0xa4] ss:$20 sps:$4 sm:$0xff]  }
 0x351   :  { %v3371_v48 = vadd.f32 %v3370_v44, %v3330_v24  ;;  %v8352_v44 = vld [vmem:[#allocation2 + $0xf4] ss:$20 sps:$4 sm:$0xff]   ;;  %v8342_v24 = vld [vmem:[%s11001_s6 + $0x38] ss:$20 sps:$4 sm:$0xff]  }
 0x352   :  { %v3372_v45 = vpop.f32.mrf.mxu0 }
 0x353   :  { %v8340_v45 = vld [vmem:[%s11001_s6 + $0x88] ss:$20 sps:$4 sm:$0xff]  }
 0x354   :  { %v3373_v22 = vpop.f32.mrf.mxu0 }
 0x355   :  { %v8350_v22 = vld [vmem:[#allocation2 + $0xf0] ss:$20 sps:$4 sm:$0xff]  }
 0x382   :  { %v3409_v32 = vpop.f32.mrf.mxu1 }
 0x383   :  { %v3410_v57 = vadd.f32 %v3409_v32, %v3369_v40  ;;  %v8362_v40 = vld [vmem:[#allocation2 + $0xa0] ss:$20 sps:$4 sm:$0xff]   ;;  %v8370_v32 = vld [vmem:[#allocation2 + $0x7c] ss:$20 sps:$4 sm:$0xff]  }
 0x384   :  { %v3411_v62 = vpop.f32.mrf.mxu1 }
 0x385   :  { %v3423_v63 = vmin.f32 %v3410_v57, 20.0  ;;  %v3412_v55 = vadd.f32 %v3411_v62, %v3371_v48  ;;  %vm3421_vm5 = vcmp.gt.f32.partialorder %v3410_v57, 20.0  ;;  %v8343_v48 = vld [vmem:[%s11001_s6 + $0x10] ss:$20 sps:$4 sm:$0xff]   ;;  %v8368_v62 = vld [vmem:[#allocation2 + $0x78] ss:$20 sps:$4 sm:$0xff]  }
 0x386   :  { %v3413_v1 = vpop.f32.mrf.mxu1 }
 0x387   :  { %v3425_v2 = vmul.f32 1.442695, %v3423_v63  ;;  %v3424_v3 = vmin.f32 %v3412_v55, 20.0  ;;  %vm3422_vm9 = vcmp.gt.f32.partialorder %v3412_v55, 20.0  ;;  %v8376_v63 = vld [vmem:[#allocation2 + $0x54] ss:$20 sps:$4 sm:$0xff]  }
 0x388   :  { %v3414_v4 = vpop.f32.mrf.mxu1  ;;  %v8355_v1 = vld [vmem:[#allocation2 + $0x374] ss:$20 sps:$4 sm:$0xff]  }
 0x389   :  { %8779 = vpow2.f32 %v3425_v2  ;;  %v3427_v61 = vmul.f32 1.442695, %v3424_v3  ;;  %v8374_v2 = vld [vmem:[#allocation2 + $0x50] ss:$20 sps:$4 sm:$0xff]   ;;  %v8382_v3 = vld [vmem:[#allocation2 + $0x2c] ss:$20 sps:$4 sm:$0xff]  }
 0x38a   :  { %v8353_v4 = vld [vmem:[#allocation2 + $0x370] ss:$20 sps:$4 sm:$0xff]  }
 0x38b   :  { %8781 = vpow2.f32 %v3427_v61  ;;  %v8361_v61 = vld [vmem:[#allocation2 + $0x34c] ss:$20 sps:$4 sm:$0xff]  }
 0x396   :  { %v8780_v6 = vpop.eup %8779 }
 0x397   :  { %v3429_v53 = vadd.f32 1.0, %v8780_v6  ;;  %v3432_v9 = vmul.f32 -0.5, %v8780_v6  ;;  %v3435_v17 = vand.u32 2147483647, %v8780_v6 }
 0x398   :  { %v8782_v7 = vpop.eup %8781 }
 0x399   :  { %8783 = vlog2.f32 %v3429_v53  ;;  %v3438_v8 = vadd.f32 1.0, %v8782_v7  ;;  %v3441_v10 = vmul.f32 -0.5, %v8782_v7  ;;  %v3433_v12 = vadd.f32 1.0, %v3432_v9  ;;  %v8388_v53 = vld [vmem:[#allocation2 + $0x4] ss:$20 sps:$4 sm:$0xff]  }
 0x39a   :  { %v3444_v52 = vand.u32 2147483647, %v8782_v7  ;;  %vm3436_vm1 = vcmp.lt.f32.partialorder %v3435_v17, 0.0004427343  ;;  %v8386_v9 = vld [vmem:[#allocation2] ss:$20 sps:$4 sm:$0xff]  }
 0x39b   :  { %8785 = vlog2.f32 %v3438_v8  ;;  %v3442_v19 = vadd.f32 1.0, %v3441_v10  ;;  %v3434_v43 = vmul.f32 %v8780_v6, %v3433_v12  ;;  %v8380_v6 = vld [vmem:[#allocation2 + $0x28] ss:$20 sps:$4 sm:$0xff]   ;;  %v8367_v8 = vld [vmem:[#allocation2 + $0x324] ss:$20 sps:$4 sm:$0xff]  }
 0x39c   :  { %vm3445_vm7 = vcmp.lt.f32.partialorder %v3444_v52, 0.0004427343  ;;  %v8394_v10 = vld [vmem:[#allocation2 + $0x25c] ss:$20 sps:$4 sm:$0xff]   ;;  %v8379_v17 = vld [vmem:[#allocation2 + $0x2d4] ss:$20 sps:$4 sm:$0xff]  }
 0x39d   :  { %v3443_v46 = vmul.f32 %v8782_v7, %v3442_v19  ;;  %v8359_v7 = vld [vmem:[#allocation2 + $0x348] ss:$20 sps:$4 sm:$0xff]   ;;  %v8406_v19 = vld [vmem:[#allocation2 + $0x20c] ss:$20 sps:$4 sm:$0xff]  }
 0x39e   :  { %v8373_v12 = vld [vmem:[#allocation2 + $0x2fc] ss:$20 sps:$4 sm:$0xff]   ;;  %v8385_v52 = vld [vmem:[#allocation2 + $0x2ac] ss:$20 sps:$4 sm:$0xff]  }
 0x3a6   :  { %v8784_v15 = vpop.eup %8783 }
 0x3a7   :  { %v3431_v20 = vmul.f32 0.6931472, %v8784_v15  ;;  %v8377_v15 = vld [vmem:[#allocation2 + $0x2d0] ss:$20 sps:$4 sm:$0xff]  }
 0x3a8   :  { %v8786_v23 = vpop.eup %8785 }
 0x3a9   :  { %v3437_v27 = vsel %vm3436_vm1, %v3434_v43, %v3431_v20  ;;  %v3440_v28 = vmul.f32 0.6931472, %v8786_v23  ;;  %v8404_v20 = vld [vmem:[#allocation2 + $0x208] ss:$20 sps:$4 sm:$0xff]   ;;  %v8391_v23 = vld [vmem:[#allocation2 + $0x284] ss:$20 sps:$4 sm:$0xff]  }
 0x3aa   :  { %v3447_v49 = vsel %vm3421_vm5, %v3410_v57, %v3437_v27  ;;  %v8383_v43 = vld [vmem:[#allocation2 + $0x2a8] ss:$20 sps:$4 sm:$0xff]  }
 0x3ab   :  { %v3449_v29 = vsel %vm3419_vm0, %v3410_v57, %v3447_v49  ;;  %v3446_v30 = vsel %vm3445_vm7, %v3443_v46, %v3440_v28  ;;  %v8349_v57 = vld [vmem:[#allocation2 + $0x39c] ss:$20 sps:$4 sm:$0xff]   ;;  %v8395_v28 = vld [vmem:[#allocation2 + $0x4d8] ss:$20 sps:$4 sm:$0xff]   ;;  %v8403_v46 = vld [vmem:[#allocation2 + $0x4b4] ss:$20 sps:$4 sm:$0xff]  }
 0x3ac   :  { %v3459_v58 = vmul.f32 %v3457_v21, %v3449_v29  ;;  %3451 = vst [vmem:[#allocation5] sm:$0xff] %v3449_v29  ;;  %v3448_v5 = vsel %vm3422_vm9, %v3412_v55, %v3446_v30  ;;  %v8347_v55 = vld [vmem:[#allocation2 + $0x398] ss:$20 sps:$4 sm:$0xff]   ;;  %v8397_v27 = vld [vmem:[#allocation2 + $0x4dc] ss:$20 sps:$4 sm:$0xff]  }
 0x3ad   :  { %v3460_v31 = vmul.f32 %v3457_v21, %v3448_v5  ;;  %3453 = vst.msk [vmem:[#allocation5 + $0x8] sm:$0xff] %vm3452_vm8, %v3448_v5  ;;  %v8389_v21 = vld [vmem:[#allocation2 + $0x280] ss:$20 sps:$4 sm:$0xff]   ;;  %v8401_v49 = vld [vmem:[#allocation2 + $0x4b0] ss:$20 sps:$4 sm:$0xff]  }
 0x3ae   :  { %3463 = vrot.lane.b32.xlu0 %v3459_v58, %s8905_s17  ;;  %v8407_v30 = vld [vmem:[#allocation2 + $0x488] ss:$20 sps:$4 sm:$0xff]   ;;  %v8412_v58 = vld [vmem:[#allocation2 + $0x1e4] ss:$20 sps:$4 sm:$0xff]  }
 0x3af   :  { %3465 = vrot.lane.b32.xlu1 %v3460_v31, %s8905_s17  ;;  %v8415_v5 = vld [vmem:[#allocation2 + $0x464] ss:$20 sps:$4 sm:$0xff]   ;;  %v8410_v31 = vld [vmem:[#allocation2 + $0x1e0] ss:$20 sps:$4 sm:$0xff]  }
 0x420   :  { %v3464_v34 = vpop.permute.xlu0 %3463 }
 0x421   :  { %v3466_v35 = vpop.permute.xlu1 %3465 }
 0x422   :  { %v3468_v37 = vsel %vm3467_vm10, %v3464_v34, %v3466_v35  ;;  %v8418_v34 = vld [vmem:[#allocation2 + $0x1bc] ss:$20 sps:$4 sm:$0xff]  }
 0x423   :  { %v3470_v38 = vadd.f32 %v3468_v37, %v3449_v29  ;;  %v8409_v29 = vld [vmem:[#allocation2 + $0x48c] ss:$20 sps:$4 sm:$0xff]   ;;  %v8421_v35 = vld [vmem:[#allocation2 + $0x43c] ss:$20 sps:$4 sm:$0xff]  }
 0x424   :  { %v8416_v37 = vld [vmem:[#allocation2 + $0x1b8] ss:$20 sps:$4 sm:$0xff]  }
 0x425   :  { %v3475_v41 = vpack.c.bf16 %v3470_v38, %v3470_v38  ;;  %v8419_v38 = vld [vmem:[#allocation2 + $0x438] ss:$20 sps:$4 sm:$0xff]  }
 0x427   :  { %7088 = vmatmul.mubr.msk.bf16.vlgmr.msra.gmra.mxu0 %vm3662_vm11, %v3475_v41  ;;  %7089 = vmatmul.mubr.msk.bf16.vlgmr.msra.gmra.mxu1 %vm3662_vm11, %v3475_v41 }
 0x428   :  { %7708 = vmatpush3.bf16.msra.mxu0 %v8339_v39  ;;  %7717 = vmatprep.mubr.msk.bf16.mxu0 %vm8903_vm3, %v8902_v56  ;;  %v8424_v39 = vld [vmem:[#allocation2 + $0x194] ss:$20 sps:$4 sm:$0xff]  }
 0x429   :  { %7709 = vmatprep.subr.bf16.mxu0 %v8902_v56  ;;  %5068 = vmatpush1.bf16.msra.mxu1 %v8344_v42  ;;  %v8422_v42 = vld [vmem:[#allocation2 + $0x190] ss:$20 sps:$4 sm:$0xff]  }
 0x42a   :  { %5069 = vmatprep.subr.bf16.mxu1 %v8352_v44  ;;  %v8425_v44 = vld [vmem:[#allocation2 + $0x410] ss:$20 sps:$4 sm:$0xff]  }
 0x42c   :  { %7710 = vmatpush3.bf16.msra.mxu0 %v8340_v45  ;;  %v8430_v45 = vld [vmem:[#allocation2 + $0x16c] ss:$20 sps:$4 sm:$0xff]  }
 0x42d   :  { %7711 = vmatprep.subr.bf16.mxu0 %v8902_v56  ;;  %5070 = vmatpush1.bf16.msra.mxu1 %v8350_v22  ;;  %v8433_v22 = vld [vmem:[#allocation2 + $0x3ec] ss:$20 sps:$4 sm:$0xff]  }
 0x42e   :  { %5071 = vmatprep.subr.bf16.mxu1 %v8358_v47  ;;  %v8428_v47 = vld [vmem:[#allocation2 + $0x168] ss:$20 sps:$4 sm:$0xff]  }
 0x430   :  { %7712 = vmatpush3.bf16.msra.mxu0 %v8341_v50  ;;  %v8431_v50 = vld [vmem:[#allocation2 + $0x3e8] ss:$20 sps:$4 sm:$0xff]  }
 0x431   :  { %7713 = vmatprep.subr.bf16.mxu0 %v8902_v56  ;;  %5072 = vmatpush1.bf16.msra.mxu1 %v8356_v51  ;;  %v8436_v51 = vld [vmem:[#allocation2 + $0x144] ss:$20 sps:$4 sm:$0xff]  }
 0x432   :  { %5073 = vmatprep.subr.bf16.mxu1 %v8364_v59  ;;  %v8439_v59 = vld [vmem:[#allocation2 + $0x3c4] ss:$20 sps:$4 sm:$0xff]  }
 0x434   :  { %7714 = vmatpush3.bf16.msra.mxu0 %v8342_v24  ;;  %v8434_v24 = vld [vmem:[#allocation2 + $0x140] ss:$20 sps:$4 sm:$0xff]  }
 0x435   :  { %7715 = vmatprep.subr.bf16.mxu0 %v8902_v56  ;;  %5074 = vmatpush1.bf16.msra.mxu1 %v8362_v40  ;;  %v8437_v40 = vld [vmem:[#allocation2 + $0x3c0] ss:$20 sps:$4 sm:$0xff]  }
 0x436   :  { %5075 = vmatprep.subr.bf16.mxu1 %v8370_v32  ;;  %v4045_v32 = vld [vmem:[#allocation2 + $0x5c8] sm:$0xff] }
 0x438   :  { %7716 = vmatpush3.bf16.msra.mxu0 %v8343_v48  ;;  %v7284_v48 = vcombine.high %v4045_v32, %v4045_v32 }
 0x439   :  { %5108 = vmatprep.subr.bf16.mxu0 %v8349_v57  ;;  %5076 = vmatpush1.bf16.msra.mxu1 %v8368_v62  ;;  %v8443_v57 = vld [vmem:[#allocation2 + $0x124] ss:$20 sps:$4 sm:$0xff]  }
 0x43a   :  { %5077 = vmatprep.subr.bf16.mxu1 %v8376_v63  ;;  %v7061_v62 = vld [vmem:[%s11004_s9 + $0x3] ss:$8 sm:$0xf] }
 0x43b   :  { %7718 = vmatmul.mubr.msk.bf16.vlgmr.msra.gmra.mxu0 %vm3662_vm11, %v3475_v41  ;;  %v8427_v41 = vld [vmem:[#allocation2 + $0x414] ss:$20 sps:$4 sm:$0xff]   ;;  %v7062_v63 = vld [vmem:[%s11004_s9 + $0x3] ss:$8 sm:$0x10] }
 0x43c   :  { %5109 = vmatpush1.bf16.msra.mxu0 %v8347_v55  ;;  %v3474_v55 = vor.u32 %v7062_v63, %v7061_v62  ;;  %v8462_v62 = vld [vmem:[#allocation2 + $0xac] ss:$20 sps:$4 sm:$0xff]   ;;  %v8457_v63 = vld [vmem:[#allocation2 + $0x550] ss:$20 sps:$4 sm:$0xff]  }
 0x43d   :  { %5110 = vmatprep.subr.bf16.mxu0 %v8355_v1  ;;  %5078 = vmatpush1.bf16.msra.mxu1 %v8374_v2 }
 0x43e   :  { %5079 = vmatprep.subr.bf16.mxu1 %v8382_v3  ;;  %v3510_v1 = vrot.slane %v3474_v55, %v9588_v25  ;;  %v3518_v2 = vrot.slane %v3474_v55, %v9608_v54  ;;  %v3514_v3 = vrot.slane %v3474_v55, %v9591_v26 }
 0x440   :  { %5111 = vmatpush1.bf16.msra.mxu0 %v8353_v4  ;;  %v3522_v4 = vrot.slane %v3474_v55, %v9622_v60 }
 0x441   :  { %5112 = vmatprep.subr.bf16.mxu0 %v8361_v61  ;;  %5080 = vmatpush1.bf16.msra.mxu1 %v8380_v6 }
 0x442   :  { %5081 = vmatprep.subr.bf16.mxu1 %v8388_v53 }
 0x444   :  { %5113 = vmatpush1.bf16.msra.mxu0 %v8359_v7 }
 0x445   :  { %5114 = vmatprep.subr.bf16.mxu0 %v8367_v8  ;;  %5082 = vmatpush1.bf16.msra.mxu1 %v8386_v9 }
 0x446   :  { %5083 = vmatprep.subr.bf16.mxu1 %v8394_v10 }
 0x448   :  { %5115 = vmatpush1.bf16.msra.mxu0 %v8365_v11 }
 0x449   :  { %5116 = vmatprep.subr.bf16.mxu0 %v8373_v12  ;;  %5084 = vmatpush2.bf16.msra.mxu1 %v8392_v13 }
 0x44a   :  { %5085 = vmatprep.subr.bf16.mxu1 %v8400_v14 }
 0x44c   :  { %5117 = vmatpush1.bf16.msra.mxu0 %v8371_v16 }
 0x44d   :  { %5118 = vmatprep.subr.bf16.mxu0 %v8379_v17  ;;  %5086 = vmatpush2.bf16.msra.mxu1 %v8398_v18  ;;  %v7092_v17 = vld [vmem:[%s10997_s2 + $0x58] sm:$0xff]  ;;  %v7094_v18 = vld [vmem:[%s10997_s2 + $0x68] sm:$0xff] }
 0x44e   :  { %5087 = vmatprep.subr.bf16.mxu1 %v8406_v19  ;;  %v7091_v19 = vld [vmem:[%s10997_s2 + $0x50] sm:$0xff]  ;;  %vm3800_vm12 = vcmp.lt.f32.partialorder %v7092_v17, 0.9  ;;  %vm3802_vm13 = vcmp.lt.f32.partialorder %v7094_v18, 0.9 }
 0x44f   :  { %vm3799_vm14 = vcmp.lt.f32.partialorder %v7091_v19, 0.9  ;;  %vm10463_vm15 = vmpackc.low %vm3800_vm12, %vm3800_vm12  ;;  %v8475_v17 = vld [vmem:[#allocation2 + $0x30] ss:$20 sps:$4 sm:$0xff]   ;;  %v8483_v19 = vld [vmem:[#allocation2 + $0xc] ss:$20 sps:$4 sm:$0xff]  }
 0x450   :  { %5119 = vmatpush1.bf16.msra.mxu0 %v8377_v15  ;;  %vm10467_vm1 = vmpackc.low %vm3802_vm13, %vm3802_vm13  ;;  %v8486_v18 = vld [vmem:[#allocation2 + $0x37c] ss:$20 sps:$4 sm:$0xff]  }
 0x451   :  { %5120 = vmatprep.subr.bf16.mxu0 %v8385_v52  ;;  %5088 = vmatpush2.bf16.msra.mxu1 %v8404_v20  ;;  %v7093_v52 = vld [vmem:[%s10997_s2 + $0x60] sm:$0xff]  ;;  %vm10473_vm5 = vmpackc.low %vm3799_vm14, %vm3799_vm14 }
 0x452   :  { %5089 = vmatprep.subr.bf16.mxu1 %v8412_v58  ;;  %vm3801_vm0 = vcmp.lt.f32.partialorder %v7093_v52, 0.9  ;;  %v8481_v52 = vld [vmem:[#allocation2 + $0x8] ss:$20 sps:$4 sm:$0xff]  }
 0x453   :  { %vm10481_vm7 = vmpackc.low %vm3801_vm0, %vm3801_vm0 }
 0x454   :  { %5121 = vmatpush1.bf16.msra.mxu0 %v8383_v43  ;;  %v3526_v43 = vrot.slane %v3474_v55, %v9673_v36  ;;  %v8460_v55 = vld [vmem:[#allocation2 + $0xa8] ss:$20 sps:$4 sm:$0xff]  }
 0x455   :  { %5122 = vmatprep.subr.bf16.mxu0 %v8391_v23  ;;  %5090 = vmatpush2.bf16.msra.mxu1 %v8410_v31 }
 0x456   :  { %5091 = vmatprep.subr.bf16.mxu1 %v8418_v34  ;;  %v8611_v34 = vld [vmem:[%s11003_s8 + $0x90] ss:$12 sps:$4 sm:$0xff]  }
 0x458   :  { %5123 = vmatpush1.bf16.msra.mxu0 %v8389_v21 }
 0x459   :  { %5124 = vmatprep.subr.bf16.mxu0 %v8397_v27  ;;  %5092 = vmatpush2.bf16.msra.mxu1 %v8416_v37  ;;  %v7283_v27 = vcombine.low %v4045_v32, %v4045_v32  ;;  %v8451_v32 = vld [vmem:[#allocation2 + $0x578] ss:$20 sps:$4 sm:$0xff]  }
 0x45a   :  { %5093 = vmatprep.subr.bf16.mxu1 %v8424_v39  ;;  %v8441_v39 = vld [vmem:[#allocation2 + $0x120] ss:$20 sps:$4 sm:$0xff]  }
 0x45c   :  { %5125 = vmatpush2.bf16.msra.mxu0 %v8395_v28 }
 0x45d   :  { %5126 = vmatprep.subr.bf16.mxu0 %v8403_v46  ;;  %5094 = vmatpush2.bf16.msra.mxu1 %v8422_v42  ;;  %v5053_v42 = vsel %vm2408_vm4, %v7283_v27, 0  ;;  %v8498_v27 = vld [vmem:[#allocation2 + $0x32c] ss:$20 sps:$4 sm:$0xff]  }
 0x45e   :  { %5095 = vmatprep.subr.bf16.mxu1 %v8430_v45  ;;  %v8447_v45 = vld [vmem:[#allocation2 + $0x5a4] ss:$20 sps:$4 sm:$0xff]  }
 0x460   :  { %5127 = vmatpush2.bf16.msra.mxu0 %v8401_v49 }
 0x461   :  { %5128 = vmatprep.subr.bf16.mxu0 %v8409_v29  ;;  %5096 = vmatpush2.bf16.msra.mxu1 %v8428_v47  ;;  %v8584_v29 = vld [vmem:[#allocation2 + $0xb0] ss:$20 sps:$4 sm:$0xff]  }
 0x462   :  { %5097 = vmatprep.subr.bf16.mxu1 %v8436_v51 }
 0x464   :  { %5129 = vmatpush2.bf16.msra.mxu0 %v8407_v30 }
 0x465   :  { %5130 = vmatprep.subr.bf16.mxu0 %v8415_v5  ;;  %5098 = vmatpush2.bf16.msra.mxu1 %v8434_v24  ;;  %v8453_v24 = vld [vmem:[#allocation2 + $0x57c] ss:$20 sps:$4 sm:$0xff]  }
 0x466   :  { %7300 = vmatprep.subr.msk.bf16.mxu1 %vm2408_vm4, %v7284_v48  ;;  %v8454_v48 = vld [vmem:[#allocation2 + $0xd0] ss:$20 sps:$4 sm:$0xff]   ;;  %v8587_v5 = vld [vmem:[#allocation2 + $0x448] ss:$20 sps:$4 sm:$0xff]  }
 0x468   :  { %5131 = vmatpush2.bf16.msra.mxu0 %v8413_v33 }
 0x469   :  { %5132 = vmatprep.subr.bf16.mxu0 %v8421_v35 }
 0x46c   :  { %5133 = vmatpush2.bf16.msra.mxu0 %v8419_v38 }
 0x46d   :  { %5134 = vmatprep.subr.bf16.mxu0 %v8427_v41  ;;  %v8604_v41 = vld [vmem:[#allocation2 + $0x588] ss:$20 sps:$4 sm:$0xff]  }
 0x470   :  { %5135 = vmatpush2.bf16.msra.mxu0 %v8425_v44 }
 0x471   :  { %5136 = vmatprep.subr.bf16.mxu0 %v8433_v22  ;;  %v8450_v22 = vld [vmem:[#allocation2 + $0xfc] ss:$20 sps:$4 sm:$0xff]  }
 0x474   :  { %5137 = vmatpush2.bf16.msra.mxu0 %v8431_v50  ;;  %v8445_v50 = vld [vmem:[#allocation2 + $0x5a0] ss:$20 sps:$4 sm:$0xff]  }
 0x475   :  { %5138 = vmatprep.subr.bf16.mxu0 %v8439_v59  ;;  %v8448_v59 = vld [vmem:[#allocation2 + $0xf8] ss:$20 sps:$4 sm:$0xff]  }
 0x478   :  { %5139 = vmatpush2.bf16.msra.mxu0 %v8437_v40  ;;  %v8456_v40 = vld [vmem:[#allocation2 + $0xd4] ss:$20 sps:$4 sm:$0xff]  }
 0x479   :  { %5190 = vmatprep.subr.bf16.mxu0 %v8443_v57  ;;  %v8459_v57 = vld [vmem:[#allocation2 + $0x554] ss:$20 sps:$4 sm:$0xff]  }
 0x4e7   :  { %v3700_v61 = vpop.f32.mrf.mxu0  ;;  %v3741_v6 = vpop.f32.mrf.mxu1 }
 0x4e8   :  { %v3701_v53 = vadd.f32 %v3700_v61, %v3510_v1  ;;  %v3742_v7 = vadd.f32 %v3741_v6, %v3518_v2  ;;  %v8465_v1 = vld [vmem:[#allocation2 + $0x52c] ss:$20 sps:$4 sm:$0xff]   ;;  %v8468_v2 = vld [vmem:[#allocation2 + $0x84] ss:$20 sps:$4 sm:$0xff]   ;;  %v8463_v61 = vld [vmem:[#allocation2 + $0x528] ss:$20 sps:$4 sm:$0xff]  }
 0x4e9   :  { %v3702_v8 = vpop.f32.mrf.mxu0  ;;  %v3743_v9 = vpop.f32.mrf.mxu1  ;;  %v8466_v6 = vld [vmem:[#allocation2 + $0x80] ss:$20 sps:$4 sm:$0xff]  }
 0x4ea   :  { %8787 = vtanh.f32 %v3701_v53  ;;  %v3703_v10 = vadd.f32 %v3702_v8, %v3514_v3  ;;  %v3744_v11 = vadd.f32 %v3743_v9, %v3522_v4  ;;  %v7095_v4 = vld [vmem:[%s10997_s2 + $0x70] sm:$0xff]  ;;  %v8471_v53 = vld [vmem:[#allocation2 + $0x504] ss:$20 sps:$4 sm:$0xff]  }
 0x4eb   :  { %8789 = vtanh.f32 %v3742_v7  ;;  %v3704_v12 = vpop.f32.mrf.mxu0  ;;  %v3745_v13 = vpop.f32.mrf.mxu1  ;;  %v8474_v8 = vld [vmem:[#allocation2 + $0x5c] ss:$20 sps:$4 sm:$0xff]   ;;  %vm3803_vm8 = vcmp.lt.f32.partialorder %v7095_v4, 0.9  ;;  %v8469_v9 = vld [vmem:[#allocation2 + $0x500] ss:$20 sps:$4 sm:$0xff]  }
 0x4ec   :  { %8791 = vtanh.f32 %v3703_v10  ;;  %v8472_v10 = vld [vmem:[#allocation2 + $0x58] ss:$20 sps:$4 sm:$0xff]   ;;  %v8477_v13 = vld [vmem:[#allocation2 + $0x34] ss:$20 sps:$4 sm:$0xff]  }
 0x4ed   :  { %8793 = vtanh.f32 %v3744_v11  ;;  %v3705_v14 = vpop.f32.mrf.mxu0  ;;  %v3746_v16 = vpop.f32.mrf.mxu1  ;;  %v8480_v11 = vld [vmem:[#allocation2 + $0x3a4] ss:$20 sps:$4 sm:$0xff]  }
 0x4ee   :  { %v8478_v14 = vld [vmem:[#allocation2 + $0x3a0] ss:$20 sps:$4 sm:$0xff]   ;;  %v8532_v4 = vld [vmem:[#allocation2 + $0x4b8] ss:$20 sps:$4 sm:$0xff]  }
 0x4f7   :  { %v8788_v15 = vpop.eup %8787 }
 0x4f8   :  { %v8790_v20 = vpop.eup %8789  ;;  %v3804_v21 = vmul.f32 1.1111112, %v8788_v15  ;;  %v8484_v15 = vld [vmem:[#allocation2 + $0x378] ss:$20 sps:$4 sm:$0xff]  }
 0x4f9   :  { %v8792_v23 = vpop.eup %8791  ;;  %v3806_v46 = vmul.f32 1.1111112, %v8790_v20  ;;  %v8492_v20 = vld [vmem:[#allocation2 + $0x354] ss:$20 sps:$4 sm:$0xff]  }
 0x4fa   :  { %v8794_v28 = vpop.eup %8793  ;;  %v3805_v49 = vmul.f32 1.1111112, %v8792_v23  ;;  %v10477_v35 = vpack.c.bf16 %v3804_v21, %v3804_v21  ;;  %v8490_v23 = vld [vmem:[#allocation2 + $0x350] ss:$20 sps:$4 sm:$0xff]   ;;  %v8487_v21 = vld [vmem:[#allocation2 + $0x260] ss:$20 sps:$4 sm:$0xff]  }
 0x4fb   :  { %v3807_v30 = vmul.f32 1.1111112, %v8794_v28  ;;  %v3782_v58 = vpop.f32.mrf.mxu0  ;;  %v10486_v44 = vpack.c.bf16 %v3806_v46, %v3806_v46  ;;  %v8495_v28 = vld [vmem:[#allocation2 + $0x23c] ss:$20 sps:$4 sm:$0xff]  }
 0x4fc   :  { %v10471_v31 = vpack.c.bf16 %v3805_v49, %v3805_v49  ;;  %v3783_v33 = vadd.f32 %v3782_v58, %v3526_v43  ;;  %v8489_v43 = vld [vmem:[#allocation2 + $0x264] ss:$20 sps:$4 sm:$0xff]   ;;  %v8496_v46 = vld [vmem:[#allocation2 + $0x328] ss:$20 sps:$4 sm:$0xff]  }
 0x4fd   :  { %v10479_v37 = vpack.c.bf16 %v3807_v30, %v3807_v30  ;;  %v7719_v38 = vpop.f32.mrf.mxu0  ;;  %v8493_v49 = vld [vmem:[#allocation2 + $0x238] ss:$20 sps:$4 sm:$0xff]   ;;  %v8501_v58 = vld [vmem:[#allocation2 + $0x214] ss:$20 sps:$4 sm:$0xff]  }
 0x4fe   :  { %8795 = vtanh.f32 %v3783_v33  ;;  %7290 = vmatprep.mubr.msk.bf16.mxu1 %vm10463_vm15, %v10471_v31  ;;  %v8504_v30 = vld [vmem:[#allocation2 + $0x304] ss:$20 sps:$4 sm:$0xff]   ;;  %v8502_v33 = vld [vmem:[#allocation2 + $0x300] ss:$20 sps:$4 sm:$0xff]  }
 0x4ff   :  { %v3785_v47 = vpop.f32.mrf.mxu0  ;;  %7296 = vmatprep.mubr.msk.bf16.mxu0 %vm10467_vm1, %v10479_v37  ;;  %7293 = vmatmul.mubr.msk.bf16.vlgmr.msra.gmra.mxu1 %vm10473_vm5, %v10477_v35  ;;  %v8499_v38 = vld [vmem:[#allocation2 + $0x210] ss:$20 sps:$4 sm:$0xff]  }
 0x500   :  { %7299 = vmatmul.mubr.msk.bf16.vlgmr.msra.gmra.mxu0 %vm10481_vm7, %v10486_v44  ;;  %5154 = vmatpush1.bf16.msra.mxu1 %v5053_v42  ;;  %v8507_v42 = vld [vmem:[#allocation2 + $0x1ec] ss:$20 sps:$4 sm:$0xff]   ;;  %v8516_v47 = vld [vmem:[#allocation2 + $0x2b4] ss:$20 sps:$4 sm:$0xff]  }
 0x501   :  { %5191 = vmatpush1.bf16.msra.mxu0 %v8441_v39  ;;  %v7720_v51 = vpop.f32.mrf.mxu0  ;;  %7304 = vmatprep.mubr.msk.bf16.mxu0 %vm10463_vm15, %v10471_v31  ;;  %v8510_v39 = vld [vmem:[#allocation2 + $0x2dc] ss:$20 sps:$4 sm:$0xff]  }
 0x502   :  { %5155 = vmatprep.subr.bf16.mxu1 %v8447_v45  ;;  %5192 = vmatprep.subr.bf16.mxu0 %v8450_v22  ;;  %v8508_v45 = vld [vmem:[#allocation2 + $0x2d8] ss:$20 sps:$4 sm:$0xff]   ;;  %v8505_v22 = vld [vmem:[#allocation2 + $0x1e8] ss:$20 sps:$4 sm:$0xff]   ;;  %v8514_v51 = vld [vmem:[#allocation2 + $0x2b0] ss:$20 sps:$4 sm:$0xff]  }
 0x503   :  { %5181 = vmatprep.mubr.bf16.mxu1 %v8900_v0 }
 0x504   :  { %5156 = vmatpush1.bf16.msra.mxu1 %v8445_v50  ;;  %v8513_v50 = vld [vmem:[#allocation2 + $0x1c4] ss:$20 sps:$4 sm:$0xff]  }
 0x505   :  { %5193 = vmatpush1.bf16.msra.mxu0 %v8448_v59  ;;  %5157 = vmatprep.subr.bf16.mxu1 %v8453_v24  ;;  %v8511_v59 = vld [vmem:[#allocation2 + $0x1c0] ss:$20 sps:$4 sm:$0xff]  }
 0x506   :  { %5194 = vmatprep.subr.bf16.mxu0 %v8456_v40  ;;  %v8522_v24 = vld [vmem:[#allocation2 + $0x28c] ss:$20 sps:$4 sm:$0xff]   ;;  %v8519_v40 = vld [vmem:[#allocation2 + $0x19c] ss:$20 sps:$4 sm:$0xff]  }
 0x508   :  { %5158 = vmatpush1.bf16.msra.mxu1 %v8451_v32  ;;  %v8520_v32 = vld [vmem:[#allocation2 + $0x288] ss:$20 sps:$4 sm:$0xff]  }
 0x509   :  { %5195 = vmatpush1.bf16.msra.mxu0 %v8454_v48  ;;  %5159 = vmatprep.subr.bf16.mxu1 %v8459_v57  ;;  %v8517_v48 = vld [vmem:[#allocation2 + $0x198] ss:$20 sps:$4 sm:$0xff]  }
 0x50a   :  { %5196 = vmatprep.subr.bf16.mxu0 %v8462_v62  ;;  %v8528_v57 = vld [vmem:[#allocation2 + $0x4e4] ss:$20 sps:$4 sm:$0xff]   ;;  %v8525_v62 = vld [vmem:[#allocation2 + $0x174] ss:$20 sps:$4 sm:$0xff]  }
 0x50b   :  { %v8796_v3 = vpop.eup %8795 }
 0x50c   :  { %5160 = vmatpush1.bf16.msra.mxu1 %v8457_v63  ;;  %v3808_v7 = vmul.f32 1.1111112, %v8796_v3  ;;  %v8526_v63 = vld [vmem:[#allocation2 + $0x4e0] ss:$20 sps:$4 sm:$0xff]  }
 0x50d   :  { %5197 = vmatpush1.bf16.msra.mxu0 %v8460_v55  ;;  %5161 = vmatprep.subr.bf16.mxu1 %v8465_v1  ;;  %v8523_v55 = vld [vmem:[#allocation2 + $0x170] ss:$20 sps:$4 sm:$0xff]  }
 0x50e   :  { %5198 = vmatprep.subr.bf16.mxu0 %v8468_v2  ;;  %v3813_v12 = vsel %vm3803_vm8, %v3808_v7, 0.0  ;;  %v8534_v1 = vld [vmem:[#allocation2 + $0x4bc] ss:$20 sps:$4 sm:$0xff]   ;;  %v8531_v2 = vld [vmem:[#allocation2 + $0x14c] ss:$20 sps:$4 sm:$0xff]  }
 0x50f   :  { %v10507_v16 = vpack.c.bf16 %v3813_v12, %v3813_v12  ;;  %v4046_v3 = vld [vmem:[#allocation2 + $0x5d0] sm:$0xff]  ;;  %v8540_v12 = vld [vmem:[#allocation2 + $0x468] ss:$20 sps:$4 sm:$0xff]  }
 0x510   :  { %5162 = vmatpush1.bf16.msra.mxu1 %v8463_v61  ;;  %v8529_v61 = vld [vmem:[#allocation2 + $0x148] ss:$20 sps:$4 sm:$0xff]   ;;  %v7285_v7 = vcombine.low %v4046_v3, %v4046_v3 }
 0x511   :  { %5199 = vmatpush1.bf16.msra.mxu0 %v8466_v6  ;;  %5163 = vmatprep.subr.bf16.mxu1 %v8471_v53  ;;  %v8537_v6 = vld [vmem:[#allocation2 + $0x494] ss:$20 sps:$4 sm:$0xff]   ;;  %v7286_v53 = vcombine.high %v4046_v3, %v4046_v3  ;;  %v8594_v3 = vld [vmem:[#allocation2 + $0x178] ss:$20 sps:$4 sm:$0xff]  }
 0x512   :  { %5200 = vmatprep.subr.bf16.mxu0 %v8474_v8  ;;  %v8535_v8 = vld [vmem:[#allocation2 + $0x490] ss:$20 sps:$4 sm:$0xff]  }
 0x514   :  { %5164 = vmatpush1.bf16.msra.mxu1 %v8469_v9  ;;  %v8542_v9 = vld [vmem:[#allocation2 + $0x46c] ss:$20 sps:$4 sm:$0xff]  }
 0x515   :  { %5201 = vmatpush1.bf16.msra.mxu0 %v8472_v10  ;;  %5231 = vmatprep.subr.bf16.mxu1 %v8480_v11  ;;  %v5059_v10 = vsel %vm2408_vm4, %v7285_v7, 0  ;;  %v8545_v11 = vld [vmem:[#allocation2 + $0x5ac] ss:$20 sps:$4 sm:$0xff]   ;;  %v8599_v7 = vld [vmem:[#allocation2 + $0x3d0] ss:$20 sps:$4 sm:$0xff]  }
 0x516   :  { %5202 = vmatprep.subr.bf16.mxu0 %v8477_v13  ;;  %v8543_v13 = vld [vmem:[#allocation2 + $0x5a8] ss:$20 sps:$4 sm:$0xff]  }
 0x517   :  { %7301 = vmatmul.mubr.msk.bf16.vlgmr.msra.gmra.mxu1 %vm2404_vm6, %v10507_v16 }
 0x518   :  { %5232 = vmatpush1.bf16.msra.mxu1 %v8478_v14  ;;  %7310 = vmatprep.mubr.msk.bf16.mxu1 %vm10467_vm1, %v10479_v37  ;;  %v8548_v14 = vld [vmem:[#allocation2 + $0x444] ss:$20 sps:$4 sm:$0xff]  }
 0x519   :  { %5203 = vmatpush1.bf16.msra.mxu0 %v8475_v17  ;;  %5233 = vmatprep.subr.bf16.mxu1 %v8486_v18  ;;  %v8551_v17 = vld [vmem:[#allocation2 + $0x584] ss:$20 sps:$4 sm:$0xff]   ;;  %v8546_v18 = vld [vmem:[#allocation2 + $0x440] ss:$20 sps:$4 sm:$0xff]  }
 0x51a   :  { %5204 = vmatprep.subr.bf16.mxu0 %v8483_v19  ;;  %v8549_v19 = vld [vmem:[#allocation2 + $0x580] ss:$20 sps:$4 sm:$0xff]  }
 0x51c   :  { %5234 = vmatpush1.bf16.msra.mxu1 %v8484_v15  ;;  %v8554_v15 = vld [vmem:[#allocation2 + $0x41c] ss:$20 sps:$4 sm:$0xff]  }
 0x51d   :  { %5205 = vmatpush1.bf16.msra.mxu0 %v8481_v52  ;;  %5235 = vmatprep.subr.bf16.mxu1 %v8492_v20  ;;  %v8557_v52 = vld [vmem:[#allocation2 + $0x55c] ss:$20 sps:$4 sm:$0xff]   ;;  %v8552_v20 = vld [vmem:[#allocation2 + $0x418] ss:$20 sps:$4 sm:$0xff]  }
 0x51e   :  { %5206 = vmatprep.subr.bf16.mxu0 %v8489_v43  ;;  %v8555_v43 = vld [vmem:[#allocation2 + $0x558] ss:$20 sps:$4 sm:$0xff]  }
 0x520   :  { %5236 = vmatpush1.bf16.msra.mxu1 %v8490_v23  ;;  %v8560_v23 = vld [vmem:[#allocation2 + $0x3f4] ss:$20 sps:$4 sm:$0xff]  }
 0x521   :  { %5207 = vmatpush2.bf16.msra.mxu0 %v8487_v21  ;;  %5237 = vmatprep.subr.bf16.mxu1 %v8498_v27  ;;  %v8563_v21 = vld [vmem:[#allocation2 + $0x534] ss:$20 sps:$4 sm:$0xff]   ;;  %v8558_v27 = vld [vmem:[#allocation2 + $0x3f0] ss:$20 sps:$4 sm:$0xff]  }
 0x522   :  { %5208 = vmatprep.subr.bf16.mxu0 %v8495_v28  ;;  %v8561_v28 = vld [vmem:[#allocation2 + $0x530] ss:$20 sps:$4 sm:$0xff]  }
 0x524   :  { %5238 = vmatpush1.bf16.msra.mxu1 %v8496_v46  ;;  %v8566_v46 = vld [vmem:[#allocation2 + $0x3cc] ss:$20 sps:$4 sm:$0xff]  }
 0x525   :  { %5209 = vmatpush2.bf16.msra.mxu0 %v8493_v49  ;;  %5239 = vmatprep.subr.bf16.mxu1 %v8504_v30  ;;  %v8569_v49 = vld [vmem:[#allocation2 + $0x50c] ss:$20 sps:$4 sm:$0xff]   ;;  %v8564_v30 = vld [vmem:[#allocation2 + $0x3c8] ss:$20 sps:$4 sm:$0xff]  }
 0x526   :  { %5210 = vmatprep.subr.bf16.mxu0 %v8501_v58  ;;  %v8567_v58 = vld [vmem:[#allocation2 + $0x508] ss:$20 sps:$4 sm:$0xff]  }
 0x528   :  { %5240 = vmatpush1.bf16.msra.mxu1 %v8502_v33  ;;  %v8570_v33 = vld [vmem:[#allocation2 + $0x268] ss:$20 sps:$4 sm:$0xff]  }
 0x529   :  { %5211 = vmatpush2.bf16.msra.mxu0 %v8499_v38  ;;  %5241 = vmatprep.subr.bf16.mxu1 %v8510_v39  ;;  %v8571_v38 = vld [vmem:[#allocation2 + $0x4e8] ss:$20 sps:$4 sm:$0xff]  }
 0x52a   :  { %5212 = vmatprep.subr.bf16.mxu0 %v8507_v42  ;;  %v8572_v39 = vld [vmem:[#allocation2 + $0x128] ss:$20 sps:$4 sm:$0xff]  }
 0x52b   :  { %v8573_v42 = vld [vmem:[#allocation2 + $0x3a8] ss:$20 sps:$4 sm:$0xff]  }
 0x52c   :  { %5242 = vmatpush1.bf16.msra.mxu1 %v8508_v45  ;;  %v8574_v45 = vld [vmem:[#allocation2 + $0x240] ss:$20 sps:$4 sm:$0xff]  }
 0x52d   :  { %5213 = vmatpush2.bf16.msra.mxu0 %v8505_v22  ;;  %5243 = vmatprep.subr.bf16.mxu1 %v8516_v47  ;;  %v8575_v22 = vld [vmem:[#allocation2 + $0x4c0] ss:$20 sps:$4 sm:$0xff]  }
 0x52e   :  { %5214 = vmatprep.subr.bf16.mxu0 %v8513_v50  ;;  %v8576_v47 = vld [vmem:[#allocation2 + $0x100] ss:$20 sps:$4 sm:$0xff]  }
 0x52f   :  { %v8577_v50 = vld [vmem:[#allocation2 + $0x380] ss:$20 sps:$4 sm:$0xff]  }
 0x530   :  { %5244 = vmatpush1.bf16.msra.mxu1 %v8514_v51  ;;  %v8578_v51 = vld [vmem:[#allocation2 + $0x218] ss:$20 sps:$4 sm:$0xff]  }
 0x531   :  { %5215 = vmatpush2.bf16.msra.mxu0 %v8511_v59  ;;  %5245 = vmatprep.subr.bf16.mxu1 %v8522_v24  ;;  %v8579_v59 = vld [vmem:[#allocation2 + $0x498] ss:$20 sps:$4 sm:$0xff]  }
 0x532   :  { %5216 = vmatprep.subr.bf16.mxu0 %v8519_v40  ;;  %v8580_v24 = vld [vmem:[#allocation2 + $0xd8] ss:$20 sps:$4 sm:$0xff]  }
 0x533   :  { %v8581_v40 = vld [vmem:[#allocation2 + $0x358] ss:$20 sps:$4 sm:$0xff]  }
 0x534   :  { %5246 = vmatpush1.bf16.msra.mxu1 %v8520_v32  ;;  %v8582_v32 = vld [vmem:[#allocation2 + $0x1f0] ss:$20 sps:$4 sm:$0xff]  }
 0x535   :  { %5217 = vmatpush2.bf16.msra.mxu0 %v8517_v48  ;;  %5247 = vmatprep.subr.bf16.mxu1 %v8528_v57  ;;  %v8583_v48 = vld [vmem:[#allocation2 + $0x470] ss:$20 sps:$4 sm:$0xff]   ;;  %v8586_v57 = vld [vmem:[#allocation2 + $0x1c8] ss:$20 sps:$4 sm:$0xff]  }
 0x536   :  { %5218 = vmatprep.subr.bf16.mxu0 %v8525_v62  ;;  %v8589_v62 = vld [vmem:[#allocation2 + $0x308] ss:$20 sps:$4 sm:$0xff]  }
 0x538   :  { %5248 = vmatpush2.bf16.msra.mxu1 %v8526_v63  ;;  %v8590_v63 = vld [vmem:[#allocation2 + $0x1a0] ss:$20 sps:$4 sm:$0xff]  }
 0x539   :  { %5219 = vmatpush2.bf16.msra.mxu0 %v8523_v55  ;;  %5249 = vmatprep.subr.bf16.mxu1 %v8534_v1  ;;  %v8591_v55 = vld [vmem:[#allocation2 + $0x420] ss:$20 sps:$4 sm:$0xff]  }
 0x53a   :  { %5220 = vmatprep.subr.bf16.mxu0 %v8531_v2  ;;  %v8592_v1 = vld [vmem:[#allocation2 + $0x60] ss:$20 sps:$4 sm:$0xff]  }
 0x53b   :  { %v8593_v2 = vld [vmem:[#allocation2 + $0x2e0] ss:$20 sps:$4 sm:$0xff]  }
 0x53c   :  { %5250 = vmatpush2.bf16.msra.mxu1 %v8532_v4  ;;  %v8595_v4 = vld [vmem:[#allocation2 + $0x3f8] ss:$20 sps:$4 sm:$0xff]  }
 0x53d   :  { %5221 = vmatpush2.bf16.msra.mxu0 %v8529_v61  ;;  %5251 = vmatprep.subr.bf16.mxu1 %v8537_v6  ;;  %v8596_v61 = vld [vmem:[#allocation2 + $0x38] ss:$20 sps:$4 sm:$0xff]  }
 0x53e   :  { %7314 = vmatprep.subr.msk.bf16.mxu0 %vm2408_vm4, %v7286_v53  ;;  %v8597_v6 = vld [vmem:[#allocation2 + $0x2b8] ss:$20 sps:$4 sm:$0xff]   ;;  %v8598_v53 = vld [vmem:[#allocation2 + $0x150] ss:$20 sps:$4 sm:$0xff]  }
 0x540   :  { %7307 = vmatmul.mubr.msk.bf16.vlgmr.msra.gmra.mxu0 %vm10473_vm5, %v10477_v35  ;;  %5252 = vmatpush2.bf16.msra.mxu1 %v8535_v8  ;;  %v8600_v8 = vld [vmem:[#allocation2 + $0x10] ss:$20 sps:$4 sm:$0xff]  }
 0x541   :  { %5277 = vmatpush1.bf16.msra.mxu0 %v5059_v10  ;;  %5253 = vmatprep.subr.bf16.mxu1 %v8542_v9  ;;  %v8601_v9 = vld [vmem:[#allocation2 + $0x290] ss:$20 sps:$4 sm:$0xff]   ;;  %v8602_v10 = vld [vmem:[#allocation2 + $0x5d8] ss:$0 sps:$4 sm:$0xff]  }
 0x542   :  { %5278 = vmatprep.subr.bf16.mxu0 %v8545_v11  ;;  %5304 = vmatprep.mubr.bf16.mxu0 %v8900_v0  ;;  %v8610_v11 = vld [vmem:[%s11003_s8 + $0xac] ss:$12 sps:$4 sm:$0xff]  }
 0x544   :  { %5254 = vmatpush2.bf16.msra.mxu1 %v8540_v12  ;;  %v5065_v12 = vsel %vm2408_vm4, %v8602_v10, 0  ;;  %v8683_v10 = vld [vmem:[%s11003_s8 + $0x2d0] ss:$12 sps:$4 sm:$0xff]  }
 0x545   :  { %5279 = vmatpush1.bf16.msra.mxu0 %v8543_v13  ;;  %5255 = vmatprep.subr.bf16.mxu1 %v8548_v14  ;;  %v8608_v13 = vld [vmem:[%s11003_s8 + $0xa8] ss:$12 sps:$4 sm:$0xff]  }
 0x546   :  { %5280 = vmatprep.subr.bf16.mxu0 %v8551_v17  ;;  %v8613_v14 = vld [vmem:[%s11003_s8 + $0x94] ss:$12 sps:$4 sm:$0xff]   ;;  %v8603_v17 = vld [vmem:[#allocation2 + $0x5b0] ss:$20 sps:$4 sm:$0xff]  }
 0x548   :  { %5256 = vmatpush2.bf16.msra.mxu1 %v8546_v18  ;;  %v8619_v18 = vld [vmem:[%s11003_s8 + $0x64] ss:$12 sps:$4 sm:$0xff]  }
 0x549   :  { %5281 = vmatpush1.bf16.msra.mxu0 %v8549_v19  ;;  %5257 = vmatprep.subr.bf16.mxu1 %v8554_v15  ;;  %v8605_v19 = vld [vmem:[#allocation2 + $0x560] ss:$20 sps:$4 sm:$0xff]  }
 0x54a   :  { %5282 = vmatprep.subr.bf16.mxu0 %v8557_v52  ;;  %v8617_v15 = vld [vmem:[%s11003_s8 + $0x60] ss:$12 sps:$4 sm:$0xff]  }
 0x54b   :  { %v8622_v52 = vld [vmem:[%s11003_s8 + $0x4c] ss:$12 sps:$4 sm:$0xff]  }
 0x54c   :  { %5258 = vmatpush2.bf16.msra.mxu1 %v8552_v20  ;;  %v8606_v20 = vld [vmem:[#allocation2 + $0x538] ss:$20 sps:$4 sm:$0xff]  }
 0x54d   :  { %5283 = vmatpush1.bf16.msra.mxu0 %v8555_v43  ;;  %5259 = vmatprep.subr.bf16.mxu1 %v8560_v23  ;;  %v8620_v43 = vld [vmem:[%s11003_s8 + $0x48] ss:$12 sps:$4 sm:$0xff]  }
 0x54e   :  { %5284 = vmatprep.subr.bf16.mxu0 %v8563_v21  ;;  %v8625_v23 = vld [vmem:[%s11003_s8 + $0x34] ss:$12 sps:$4 sm:$0xff]   ;;  %v8607_v21 = vld [vmem:[#allocation2 + $0x510] ss:$20 sps:$4 sm:$0xff]  }
 0x550   :  { %5260 = vmatpush2.bf16.msra.mxu1 %v8558_v27  ;;  %v8658_v27 = vld [vmem:[%s11003_s8 + $0x22c] ss:$12 sps:$4 sm:$0xff]  }
 0x551   :  { %5285 = vmatpush1.bf16.msra.mxu0 %v8561_v28  ;;  %5261 = vmatprep.subr.bf16.mxu1 %v8566_v46  ;;  %v8623_v28 = vld [vmem:[%s11003_s8 + $0x30] ss:$12 sps:$4 sm:$0xff]  }
 0x552   :  { %5286 = vmatprep.subr.bf16.mxu0 %v8569_v49  ;;  %v8628_v46 = vld [vmem:[%s11003_s8 + $0x1c] ss:$12 sps:$4 sm:$0xff]  }
 0x553   :  { %v8656_v49 = vld [vmem:[%s11003_s8 + $0x228] ss:$12 sps:$4 sm:$0xff]  }
 0x554   :  { %5262 = vmatpush2.bf16.msra.mxu1 %v8564_v30  ;;  %v8661_v30 = vld [vmem:[%s11003_s8 + $0x214] ss:$12 sps:$4 sm:$0xff]  }
 0x555   :  { %5287 = vmatpush1.bf16.msra.mxu0 %v8567_v58  ;;  %7569 = vmatprep.subr.bf16.mxu1 %v8570_v33  ;;  %v8626_v58 = vld [vmem:[%s11003_s8 + $0x18] ss:$12 sps:$4 sm:$0xff]  }
 0x556   :  { %7591 = vmatprep.subr.bf16.mxu0 %v8571_v38  ;;  %v8631_v33 = vld [vmem:[%s11003_s8 + $0x4] ss:$12 sps:$4 sm:$0xff]  }
 0x557   :  { %7313 = vmatmul.mubr.msk.bf16.vlgmr.msra.gmra.mxu1 %vm10481_vm7, %v10486_v44  ;;  %v8659_v38 = vld [vmem:[%s11003_s8 + $0x210] ss:$12 sps:$4 sm:$0xff]  }
 0x558   :  { %7315 = vmatmul.mubr.msk.bf16.vlgmr.msra.gmra.mxu0 %vm2404_vm6, %v10507_v16  ;;  %7570 = vmatpush3.bf16.msra.mxu1 %v8572_v39  ;;  %v8664_v39 = vld [vmem:[%s11003_s8 + $0x1fc] ss:$12 sps:$4 sm:$0xff]  }
 0x559   :  { %7318 = vmatprep.mubr.msk.bf16.mxu1 %vm10463_vm15, %v10471_v31  ;;  %7592 = vmatpush3.bf16.msra.mxu0 %v8573_v42  ;;  %v8585_v31 = vld [vmem:[#allocation2 + $0x330] ss:$20 sps:$4 sm:$0xff]   ;;  %v8634_v42 = vld [vmem:[%s11003_s8 + $0x16c] ss:$12 sps:$4 sm:$0xff]  }
 0x55a   :  { %7324 = vmatprep.mubr.msk.bf16.mxu0 %vm10467_vm1, %v10479_v37  ;;  %7571 = vmatprep.subr.bf16.mxu1 %v8574_v45  ;;  %v8588_v37 = vld [vmem:[#allocation2 + $0x88] ss:$20 sps:$4 sm:$0xff]   ;;  %v8662_v45 = vld [vmem:[%s11003_s8 + $0x1f8] ss:$12 sps:$4 sm:$0xff]  }
 0x55b   :  { %7593 = vmatprep.subr.bf16.mxu0 %v8575_v22  ;;  %v8667_v22 = vld [vmem:[%s11003_s8 + $0x1e4] ss:$12 sps:$4 sm:$0xff]  }
 0x55c   :  { %7572 = vmatpush3.bf16.msra.mxu1 %v8576_v47  ;;  %v8632_v47 = vld [vmem:[%s11003_s8 + $0x168] ss:$12 sps:$4 sm:$0xff]  }
 0x55d   :  { %7594 = vmatpush3.bf16.msra.mxu0 %v8577_v50  ;;  %7573 = vmatprep.subr.bf16.mxu1 %v8578_v51  ;;  %v8637_v50 = vld [vmem:[%s11003_s8 + $0x154] ss:$12 sps:$4 sm:$0xff]  }
 0x55e   :  { %7595 = vmatprep.subr.bf16.mxu0 %v8579_v59  ;;  %v8665_v51 = vld [vmem:[%s11003_s8 + $0x1e0] ss:$12 sps:$4 sm:$0xff]  }
 0x55f   :  { %v8670_v59 = vld [vmem:[%s11003_s8 + $0x1cc] ss:$12 sps:$4 sm:$0xff]  }
 0x560   :  { %7574 = vmatpush3.bf16.msra.mxu1 %v8580_v24  ;;  %v8635_v24 = vld [vmem:[%s11003_s8 + $0x150] ss:$12 sps:$4 sm:$0xff]  }
 0x561   :  { %7596 = vmatpush3.bf16.msra.mxu0 %v8581_v40  ;;  %7575 = vmatprep.subr.bf16.mxu1 %v8582_v32  ;;  %v8640_v40 = vld [vmem:[%s11003_s8 + $0x13c] ss:$12 sps:$4 sm:$0xff]  }
 0x562   :  { %7597 = vmatprep.subr.bf16.mxu0 %v8583_v48  ;;  %v8668_v32 = vld [vmem:[%s11003_s8 + $0x1c8] ss:$12 sps:$4 sm:$0xff]  }
 0x563   :  { %v8673_v48 = vld [vmem:[%s11003_s8 + $0x1b4] ss:$12 sps:$4 sm:$0xff]  }
 0x564   :  { %7576 = vmatpush3.bf16.msra.mxu1 %v8584_v29  ;;  %v8638_v29 = vld [vmem:[%s11003_s8 + $0x138] ss:$12 sps:$4 sm:$0xff]  }
 0x565   :  { %7598 = vmatpush3.bf16.msra.mxu0 %v8585_v31  ;;  %7577 = vmatprep.subr.bf16.mxu1 %v8586_v57  ;;  %v8643_v31 = vld [vmem:[%s11003_s8 + $0x124] ss:$12 sps:$4 sm:$0xff]  }
 0x566   :  { %7599 = vmatprep.subr.bf16.mxu0 %v8587_v5  ;;  %v8671_v57 = vld [vmem:[%s11003_s8 + $0x1b0] ss:$12 sps:$4 sm:$0xff]  }
 0x567   :  { %v8676_v5 = vld [vmem:[%s11003_s8 + $0x19c] ss:$12 sps:$4 sm:$0xff]  }
 0x568   :  { %7578 = vmatpush3.bf16.msra.mxu1 %v8588_v37  ;;  %v8641_v37 = vld [vmem:[%s11003_s8 + $0x120] ss:$12 sps:$4 sm:$0xff]  }
 0x569   :  { %7600 = vmatpush3.bf16.msra.mxu0 %v8589_v62  ;;  %7579 = vmatprep.subr.bf16.mxu1 %v8590_v63  ;;  %v8646_v62 = vld [vmem:[%s11003_s8 + $0x10c] ss:$12 sps:$4 sm:$0xff]  }
 0x56a   :  { %7601 = vmatprep.subr.bf16.mxu0 %v8591_v55  ;;  %v8674_v63 = vld [vmem:[%s11003_s8 + $0x198] ss:$12 sps:$4 sm:$0xff]  }
 0x56b   :  { %v8679_v55 = vld [vmem:[%s11003_s8 + $0x184] ss:$12 sps:$4 sm:$0xff]  }
 0x56c   :  { %7580 = vmatpush3.bf16.msra.mxu1 %v8592_v1  ;;  %v8644_v1 = vld [vmem:[%s11003_s8 + $0x108] ss:$12 sps:$4 sm:$0xff]  }
 0x56d   :  { %7602 = vmatpush3.bf16.msra.mxu0 %v8593_v2  ;;  %7581 = vmatprep.subr.bf16.mxu1 %v8594_v3  ;;  %v8649_v2 = vld [vmem:[%s11003_s8 + $0xf4] ss:$12 sps:$4 sm:$0xff]  }
 0x56e   :  { %7603 = vmatprep.subr.bf16.mxu0 %v8595_v4  ;;  %v8677_v3 = vld [vmem:[%s11003_s8 + $0x180] ss:$12 sps:$4 sm:$0xff]  }
 0x56f   :  { %v8682_v4 = vld [vmem:[%s11003_s8 + $0x2ec] ss:$12 sps:$4 sm:$0xff]  }
 0x570   :  { %7582 = vmatpush3.bf16.msra.mxu1 %v8596_v61  ;;  %v8647_v61 = vld [vmem:[%s11003_s8 + $0xf0] ss:$12 sps:$4 sm:$0xff]  }
 0x571   :  { %7604 = vmatpush3.bf16.msra.mxu0 %v8597_v6  ;;  %7583 = vmatprep.subr.bf16.mxu1 %v8598_v53  ;;  %v8652_v6 = vld [vmem:[%s11003_s8 + $0xdc] ss:$12 sps:$4 sm:$0xff]  }
 0x572   :  { %7605 = vmatprep.subr.bf16.mxu0 %v8599_v7  ;;  %v8680_v53 = vld [vmem:[%s11003_s8 + $0x2e8] ss:$12 sps:$4 sm:$0xff]  }
 0x573   :  { %v8685_v7 = vld [vmem:[%s11003_s8 + $0x2d4] ss:$12 sps:$4 sm:$0xff]  }
 0x574   :  { %7584 = vmatpush3.bf16.msra.mxu1 %v8600_v8  ;;  %v8650_v8 = vld [vmem:[%s11003_s8 + $0xd8] ss:$12 sps:$4 sm:$0xff]  }
 0x575   :  { %7606 = vmatpush3.bf16.msra.mxu0 %v8601_v9  ;;  %7721 = vmatprep.subr.bf16.mxu1 %v8902_v56  ;;  %v8655_v9 = vld [vmem:[%s11003_s8 + $0xc4] ss:$12 sps:$4 sm:$0xff]  }
 0x576   :  { %6269 = vmatprep.subr.bf16.mxu0 %v8610_v11  ;;  %v8688_v11 = vld [vmem:[%s11003_s8 + $0x2bc] ss:$12 sps:$4 sm:$0xff]  }
 0x577   :  { %7321 = vmatmul.mubr.msk.bf16.vlgmr.msra.gmra.mxu1 %vm10473_vm5, %v10477_v35  ;;  %v8616_v35 = vld [vmem:[%s11003_s8 + $0x7c] ss:$12 sps:$4 sm:$0xff]  }
 0x578   :  { %7327 = vmatmul.mubr.msk.bf16.vlgmr.msra.gmra.mxu0 %vm10481_vm7, %v10486_v44  ;;  %7722 = vmatpush3.bf16.msra.mxu1 %v5065_v12  ;;  %v8614_v44 = vld [vmem:[%s11003_s8 + $0x78] ss:$12 sps:$4 sm:$0xff]   ;;  %v8653_v12 = vld [vmem:[%s11003_s8 + $0xc0] ss:$12 sps:$4 sm:$0xff]  }
 0x579   :  { %7723 = vmatprep.subr.bf16.mxu1 %v8902_v56  ;;  %7733 = vmatprep.mubr.msk.bf16.mxu1 %vm8903_vm3, %v8902_v56 }
 0x57a   :  { %6270 = vmatpush1.bf16.msra.mxu0 %v8608_v13  ;;  %v8686_v13 = vld [vmem:[%s11003_s8 + $0x2b8] ss:$12 sps:$4 sm:$0xff]  }
 0x57b   :  { %6271 = vmatprep.subr.bf16.mxu0 %v8613_v14  ;;  %v8691_v14 = vld [vmem:[%s11003_s8 + $0x2a4] ss:$12 sps:$4 sm:$0xff]  }
 0x57c   :  { %7724 = vmatpush3.bf16.msra.mxu1 %v8603_v17  ;;  %v8689_v17 = vld [vmem:[%s11003_s8 + $0x2a0] ss:$12 sps:$4 sm:$0xff]  }
 0x57d   :  { %7725 = vmatprep.subr.bf16.mxu1 %v8902_v56 }
 0x57e   :  { %6272 = vmatpush1.bf16.msra.mxu0 %v8611_v34  ;;  %v8694_v34 = vld [vmem:[%s11003_s8 + $0x28c] ss:$12 sps:$4 sm:$0xff]  }
 0x57f   :  { %6273 = vmatprep.subr.bf16.mxu0 %v8616_v35  ;;  %v8692_v35 = vld [vmem:[%s11003_s8 + $0x288] ss:$12 sps:$4 sm:$0xff]  }
 0x580   :  { %7726 = vmatpush3.bf16.msra.mxu1 %v8604_v41  ;;  %v8697_v41 = vld [vmem:[%s11003_s8 + $0x274] ss:$12 sps:$4 sm:$0xff]  }
 0x581   :  { %7727 = vmatprep.subr.bf16.mxu1 %v8902_v56 }
 0x582   :  { %6274 = vmatpush1.bf16.msra.mxu0 %v8614_v44 }
 0x583   :  { %6275 = vmatprep.subr.bf16.mxu0 %v8619_v18 }
 0x584   :  { %7728 = vmatpush3.bf16.msra.mxu1 %v8605_v19  ;;  %v8695_v19 = vld [vmem:[%s11003_s8 + $0x270] ss:$12 sps:$4 sm:$0xff]  }
 0x585   :  { %7729 = vmatprep.subr.bf16.mxu1 %v8902_v56 }
 0x586   :  { %6276 = vmatpush1.bf16.msra.mxu0 %v8617_v15 }
 0x587   :  { %6277 = vmatprep.subr.bf16.mxu0 %v8622_v52  ;;  %v8700_v52 = vld [vmem:[%s11003_s8 + $0x25c] ss:$12 sps:$4 sm:$0xff]  }
 0x588   :  { %7730 = vmatpush3.bf16.msra.mxu1 %v8606_v20 }
 0x589   :  { %7731 = vmatprep.subr.bf16.mxu1 %v8902_v56 }
 0x58a   :  { %6278 = vmatpush1.bf16.msra.mxu0 %v8620_v43 }
 0x58b   :  { %6279 = vmatprep.subr.bf16.mxu0 %v8625_v23 }
 0x58c   :  { %7732 = vmatpush3.bf16.msra.mxu1 %v8607_v21  ;;  %v8698_v21 = vld [vmem:[%s11003_s8 + $0x258] ss:$12 sps:$4 sm:$0xff]  }
 0x58d   :  { %6310 = vmatprep.subr.bf16.mxu1 %v8658_v27 }
 0x58e   :  { %6280 = vmatpush1.bf16.msra.mxu0 %v8623_v28  ;;  %v8703_v28 = vld [vmem:[%s11003_s8 + $0x244] ss:$12 sps:$4 sm:$0xff]  }
 0x58f   :  { %7734 = vmatmul.mubr.msk.bf16.vlgmr.msra.gmra.mxu1 %vm2404_vm6, %v10507_v16  ;;  %6281 = vmatprep.subr.bf16.mxu0 %v8628_v46  ;;  %v8629_v16 = vld [vmem:[%s11003_s8] ss:$12 sps:$4 sm:$0xff]  }
 0x590   :  { %6311 = vmatpush1.bf16.msra.mxu1 %v8656_v49  ;;  %v7096_v49 = vld [vmem:[%s11004_s9 + $0x4] ss:$8 sm:$0xf] }
 0x591   :  { %6312 = vmatprep.subr.bf16.mxu1 %v8661_v30  ;;  %v7097_v30 = vld [vmem:[%s11004_s9 + $0x4] ss:$8 sm:$0x10] }
 0x592   :  { %6282 = vmatpush1.bf16.msra.mxu0 %v8626_v58  ;;  %v8701_v58 = vld [vmem:[%s11003_s8 + $0x240] ss:$12 sps:$4 sm:$0xff]  }
 0x593   :  { %6283 = vmatprep.subr.bf16.mxu0 %v8631_v33  ;;  %v8704_v33 = vld [vmem:[%s11003_s8 + $0x170] ss:$12 sps:$4 sm:$0xff]  }
 0x594   :  { %6313 = vmatpush1.bf16.msra.mxu1 %v8659_v38  ;;  %v10749_v38 = vor.u32 %v7097_v30, %v7096_v49 }
 0x595   :  { %6314 = vmatprep.subr.bf16.mxu1 %v8664_v39 }
 0x596   :  { %6284 = vmatpush1.bf16.msra.mxu0 %v8629_v16  ;;  %v4052_v39 = vrot.slane %v10749_v38, %v9588_v25  ;;  %v4056_v16 = vrot.slane %v10749_v38, %v9591_v26 }
 0x597   :  { %6285 = vmatprep.subr.bf16.mxu0 %v8634_v42 }
 0x598   :  { %6315 = vmatpush1.bf16.msra.mxu1 %v8662_v45  ;;  %v5639_v45 = vld [vmem:[%s11003_s8 + $0x378] sm:$0xff] }
 0x599   :  { %6316 = vmatprep.subr.bf16.mxu1 %v8667_v22  ;;  %v7452_v22 = vcombine.high %v5639_v45, %v5639_v45 }
 0x59a   :  { %6286 = vmatpush2.bf16.msra.mxu0 %v8632_v47 }
 0x59b   :  { %6287 = vmatprep.subr.bf16.mxu0 %v8637_v50 }
 0x59c   :  { %6317 = vmatpush1.bf16.msra.mxu1 %v8665_v51 }
 0x59d   :  { %6318 = vmatprep.subr.bf16.mxu1 %v8670_v59 }
 0x59e   :  { %6288 = vmatpush2.bf16.msra.mxu0 %v8635_v24 }
 0x59f   :  { %6289 = vmatprep.subr.bf16.mxu0 %v8640_v40 }
 0x5a0   :  { %6319 = vmatpush1.bf16.msra.mxu1 %v8668_v32 }
 0x5a1   :  { %6320 = vmatprep.subr.bf16.mxu1 %v8673_v48 }
 0x5a2   :  { %6290 = vmatpush2.bf16.msra.mxu0 %v8638_v29 }
 0x5a3   :  { %6291 = vmatprep.subr.bf16.mxu0 %v8643_v31 }
 0x5a4   :  { %6321 = vmatpush1.bf16.msra.mxu1 %v8671_v57 }
 0x5a5   :  { %6322 = vmatprep.subr.bf16.mxu1 %v8676_v5 }
 0x5a6   :  { %6292 = vmatpush2.bf16.msra.mxu0 %v8641_v37 }
 0x5a7   :  { %6293 = vmatprep.subr.bf16.mxu0 %v8646_v62 }
 0x5a8   :  { %6323 = vmatpush1.bf16.msra.mxu1 %v8674_v63 }
 0x5a9   :  { %6324 = vmatprep.subr.bf16.mxu1 %v8679_v55  ;;  %v7335_v55 = vld [vmem:[%s10997_s2 + $0x80] sm:$0xff] }
 0x5aa   :  { %6294 = vmatpush2.bf16.msra.mxu0 %v8644_v1  ;;  %vm5470_vm11 = vcmp.lt.f32.partialorder %v7335_v55, 0.9 }
 0x5ab   :  { %6295 = vmatprep.subr.bf16.mxu0 %v8649_v2  ;;  %v7334_v2 = vld [vmem:[%s10997_s2 + $0x78] sm:$0xff]  ;;  %vm10765_vm13 = vmpackc.low %vm5470_vm11, %vm5470_vm11 }
 0x5ac   :  { %6325 = vmatpush1.bf16.msra.mxu1 %v8677_v3  ;;  %vm5469_vm12 = vcmp.lt.f32.partialorder %v7334_v2, 0.9 }
 0x5ad   :  { %6326 = vmatprep.subr.bf16.mxu1 %v8682_v4  ;;  %vm10771_vm14 = vmpackc.low %vm5469_vm12, %vm5469_vm12 }
 0x5ae   :  { %6296 = vmatpush2.bf16.msra.mxu0 %v8647_v61 }
 0x5af   :  { %6297 = vmatprep.subr.bf16.mxu0 %v8652_v6 }
 0x5b0   :  { %6327 = vmatpush2.bf16.msra.mxu1 %v8680_v53  ;;  %v7451_v53 = vcombine.low %v5639_v45, %v5639_v45 }
 0x5b1   :  { %6328 = vmatprep.subr.bf16.mxu1 %v8685_v7 }
 0x5b2   :  { %6298 = vmatpush2.bf16.msra.mxu0 %v8650_v8 }
 0x5b3   :  { %6299 = vmatprep.subr.bf16.mxu0 %v8655_v9 }
 0x5b4   :  { %6329 = vmatpush2.bf16.msra.mxu1 %v8683_v10  ;;  %v8737_v10 = vld [vmem:[%s11003_s8 + $0x338] ss:$12 sps:$4 sm:$0xff]  }
 0x5b5   :  { %6330 = vmatprep.subr.bf16.mxu1 %v8688_v11 }
 0x5b6   :  { %6300 = vmatpush2.bf16.msra.mxu0 %v8653_v12  ;;  %v6261_v12 = vsel %vm2408_vm4, %v7451_v53, 0 }
 0x5b7   :  { %7466 = vmatprep.subr.msk.bf16.mxu0 %vm2408_vm4, %v7452_v22 }
 0x5b8   :  { %6331 = vmatpush2.bf16.msra.mxu1 %v8686_v13  ;;  %v8724_v13 = vld [vmem:[%s11003_s8 + $0x364] ss:$12 sps:$4 sm:$0xff]  }
 0x5b9   :  { %6332 = vmatprep.subr.bf16.mxu1 %v8691_v14  ;;  %v8722_v14 = vld [vmem:[%s11003_s8 + $0x360] ss:$12 sps:$4 sm:$0xff]  }
 0x5bc   :  { %6333 = vmatpush2.bf16.msra.mxu1 %v8689_v17  ;;  %v8728_v17 = vld [vmem:[%s11003_s8 + $0x34c] ss:$12 sps:$4 sm:$0xff]  }
 0x5bd   :  { %6334 = vmatprep.subr.bf16.mxu1 %v8694_v34  ;;  %v8726_v34 = vld [vmem:[%s11003_s8 + $0x348] ss:$12 sps:$4 sm:$0xff]  }
 0x5bf   :  { %v5101_v44 = vpop.f32.mrf.mxu1 }
 0x5c0   :  { %v5142_v18 = vpop.f32.mrf.mxu0  ;;  %6335 = vmatpush2.bf16.msra.mxu1 %v8692_v35  ;;  %v5102_v42 = vadd.f32 %v5101_v44, %v4052_v39  ;;  %v8732_v35 = vld [vmem:[%s11003_s8 + $0x334] ss:$12 sps:$4 sm:$0xff]   ;;  %v8736_v44 = vld [vmem:[%s11003_s8 + $0x31c] ss:$12 sps:$4 sm:$0xff]  }
 0x5c1   :  { %v5103_v15 = vpop.f32.mrf.mxu1  ;;  %6336 = vmatprep.subr.bf16.mxu1 %v8697_v41 }
 0x5c2   :  { %v5144_v20 = vpop.f32.mrf.mxu0  ;;  %v5104_v47 = vadd.f32 %v5103_v15, %v4056_v16  ;;  %v5143_v50 = vadd.f32 %v5142_v18, %v5102_v42 }
 0x5c3   :  { %v5105_v43 = vpop.f32.mrf.mxu1 }
 0x5c4   :  { %v5146_v23 = vpop.f32.mrf.mxu0  ;;  %6337 = vmatpush2.bf16.msra.mxu1 %v8695_v19  ;;  %v5145_v59 = vadd.f32 %v5144_v20, %v5104_v47  ;;  %v8734_v19 = vld [vmem:[%s11003_s8 + $0x318] ss:$12 sps:$4 sm:$0xff]   ;;  %v8738_v43 = vld [vmem:[%s11003_s8 + $0x300] ss:$12 sps:$4 sm:$0xff]  }
 0x5c5   :  { %v5106_v27 = vpop.f32.mrf.mxu1  ;;  %6338 = vmatprep.subr.bf16.mxu1 %v8700_v52  ;;  %v8740_v52 = vld [vmem:[%s11003_s8 + $0x304] ss:$12 sps:$4 sm:$0xff]  }
 0x5c6   :  { %v5147_v46 = vpop.f32.mrf.mxu0  ;;  %v8742_v23 = vld [vmem:[%s11003_s8 + $0x2f0] ss:$12 sps:$4 sm:$0xff]   ;;  %v4064_v27 = vrot.slane %v10749_v38, %v9622_v60 }
 0x5c8   :  { %6339 = vmatpush2.bf16.msra.mxu1 %v8698_v21  ;;  %v4060_v21 = vrot.slane %v10749_v38, %v9608_v54 }
 0x5c9   :  { %6340 = vmatprep.subr.bf16.mxu1 %v8703_v28 }
 0x5cc   :  { %6341 = vmatpush2.bf16.msra.mxu1 %v8701_v58 }
 0x5cd   :  { %7620 = vmatprep.subr.bf16.mxu1 %v8704_v33 }
 0x5d7   :  { %v5183_v51 = vpop.f32.mrf.mxu1 }
 0x5d8   :  { %v5184_v24 = vadd.f32 %v5183_v51, %v5143_v50 }
 0x5d9   :  { %v5185_v40 = vpop.f32.mrf.mxu1 }
 0x5da   :  { %v5438_v32 = vmin.f32 %v5184_v24, 0.0  ;;  %v5186_v48 = vadd.f32 %v5185_v40, %v5145_v59  ;;  %vm5433_vm9 = vcmp.gt.f32.partialorder %v5184_v24, 0.0 }
 0x5db   :  { %v5187_v29 = vpop.f32.mrf.mxu1 }
 0x5dc   :  { %v5443_v31 = vmul.f32 1.442695, %v5438_v32  ;;  %v5439_v57 = vmin.f32 %v5186_v48, 0.0  ;;  %vm5434_vm10 = vcmp.gt.f32.partialorder %v5186_v48, 0.0  ;;  %v7337_v29 = vld [vmem:[%s10997_s2 + $0x90] sm:$0xff] }
 0x5dd   :  { %v5188_v5 = vpop.f32.mrf.mxu1  ;;  %vm5472_vm1 = vcmp.lt.f32.partialorder %v7337_v29, 0.9  ;;  %v8744_v29 = vld [vmem:[%s11003_s8 + $0x308] ss:$12 sps:$4 sm:$0xff]  }
 0x5de   :  { %8797 = vpow2.f32 %v5443_v31  ;;  %v5445_v37 = vmul.f32 1.442695, %v5439_v57  ;;  %v7336_v57 = vld [vmem:[%s10997_s2 + $0x88] sm:$0xff]  ;;  %vm10828_vm7 = vmpackc.low %vm5472_vm1, %vm5472_vm1 }
 0x5df   :  { %vm5471_vm5 = vcmp.lt.f32.partialorder %v7336_v57, 0.9  ;;  %v8745_v57 = vld [vmem:[%s11003_s8 + $0x2d8] ss:$12 sps:$4 sm:$0xff]  }
 0x5e0   :  { %8799 = vpow2.f32 %v5445_v37  ;;  %vm10834_vm8 = vmpackc.low %vm5471_vm5, %vm5471_vm5 }
 0x5eb   :  { %v8798_v62 = vpop.eup %8797 }
 0x5ec   :  { %v7329_v63 = vadd.f32 -1.0, %v8798_v62 }
 0x5ed   :  { %v8800_v1 = vpop.eup %8799 }
 0x5ee   :  { %v5458_v3 = vsel %vm5433_vm9, %v5184_v24, %v7329_v63  ;;  %v7330_v4 = vadd.f32 -1.0, %v8800_v1  ;;  %v8752_v1 = vld [vmem:[%s11003_s8 + $0x1d0] ss:$12 sps:$4 sm:$0xff]  }
 0x5ef   :  { %v5474_v61 = vmul.f32 1.1111112, %v5458_v3 }
 0x5f0   :  { %v5459_v6 = vsel %vm5434_vm10, %v5186_v48, %v7330_v4  ;;  %v8705_v4 = vld [vmem:[%s11003_s8 + $0xb0] ss:$12 sps:$4 sm:$0xff]  }
 0x5f1   :  { %v5475_v7 = vmul.f32 1.1111112, %v5459_v6  ;;  %v10775_v11 = vpack.c.bf16 %v5474_v61, %v5474_v61  ;;  %v8706_v6 = vld [vmem:[%s11003_s8 + $0x158] ss:$12 sps:$4 sm:$0xff]  }
 0x5f3   :  { %v10769_v9 = vpack.c.bf16 %v5475_v7, %v5475_v7 }
 0x5f5   :  { %7456 = vmatprep.mubr.msk.bf16.mxu0 %vm10765_vm13, %v10769_v9 }
 0x5f6   :  { %7459 = vmatmul.mubr.msk.bf16.vlgmr.msra.gmra.mxu0 %vm10771_vm14, %v10775_v11 }
 0x5f7   :  { %6356 = vmatpush1.bf16.msra.mxu0 %v6261_v12  ;;  %6383 = vmatprep.mubr.bf16.mxu0 %v8900_v0  ;;  %v8730_v0 = vld [vmem:[%s11003_s8 + $0x330] ss:$12 sps:$4 sm:$0xff]  }
 0x5f8   :  { %6357 = vmatprep.subr.bf16.mxu0 %v8724_v13  ;;  %v8707_v13 = vld [vmem:[%s11003_s8 + $0x98] ss:$12 sps:$4 sm:$0xff]  }
 0x5fb   :  { %6358 = vmatpush1.bf16.msra.mxu0 %v8722_v14 }
 0x5fc   :  { %6359 = vmatprep.subr.bf16.mxu0 %v8728_v17  ;;  %v8708_v17 = vld [vmem:[%s11003_s8 + $0x140] ss:$12 sps:$4 sm:$0xff]  }
 0x5ff   :  { %6360 = vmatpush1.bf16.msra.mxu0 %v8726_v34 }
 0x600   :  { %v5224_v41 = vpop.f32.mrf.mxu0  ;;  %6361 = vmatprep.subr.bf16.mxu0 %v8732_v35 }
 0x601   :  { %v5225_v28 = vadd.f32 %v5224_v41, %v4060_v21  ;;  %v8709_v41 = vld [vmem:[%s11003_s8 + $0x80] ss:$12 sps:$4 sm:$0xff]  }
 0x602   :  { %v5226_v18 = vpop.f32.mrf.mxu0  ;;  %v8716_v21 = vld [vmem:[%s11003_s8 + $0xe0] ss:$12 sps:$4 sm:$0xff]  }
 0x603   :  { %6362 = vmatpush1.bf16.msra.mxu0 %v8730_v0  ;;  %v5227_v49 = vadd.f32 %v5226_v18, %v4064_v27  ;;  %v8712_v18 = vld [vmem:[%s11003_s8 + $0x110] ss:$12 sps:$4 sm:$0xff]  }
 0x604   :  { %v5228_v15 = vpop.f32.mrf.mxu0  ;;  %6363 = vmatprep.subr.bf16.mxu0 %v8736_v44  ;;  %v8711_v44 = vld [vmem:[%s11003_s8 + $0x68] ss:$12 sps:$4 sm:$0xff]  }
 0x605   :  { %v4068_v15 = vrot.slane %v10749_v38, %v9673_v36  ;;  %v8717_v36 = vld [vmem:[%s11003_s8 + $0x20] ss:$12 sps:$4 sm:$0xff]  }
 0x606   :  { %v5229_v20 = vpop.f32.mrf.mxu0 }
 0x607   :  { %6364 = vmatpush1.bf16.msra.mxu0 %v8734_v19  ;;  %v8713_v19 = vld [vmem:[%s11003_s8 + $0x50] ss:$12 sps:$4 sm:$0xff]   ;;  %v8714_v20 = vld [vmem:[%s11003_s8 + $0xf8] ss:$12 sps:$4 sm:$0xff]  }
 0x608   :  { %6365 = vmatprep.subr.bf16.mxu0 %v8740_v52 }
 0x60b   :  { %6366 = vmatpush1.bf16.msra.mxu0 %v8738_v43  ;;  %v8715_v43 = vld [vmem:[%s11003_s8 + $0x38] ss:$12 sps:$4 sm:$0xff]  }
 0x60c   :  { %7642 = vmatprep.subr.bf16.mxu0 %v8742_v23 }
 0x617   :  { %v5265_v46 = vpop.f32.mrf.mxu1 }
 0x618   :  { %v5266_v30 = vadd.f32 %v5265_v46, %v5225_v28  ;;  %v5306_v58 = vpop.f32.mrf.mxu0  ;;  %v8719_v28 = vld [vmem:[%s11003_s8 + $0xc8] ss:$12 sps:$4 sm:$0xff]  }
 0x619   :  { %v5267_v33 = vpop.f32.mrf.mxu1 }
 0x61a   :  { %v5307_v39 = vadd.f32 %v5306_v58, %v5266_v30  ;;  %v5268_v16 = vadd.f32 %v5267_v33, %v5227_v49  ;;  %v5308_v42 = vpop.f32.mrf.mxu0  ;;  %v8721_v58 = vld [vmem:[%s11003_s8 + $0x8] ss:$12 sps:$4 sm:$0xff]  }
 0x61b   :  { %v5269_v45 = vpop.f32.mrf.mxu1 }
 0x61c   :  { %v5440_v22 = vmin.f32 %v5307_v39, 0.0  ;;  %v5309_v47 = vadd.f32 %v5308_v42, %v5268_v16  ;;  %v5310_v50 = vpop.f32.mrf.mxu0  ;;  %vm5435_vm15 = vcmp.gt.f32.partialorder %v5307_v39, 0.0 }
 0x61d   :  { %v5270_v51 = vpop.f32.mrf.mxu1  ;;  %v8733_v50 = vld [vmem:[%s11003_s8 + $0x350] ss:$12 sps:$4 sm:$0xff]  }
 0x61e   :  { %v5447_v59 = vmul.f32 1.442695, %v5440_v22  ;;  %v5441_v24 = vmin.f32 %v5309_v47, 0.0  ;;  %v5311_v40 = vpop.f32.mrf.mxu0  ;;  %vm5436_vm0 = vcmp.gt.f32.partialorder %v5309_v47, 0.0  ;;  %v7338_v51 = vld [vmem:[%s10997_s2 + $0x98] sm:$0xff] }
 0x620   :  { %8801 = vpow2.f32 %v5447_v59  ;;  %v5449_v32 = vmul.f32 1.442695, %v5441_v24  ;;  %v8741_v24 = vld [vmem:[%s11003_s8 + $0x320] ss:$12 sps:$4 sm:$0xff]  }
 0x622   :  { %8803 = vpow2.f32 %v5449_v32 }
 0x62d   :  { %v8802_v60 = vpop.eup %8801 }
 0x62e   :  { %v7331_v48 = vadd.f32 -1.0, %v8802_v60 }
 0x62f   :  { %v8804_v31 = vpop.eup %8803 }
 0x630   :  { %v5460_v5 = vsel %vm5435_vm15, %v5307_v39, %v7331_v48  ;;  %v7332_v37 = vadd.f32 -1.0, %v8804_v31  ;;  %v8725_v39 = vld [vmem:[%s11003_s8 + $0x380] ss:$0 sps:$4 sm:$0xff]   ;;  %v8743_v48 = vld [vmem:[%s11003_s8 + $0x230] ss:$12 sps:$4 sm:$0xff]  }
 0x631   :  { %v5476_v62 = vmul.f32 1.1111112, %v5460_v5  ;;  %v6267_v22 = vsel %vm2408_vm4, %v8725_v39, 0  ;;  %vm5473_vm4 = vcmp.lt.f32.partialorder %v7338_v51, 0.9 }
 0x632   :  { %v5461_v63 = vsel %vm5436_vm0, %v5309_v47, %v7332_v37  ;;  %v8729_v47 = vld [vmem:[%s11003_s8 + $0x368] ss:$12 sps:$4 sm:$0xff]   ;;  %v8746_v5 = vld [vmem:[%s11003_s8 + $0x218] ss:$12 sps:$4 sm:$0xff]   ;;  %v8748_v37 = vld [vmem:[%s11003_s8 + $0x200] ss:$12 sps:$4 sm:$0xff]  }
 0x633   :  { %v5477_v55 = vmul.f32 1.1111112, %v5461_v63  ;;  %v10841_v61 = vpack.c.bf16 %v5476_v62, %v5476_v62  ;;  %v8749_v62 = vld [vmem:[%s11003_s8 + $0x2a8] ss:$12 sps:$4 sm:$0xff]  }
 0x634   :  { %v8750_v63 = vld [vmem:[%s11003_s8 + $0x1e8] ss:$12 sps:$4 sm:$0xff]  }
 0x635   :  { %v10832_v2 = vpack.c.bf16 %v5477_v55, %v5477_v55  ;;  %v8751_v55 = vld [vmem:[%s11003_s8 + $0x290] ss:$12 sps:$4 sm:$0xff]  }
 0x637   :  { %v7585_v53 = vpop.f32.mrf.mxu1  ;;  %7462 = vmatprep.mubr.msk.bf16.mxu1 %vm10828_vm7, %v10832_v2 }
 0x638   :  { %v7607_v7 = vpop.f32.mrf.mxu0  ;;  %7465 = vmatmul.mubr.msk.bf16.vlgmr.msra.gmra.mxu1 %vm10834_vm8, %v10841_v61 }
 0x639   :  { %7621 = vmatpush3.bf16.msra.mxu1 %v8705_v4  ;;  %v7586_v12 = vpop.f32.mrf.mxu1  ;;  %7470 = vmatprep.mubr.msk.bf16.mxu1 %vm10765_vm13, %v10769_v9  ;;  %v8710_v9 = vld [vmem:[%s11003_s8 + $0x128] ss:$12 sps:$4 sm:$0xff]   ;;  %v8754_v4 = vld [vmem:[%s11003_s8 + $0x1b8] ss:$12 sps:$4 sm:$0xff]  }
 0x63a   :  { %v7608_v14 = vpop.f32.mrf.mxu0  ;;  %7622 = vmatprep.subr.bf16.mxu1 %v8706_v6  ;;  %v7587_v52 = vadd.f32 %v7586_v12, %v7585_v53  ;;  %v8755_v6 = vld [vmem:[%s11003_s8 + $0x260] ss:$12 sps:$4 sm:$0xff]   ;;  %v8758_v12 = vld [vmem:[%s11003_s8 + $0x188] ss:$12 sps:$4 sm:$0xff]  }
 0x63b   :  { %v7588_v34 = vpop.f32.mrf.mxu1  ;;  %v7609_v27 = vadd.f32 %v7608_v14, %v7607_v7  ;;  %v8756_v53 = vld [vmem:[%s11003_s8 + $0x1a0] ss:$12 sps:$4 sm:$0xff]   ;;  %v8757_v7 = vld [vmem:[%s11003_s8 + $0x248] ss:$12 sps:$4 sm:$0xff]  }
 0x63c   :  { %v7610_v35 = vpop.f32.mrf.mxu0  ;;  %v5348_v23 = vadd.f32 %v7587_v52, %v4068_v15 }
 0x63d   :  { %7623 = vmatpush3.bf16.msra.mxu1 %v8707_v13  ;;  %v7589_v0 = vpop.f32.mrf.mxu1 }
 0x63e   :  { %v7611_v8 = vpop.f32.mrf.mxu0  ;;  %7624 = vmatprep.subr.bf16.mxu1 %v8708_v17  ;;  %v5388_v38 = vadd.f32 %v7609_v27, %v5348_v23 }
 0x641   :  { %7625 = vmatpush3.bf16.msra.mxu1 %v8709_v41 }
 0x642   :  { %7626 = vmatprep.subr.bf16.mxu1 %v8710_v9 }
 0x645   :  { %7627 = vmatpush3.bf16.msra.mxu1 %v8711_v44 }
 0x646   :  { %7628 = vmatprep.subr.bf16.mxu1 %v8712_v18 }
 0x649   :  { %7629 = vmatpush3.bf16.msra.mxu1 %v8713_v19 }
 0x64a   :  { %7630 = vmatprep.subr.bf16.mxu1 %v8714_v20 }
 0x64d   :  { %7631 = vmatpush3.bf16.msra.mxu1 %v8715_v43 }
 0x64e   :  { %7632 = vmatprep.subr.bf16.mxu1 %v8716_v21 }
 0x64f   :  { %v5427_v46 = vpop.f32.mrf.mxu1 }
 0x650   :  { %v5428_v49 = vadd.f32 %v5427_v46, %v5388_v38 }
 0x651   :  { %7633 = vmatpush3.bf16.msra.mxu1 %v8717_v36  ;;  %v7735_v30 = vpop.f32.mrf.mxu1 }
 0x652   :  { %v5442_v33 = vmin.f32 %v5428_v49, 0.0  ;;  %7634 = vmatprep.subr.bf16.mxu1 %v8719_v28 }
 0x653   :  { %v5430_v16 = vpop.f32.mrf.mxu1 }
 0x654   :  { %v5451_v42 = vmul.f32 1.442695, %v5442_v33 }
 0x655   :  { %7635 = vmatpush3.bf16.msra.mxu1 %v8721_v58  ;;  %v7736_v45 = vpop.f32.mrf.mxu1 }
 0x656   :  { %8805 = vpow2.f32 %v5451_v42  ;;  %7737 = vmatprep.subr.bf16.mxu1 %v8902_v56 }
 0x658   :  { %7473 = vmatmul.mubr.msk.bf16.vlgmr.msra.gmra.mxu1 %vm10771_vm14, %v10775_v11 }
 0x659   :  { %7738 = vmatpush3.bf16.msra.mxu1 %v6267_v22  ;;  %7749 = vmatprep.mubr.msk.bf16.mxu1 %vm8903_vm3, %v8902_v56  ;;  %vm5437_vm3 = vcmp.gt.f32.partialorder %v5428_v49, 0.0 }
 0x65a   :  { %7739 = vmatprep.subr.bf16.mxu1 %v8902_v56 }
 0x65d   :  { %7740 = vmatpush3.bf16.msra.mxu1 %v8729_v47 }
 0x65e   :  { %7741 = vmatprep.subr.bf16.mxu1 %v8902_v56 }
 0x661   :  { %7742 = vmatpush3.bf16.msra.mxu1 %v8733_v50 }
 0x662   :  { %7743 = vmatprep.subr.bf16.mxu1 %v8902_v56 }
 0x663   :  { %v8806_v11 = vpop.eup %8805 }
 0x664   :  { %v7333_v59 = vadd.f32 -1.0, %v8806_v11 }
 0x665   :  { %7744 = vmatpush3.bf16.msra.mxu1 %v8737_v10 }
 0x666   :  { %v5462_v40 = vsel %vm5437_vm3, %v5428_v49, %v7333_v59  ;;  %7745 = vmatprep.subr.bf16.mxu1 %v8902_v56 }
 0x667   :  { %v5478_v32 = vmul.f32 1.1111112, %v5462_v40 }
 0x669   :  { %v5483_v60 = vsel %vm5473_vm4, %v5478_v32, 0.0  ;;  %7746 = vmatpush3.bf16.msra.mxu1 %v8741_v24 }
 0x66a   :  { %v5490_v31 = vpack.c.bf16 %v5483_v60, %v5483_v60  ;;  %7747 = vmatprep.subr.bf16.mxu1 %v8902_v56  ;;  %v8747_v56 = vld [vmem:[%s11003_s8 + $0x2c0] ss:$12 sps:$4 sm:$0xff]  }
 0x66c   :  { %7467 = vmatmul.mubr.msk.bf16.vlgmr.msra.gmra.mxu0 %vm2404_vm6, %v5490_v31 }
 0x66d   :  { %7643 = vmatpush3.bf16.msra.mxu0 %v8743_v48  ;;  %7748 = vmatpush3.bf16.msra.mxu1 %v8744_v29 }
 0x66e   :  { %7476 = vmatprep.mubr.msk.bf16.mxu0 %vm10828_vm7, %v10832_v2  ;;  %7644 = vmatprep.subr.bf16.mxu0 %v8745_v57  ;;  %v8753_v2 = vld [vmem:[%s11003_s8 + $0x278] ss:$12 sps:$4 sm:$0xff]   ;;  %s8851_s8 = scalar_lea.vmem %s6582_s21, 256 }
 0x66f   :  { %p8852_p5 = scmp.ne.s32.totalorder %s6582_s21, %s8851_s8  ;;  %p8857_p7 = scmp.lt.s32.totalorder %s8851_s8, %s8851_s8 }
 0x670   :  { %7750 = vmatmul.mubr.msk.bf16.vlgmr.msra.gmra.mxu1 %vm2404_vm6, %v5490_v31 }
 0x671   :  { %7645 = vmatpush3.bf16.msra.mxu0 %v8746_v5  ;;  %p8858_p8 = por %p8857_p7, %p8856_p6 }
 0x672   :  { %7646 = vmatprep.subr.bf16.mxu0 %v8747_v56 }
 0x673   :  { %p8859_p9 = pnand %p8858_p8, %p8852_p5 }
 0x675   :  { %7647 = vmatpush3.bf16.msra.mxu0 %v8748_v37 }
 0x676   :  { %7648 = vmatprep.subr.bf16.mxu0 %v8749_v62 }
 0x679   :  { %7649 = vmatpush3.bf16.msra.mxu0 %v8750_v63 }
 0x67a   :  { %7650 = vmatprep.subr.bf16.mxu0 %v8751_v55 }
 0x67d   :  { %7651 = vmatpush3.bf16.msra.mxu0 %v8752_v1 }
 0x67e   :  { %7652 = vmatprep.subr.bf16.mxu0 %v8753_v2 }
 0x681   :  { %7653 = vmatpush3.bf16.msra.mxu0 %v8754_v4 }
 0x682   :  { %7654 = vmatprep.subr.bf16.mxu0 %v8755_v6 }
 0x685   :  { %7655 = vmatpush3.bf16.msra.mxu0 %v8756_v53 }
 0x686   :  { %7656 = vmatprep.subr.bf16.mxu0 %v8757_v7 }
 0x689   :  { %7657 = vmatpush3.bf16.msra.mxu0 %v8758_v12 }
 0x68c   :  { %7479 = vmatmul.mubr.msk.bf16.vlgmr.msra.gmra.mxu0 %vm10834_vm8, %v10841_v61 }
 0x6b6   :  { %v6303_v13 = vpop.f32.mrf.mxu0 }
 0x6b8   :  { %v6305_v14 = vpop.f32.mrf.mxu0 }
 0x6ba   :  { %v6307_v17 = vpop.f32.mrf.mxu0 }
 0x6bc   :  { %v6308_v34 = vpop.f32.mrf.mxu0 }
 0x6f8   :  { %v6344_v35 = vpop.f32.mrf.mxu1 }
 0x6fa   :  { %v6346_v0 = vpop.f32.mrf.mxu1 }
 0x6fc   :  { %v6348_v41 = vpop.f32.mrf.mxu1 }
 0x6fe   :  { %v6349_v8 = vpop.f32.mrf.mxu1 }
 0x718   :  { %v7636_v9 = vpop.f32.mrf.mxu1 }
 0x71a   :  { %v7637_v44 = vpop.f32.mrf.mxu1 }
 0x71c   :  { %v7639_v18 = vpop.f32.mrf.mxu1 }
 0x71e   :  { %v7640_v19 = vpop.f32.mrf.mxu1 }
 0x71f   :  { %8862 = shalt.err (!%p8859_p9)
}
 0x720   :  { %6584 = dma.vmem_to_hbm [thread:$0]  %s6582_s21, 256, %s11005_s10, [#allocation4]   ;;  %v7339_v3 = vld [vmem:[%s11004_s9 + $0x5] ss:$8 sm:$0x7]  ;;  %v7638_v11 = vadd.f32 %v7637_v44, %v7636_v9 }
 0x721   :  { %v5645_v61 = vrot.slane %v7339_v3, %v9588_v25  ;;  %v5649_v15 = vrot.slane %v7339_v3, %v9591_v26  ;;  %v5653_v10 = vrot.slane %v7339_v3, %v9608_v54  ;;  %s8907_s9 = smov [#allocation6]  }
 0x722   :  { %s6591_s10 = sshll.u32 %s8907_s9, 4  ;;  %s6592_s10 = int_to_ptr.vmem [resolvable:$true] %s6591_s10 }
 0x723   :  { %v6304_v52 = vadd.f32 %v6303_v13, %v5645_v61  ;;  %v6306_v20 = vadd.f32 %v6305_v14, %v5649_v15  ;;  %v6427_v60 = vadd.f32 %v7638_v11, %v5653_v10  ;;  %s8871_s24 = scalar_lea.vmem %s6592_s10, 384  ;;  %p8876_p11 = scmp.lt.s32.totalorder %s6592_s10, %s6592_s10 }
 0x724   :  { %p8872_p10 = scmp.ne.s32.totalorder %s6592_s10, %s8871_s24  ;;  %p8877_p12 = scmp.lt.s32.totalorder %s8871_s24, %s8871_s24 }
 0x725   :  { %v6345_v43 = vadd.f32 %v6344_v35, %v6304_v52  ;;  %v6347_v21 = vadd.f32 %v6346_v0, %v6306_v20 }
 0x726   :  { %p8878_p13 = por %p8877_p12, %p8876_p11 }
 0x728   :  { %p8879_p0 = pnand %p8878_p13, %p8872_p10 }
 0x72c   :  { %v6385_v23 = vpop.f32.mrf.mxu0 }
 0x72d   :  { %v6386_v27 = vadd.f32 %v6385_v23, %v6345_v43 }
 0x72e   :  { %v6387_v36 = vpop.f32.mrf.mxu0 }
 0x72f   :  { %v6515_v38 = vmin.f32 %v6386_v27, 20.0  ;;  %v6388_v28 = vadd.f32 %v6387_v36, %v6347_v21  ;;  %vm6512_vm6 = vcmp.gt.f32.partialorder %v6386_v27, 20.0 }
 0x730   :  { %v6506_v46 = vpop.f32.mrf.mxu1  ;;  %v6389_v49 = vpop.f32.mrf.mxu0 }
 0x731   :  { %v6518_v30 = vmul.f32 1.442695, %v6515_v38  ;;  %v6516_v58 = vmin.f32 %v6388_v28, 20.0  ;;  %vm6513_vm11 = vcmp.gt.f32.partialorder %v6388_v28, 20.0 }
 0x732   :  { %v7751_v33 = vpop.f32.mrf.mxu1  ;;  %v6390_v39 = vpop.f32.mrf.mxu0 }
 0x733   :  { %8807 = vpow2.f32 %v6518_v30  ;;  %v6520_v16 = vmul.f32 1.442695, %v6516_v58 }
 0x734   :  { %v6509_v25 = vpop.f32.mrf.mxu1 }
 0x735   :  { %8809 = vpow2.f32 %v6520_v16 }
 0x736   :  { %v7752_v26 = vpop.f32.mrf.mxu1 }
 0x740   :  { %v8808_v42 = vpop.eup %8807 }
 0x741   :  { %v6524_v45 = vadd.f32 1.0, %v8808_v42  ;;  %v6527_v50 = vmul.f32 -0.5, %v8808_v42  ;;  %v6530_v40 = vand.u32 2147483647, %v8808_v42 }
 0x742   :  { %v8810_v22 = vpop.eup %8809 }
 0x743   :  { %8811 = vlog2.f32 %v6524_v45  ;;  %v6533_v47 = vadd.f32 1.0, %v8810_v22  ;;  %v6536_v51 = vmul.f32 -0.5, %v8810_v22  ;;  %v6528_v24 = vadd.f32 1.0, %v6527_v50 }
 0x744   :  { %v6539_v57 = vand.u32 2147483647, %v8810_v22  ;;  %vm6531_vm9 = vcmp.lt.f32.partialorder %v6530_v40, 0.0004427343 }
 0x745   :  { %8813 = vlog2.f32 %v6533_v47  ;;  %v6537_v48 = vadd.f32 1.0, %v6536_v51  ;;  %v6529_v37 = vmul.f32 %v8808_v42, %v6528_v24 }
 0x746   :  { %vm6540_vm10 = vcmp.lt.f32.partialorder %v6539_v57, 0.0004427343 }
 0x747   :  { %v6538_v2 = vmul.f32 %v8810_v22, %v6537_v48 }
 0x74c   :  { %v7658_v59 = vpop.f32.mrf.mxu0 }
 0x74e   :  { %v7659_v32 = vpop.f32.mrf.mxu0 }
 0x74f   :  { %v7660_v29 = vadd.f32 %v7659_v32, %v7658_v59 }
 0x750   :  { %v8812_v31 = vpop.eup %8811  ;;  %v7661_v5 = vpop.f32.mrf.mxu0 }
 0x751   :  { %v6526_v56 = vmul.f32 0.6931472, %v8812_v31  ;;  %v6467_v62 = vadd.f32 %v7660_v29, %v6427_v60 }
 0x752   :  { %v8814_v63 = vpop.eup %8813  ;;  %v7662_v55 = vpop.f32.mrf.mxu0 }
 0x753   :  { %v6532_v54 = vsel %vm6531_vm9, %v6529_v37, %v6526_v56  ;;  %v6535_v1 = vmul.f32 0.6931472, %v8814_v63  ;;  %v6507_v4 = vadd.f32 %v6506_v46, %v6467_v62 }
 0x754   :  { %v6551_v6 = vsel %vm6512_vm6, %v6386_v27, %v6532_v54 }
 0x755   :  { %v6554_v53 = vsub.f32 0.0, %v6551_v6  ;;  %v6541_v7 = vsel %vm6540_vm10, %v6538_v2, %v6535_v1  ;;  %v6517_v12 = vmin.f32 %v6507_v4, 20.0  ;;  %vm6514_vm13 = vcmp.gt.f32.partialorder %v6507_v4, 20.0 }
 0x756   :  { %v6552_v13 = vsel %vm6513_vm11, %v6388_v28, %v6541_v7 }
 0x757   :  { %v6557_v14 = vmul.f32 1.442695, %v6554_v53  ;;  %v6555_v17 = vsub.f32 0.0, %v6552_v13  ;;  %v6522_v34 = vmul.f32 1.442695, %v6517_v12 }
 0x759   :  { %8815 = vpow2.f32 %v6557_v14  ;;  %v6559_v35 = vmul.f32 1.442695, %v6555_v17 }
 0x75a   :  { %8817 = vpow2.f32 %v6522_v34 }
 0x75b   :  { %8819 = vpow2.f32 %v6559_v35 }
 0x766   :  { %v8816_v0 = vpop.eup %8815 }
 0x767   :  { %v8818_v41 = vpop.eup %8817  ;;  %v6563_v8 = vadd.f32 1.0, %v8816_v0 }
 0x768   :  { %v8820_v9 = vpop.eup %8819  ;;  %v6542_v44 = vadd.f32 1.0, %v8818_v41  ;;  %v6545_v19 = vmul.f32 -0.5, %v8818_v41  ;;  %v6548_v61 = vand.u32 2147483647, %v8818_v41 }
 0x769   :  { %8821 = vrcp.f32 %v6563_v8  ;;  %v6564_v18 = vadd.f32 1.0, %v8820_v9 }
 0x76a   :  { %8823 = vlog2.f32 %v6542_v44  ;;  %v6546_v3 = vadd.f32 1.0, %v6545_v19  ;;  %vm6549_vm12 = vcmp.lt.f32.partialorder %v6548_v61, 0.0004427343 }
 0x76b   :  { %8825 = vrcp.f32 %v6564_v18 }
 0x76c   :  { %v6547_v23 = vmul.f32 %v8818_v41, %v6546_v3 }
 0x776   :  { %v8822_v15 = vpop.eup %8821 }
 0x777   :  { %v8824_v52 = vpop.eup %8823  ;;  %6572 = vst [vmem:[#allocation6] sm:$0xff] %v8822_v15 }
 0x778   :  { %v8826_v20 = vpop.eup %8825  ;;  %v6544_v43 = vmul.f32 0.6931472, %v8824_v52 }
 0x779   :  { %6573 = vst [vmem:[#allocation6 + $0x8] sm:$0xff] %v8826_v20 }
 0x77a   :  { %v6550_v21 = vsel %vm6549_vm12, %v6547_v23, %v6544_v43 }
 0x77b   :  { %v6553_v27 = vsel %vm6514_vm13, %v6507_v4, %v6550_v21 }
 0x77c   :  { %v6556_v36 = vsub.f32 0.0, %v6553_v27 }
 0x77e   :  { %v6561_v38 = vmul.f32 1.442695, %v6556_v36 }
 0x780   :  { %8827 = vpow2.f32 %v6561_v38 }
 0x78d   :  { %v8828_v28 = vpop.eup %8827 }
 0x78e   :  { %v6565_v46 = vadd.f32 1.0, %v8828_v28 }
 0x790   :  { %8829 = vrcp.f32 %v6565_v46 }
 0x79d   :  { %v8830_v49 = vpop.eup %8829 }
 0x79e   :  { %6574 = vst.msk [vmem:[#allocation6 + $0x10] sm:$0xff] %vm852_vm2, %v8830_v49 }
 0x79f   :  { %8882 = shalt.err (!%p8879_p0)
}
 0x7a0   :  { %6594 = dma.vmem_to_hbm [thread:$0]  %s6592_s10, 384, %s11006_s11, [#allocation7]  }
 0x7a1   :  { %8893 = dma.done.wait [#allocation4], 256  }
 0x7a2   :  { %8894 = vsyncadd [#allocation4], 4294967040 }
 0x7a3   :  { %8895 = dma.done.wait [#allocation7], 384  }
 0x7a4   :  { %8896 = vsyncadd [#allocation7], 4294966912 }
 0x7a5   :  { %6601 = vsyncpa [#allocation3], 1 }
 0x7a6   :  { %6602 = vsyncpa [#allocation4], 1 }
 0x7a7   :  { %6603 = vsyncpa [#allocation7], 1 }

</bundles_post_ra>
